<compile_context>
chip_gen: v5e
topology: v5e:2x2
jax: 0.10.0
libtpu: 0.0.40
codegen_flags: <defaults>
</compile_context>

<pallas_src>
import functools

import jax
import jax.numpy as jnp
import numpy as np
from jax.experimental import pallas as pl
from jax.experimental.pallas import tpu as pltpu

C_IN, C1, C2 = 3, 8, 10        # input / conv1 / conv2 channels
K1, K2 = 7, 5                  # conv kernel sizes
N_HID, N_THETA = 32, 6         # fc_loc sizes


def _dims(H, W):
    OH1, OW1 = H - K1 + 1, W - K1 + 1
    PH1, PW1 = OH1 // 2, OW1 // 2
    OH2, OW2 = PH1 - K2 + 1, PW1 - K2 + 1
    PH2, PW2 = OH2 // 2, OW2 // 2
    Wm1 = (2 * PW1 - 1) * C1   # lane width of (un-compacted) pooled conv1 acts
    Wm2 = (2 * PW2 - 1) * C2   # lane width of (un-compacted) pooled conv2 acts
    return OH1, OW1, PH1, PW1, OH2, OW2, PH2, PW2, Wm1, Wm2


# ----------------------------------------------------------------------------
# Kernel 1: conv1+pool+ReLU + conv2+pool+ReLU + fc1+ReLU + fc2  (per batch).
# ----------------------------------------------------------------------------
def _loc_fc_kernel(x_ref, a1_ref, b1_ref, a2_ref, b2_ref,
                   wf1_ref, bf1_ref, wf2_ref, bf2_ref,
                   th_ref, xb_ref, p1_ref, *, H, W):
    OH1, OW1, PH1, PW1, OH2, OW2, PH2, PW2, Wm1, Wm2 = _dims(H, W)

    # Single bf16 cast of the input (autocast approximation).
    xb_ref[...] = x_ref[0].astype(jnp.bfloat16)

    # conv1: K1 banded matmuls (OH1, W*C_IN) @ (W*C_IN, OW1*C1); the (dj, ci)
    # taps are folded into K, accumulator is a few vregs of f32.
    acc = jnp.zeros((OH1, OW1 * C1), jnp.float32)
    for di in range(K1):
        acc = acc + jnp.dot(xb_ref[di:di + OH1, :], a1_ref[di],
                            preferred_element_type=jnp.float32)
    y = acc + b1_ref[...]
    # MaxPool2d(2, 2): rows via reshape/max, columns via a shifted lane max;
    # no lane compaction (conv2's operator indexes the sparse valid lanes).
    y = y[:2 * PH1, :].reshape(PH1, 2, OW1 * C1)
    y = jnp.maximum(y[:, 0, :], y[:, 1, :])
    y = jnp.maximum(y[:, :Wm1], y[:, C1:C1 + Wm1])
    p1_ref[...] = jnp.maximum(y, 0.0).astype(jnp.bfloat16)     # (PH1, Wm1)

    # conv2: same banded structure, K = Wm1.
    acc2 = jnp.zeros((OH2, OW2 * C2), jnp.float32)
    for di in range(K2):
        acc2 = acc2 + jnp.dot(p1_ref[di:di + OH2, :], a2_ref[di],
                              preferred_element_type=jnp.float32)
    y2 = acc2 + b2_ref[...]
    y2 = y2[:2 * PH2, :].reshape(PH2, 2, OW2 * C2)
    y2 = jnp.maximum(y2[:, 0, :], y2[:, 1, :])
    y2 = jnp.maximum(y2[:, :Wm2], y2[:, C2:C2 + Wm2])
    p2 = jnp.maximum(y2, 0.0).astype(jnp.bfloat16)              # (PH2, Wm2)

    # fc_loc = Linear -> ReLU -> Linear; the PyTorch NCHW flatten is baked
    # into the row-remapped fc1 weights (one small dot per pooled row).
    h = bf1_ref[...]
    for r in range(PH2):
        h = h + jnp.dot(p2[r:r + 1, :], wf1_ref[r],
                        preferred_element_type=jnp.float32)
    h = jnp.maximum(h, 0.0).astype(jnp.bfloat16)
    th_ref[0] = jnp.dot(h, wf2_ref[...],
                        preferred_element_type=jnp.float32) + bf2_ref[...]


def localization_fc(x2d, prep, H, W):
    B = x2d.shape[0]
    OH1, OW1, PH1, PW1, OH2, OW2, PH2, PW2, Wm1, Wm2 = _dims(H, W)
    WC = W * C_IN
    return pl.pallas_call(
        functools.partial(_loc_fc_kernel, H=H, W=W),
        out_shape=jax.ShapeDtypeStruct((B, 1, N_THETA), jnp.float32),
        grid_spec=pltpu.PrefetchScalarGridSpec(
            num_scalar_prefetch=0,
            grid=(B,),
            in_specs=[
                pl.BlockSpec((1, H, WC), lambda b: (b, 0, 0)),
                pl.BlockSpec((K1, WC, OW1 * C1), lambda b: (0, 0, 0)),
                pl.BlockSpec((1, OW1 * C1), lambda b: (0, 0)),
                pl.BlockSpec((K2, Wm1, OW2 * C2), lambda b: (0, 0, 0)),
                pl.BlockSpec((1, OW2 * C2), lambda b: (0, 0)),
                pl.BlockSpec((PH2, Wm2, N_HID), lambda b: (0, 0, 0)),
                pl.BlockSpec((1, N_HID), lambda b: (0, 0)),
                pl.BlockSpec((N_HID, N_THETA), lambda b: (0, 0)),
                pl.BlockSpec((1, N_THETA), lambda b: (0, 0)),
            ],
            out_specs=pl.BlockSpec((1, 1, N_THETA), lambda b: (b, 0, 0)),
            scratch_shapes=[pltpu.VMEM((H, WC), jnp.bfloat16),
                            pltpu.VMEM((PH1, Wm1), jnp.bfloat16)],
        ),
        compiler_params=pltpu.CompilerParams(
            dimension_semantics=("parallel",)),
    )(x2d, prep["A1"], prep["b1t"], prep["A2"], prep["b2t"],
      prep["Wfc1"], prep["bfc1"], prep["Wfc2"], prep["bfc2"])


# ----------------------------------------------------------------------------
# Kernel 2: affine_grid + bilinear grid_sample (zeros pad, align_corners=False)
#           + Conv2d(3, 1, kernel_size=1), per batch, f32 sampling path.
# ----------------------------------------------------------------------------
def _sample_kernel(theta_ref, ob_ref, x_ref, r_ref, o_ref, *, H, W):
    b = pl.program_id(0)
    HW = H * W

    # 1x1 output conv commuted through grid_sample: pre-reduce channels with a
    # banded (W*C_IN, W) operator (kept in f32 to match reference numerics).
    x1 = jnp.dot(x_ref[0], r_ref[...], preferred_element_type=jnp.float32)  # (H, W)

    # Output-pixel normalized coordinates from an in-kernel iota (no DMA).
    p = jax.lax.broadcasted_iota(jnp.int32, (1, HW), 1).astype(jnp.float32)
    row = jnp.floor((p + 0.5) * (1.0 / W))   # exact: frac >= 1/(2W) >> fp eps
    colp = p - row * W
    xn = (2.0 * colp + 1.0) / W - 1.0
    yn = (2.0 * row + 1.0) / H - 1.0

    # F.affine_grid (align_corners=False); theta scalars live in SMEM.
    t00 = theta_ref[6 * b + 0]
    t01 = theta_ref[6 * b + 1]
    t02 = theta_ref[6 * b + 2]
    t10 = theta_ref[6 * b + 3]
    t11 = theta_ref[6 * b + 4]
    t12 = theta_ref[6 * b + 5]
    gx = t00 * xn + t01 * yn + t02
    gy = t10 * xn + t11 * yn + t12
    # F.grid_sample unnormalization (align_corners=False), bilinear.
    ix = ((gx + 1.0) * W - 1.0) * 0.5
    iy = ((gy + 1.0) * H - 1.0) * 0.5
    x0 = jnp.floor(ix)
    y0 = jnp.floor(iy)
    fx = ix - x0
    fy = iy - y0
    x0i = x0.astype(jnp.int32)
    y0i = y0.astype(jnp.int32)

    # Column interpolation operator (W, HW); out-of-range taps match no iota
    # row, which reproduces padding_mode='zeros'.
    w_iota = jax.lax.broadcasted_iota(jnp.int32, (W, HW), 0)
    ct = ((w_iota == x0i).astype(jnp.float32) * (1.0 - fx)
          + (w_iota == (x0i + 1)).astype(jnp.float32) * fx)
    col = jnp.dot(x1, ct, preferred_element_type=jnp.float32)    # (H, HW) f32

    # Row interpolation operator: elementwise multiply + sublane reduction.
    h_iota = jax.lax.broadcasted_iota(jnp.int32, (H, HW), 0)
    rt = ((h_iota == y0i).astype(jnp.float32) * (1.0 - fy)
          + (h_iota == (y0i + 1)).astype(jnp.float32) * fy)
    o_ref[0] = jnp.sum(rt * col, axis=0, keepdims=True) + ob_ref[0]


def sampled_output(x2d, theta, prep, H, W):
    B = x2d.shape[0]
    HW = H * W
    WC = W * C_IN
    return pl.pallas_call(
        functools.partial(_sample_kernel, H=H, W=W),
        out_shape=jax.ShapeDtypeStruct((B, 1, HW), jnp.float32),
        grid_spec=pltpu.PrefetchScalarGridSpec(
            num_scalar_prefetch=2,
            grid=(B,),
            in_specs=[
                pl.BlockSpec((1, H, WC), lambda b, th, ob: (b, 0, 0)),
                pl.BlockSpec((WC, W), lambda b, th, ob: (0, 0)),
            ],
            out_specs=pl.BlockSpec((1, 1, HW), lambda b, th, ob: (b, 0, 0)),
        ),
        compiler_params=pltpu.CompilerParams(
            dimension_semantics=("parallel",)),
    )(theta.reshape(B * N_THETA), prep["out_b"], x2d, prep["R_ow"])


# ----------------------------------------------------------------------------
# Parameters + one-time weight preprocessing (pure re-indexing of weights)
# ----------------------------------------------------------------------------
def init_params(key, h_w_size):
    h0, w0 = h_w_size
    h = h0 - 7 + 1; h = (h - 2) // 2 + 1; h = h - 5 + 1; h = (h - 2) // 2 + 1
    w = w0 - 7 + 1; w = (w - 2) // 2 + 1; w = w - 5 + 1; w = (w - 2) // 2 + 1
    ks = jax.random.split(key, 8)
    p = {}
    p["conv1_w"] = 0.05 * jax.random.normal(ks[0], (K1, K1, C_IN, C1), jnp.float32)
    p["conv1_b"] = 0.05 * jax.random.normal(ks[1], (C1,), jnp.float32)
    p["conv2_w"] = 0.05 * jax.random.normal(ks[2], (K2, K2, C1, C2), jnp.float32)
    p["conv2_b"] = 0.05 * jax.random.normal(ks[3], (C2,), jnp.float32)
    p["fc1_w"] = 0.05 * jax.random.normal(ks[4], (C2 * h * w, N_HID), jnp.float32)
    p["fc1_b"] = 0.05 * jax.random.normal(ks[5], (N_HID,), jnp.float32)
    # fc_loc[2]: weight zeroed, bias = identity affine transform (as in __init__)
    p["fc2_w"] = jnp.zeros((N_HID, N_THETA), jnp.float32)
    p["fc2_b"] = jnp.array([1, 0, 0, 0, 1, 0], jnp.float32)
    p["out_w"] = 0.05 * jax.random.normal(ks[6], (C_IN, 1), jnp.float32)  # 1x1 conv
    p["out_b"] = 0.05 * jax.random.normal(ks[7], (1,), jnp.float32)
    return p


def prepare_params(params, h_w_size):
    """Fold conv/fc weights into banded operators matching the kernels' lane
    layouts (one-time preprocessing; forward math is unchanged)."""
    H, W = h_w_size
    OH1, OW1, PH1, PW1, OH2, OW2, PH2, PW2, Wm1, Wm2 = _dims(H, W)

    # conv1: A1[di, wj*C_IN + ci, ow*C1 + co] = w1[di, wj - ow, ci, co] (band).
    w1 = params["conv1_w"]
    dj = np.arange(W)[:, None] - np.arange(OW1)[None, :]
    v1 = (dj >= 0) & (dj < K1)
    A1 = w1[:, np.clip(dj, 0, K1 - 1), :, :] * v1[None, :, :, None, None]
    A1 = jnp.transpose(A1, (0, 1, 3, 2, 4)).reshape(K1, W * C_IN, OW1 * C1)

    # conv2 reads the un-compacted pooled conv1 lanes l = 2*C1*iw + ci.
    w2 = params["conv2_w"]
    lane = np.arange(Wm1)
    iw, ci = lane // (2 * C1), lane % (2 * C1)
    dj2 = iw[:, None] - np.arange(OW2)[None, :]
    v2 = (ci[:, None] < C1) & (dj2 >= 0) & (dj2 < K2)
    w2g = jnp.transpose(w2[:, :, np.minimum(ci, C1 - 1), :], (0, 2, 1, 3))
    A2 = w2g[:, lane[:, None], np.clip(dj2, 0, K2 - 1), :] * v2[None, :, :, None]
    A2 = A2.reshape(K2, Wm1, OW2 * C2)

    # fc1 with the PyTorch NCHW flatten baked into a row remap of the weights.
    fc1_w = params["fc1_w"]
    src = np.zeros((PH2, Wm2), np.int32)
    msk = np.zeros((PH2, Wm2), np.float32)
    for ph in range(PH2):
        for pw in range(PW2):
            for co in range(C2):
                src[ph, 2 * C2 * pw + co] = co * (PH2 * PW2) + ph * PW2 + pw
                msk[ph, 2 * C2 * pw + co] = 1.0
    Wfc1 = (fc1_w[src.reshape(-1)] * msk.reshape(-1, 1)).reshape(PH2, Wm2, N_HID)

    # 1x1 output conv commuted through grid_sample -> banded channel reducer.
    ow_vec = params["out_w"].reshape(C_IN)
    R_ow = (jnp.eye(W, dtype=jnp.float32)[:, None, :]
            * ow_vec[None, :, None]).reshape(W * C_IN, W)

    return {
        "A1": A1.astype(jnp.bfloat16),
        "b1t": jnp.tile(params["conv1_b"], OW1).reshape(1, OW1 * C1).astype(jnp.float32),
        "A2": A2.astype(jnp.bfloat16),
        "b2t": jnp.tile(params["conv2_b"], OW2).reshape(1, OW2 * C2).astype(jnp.float32),
        "Wfc1": Wfc1.astype(jnp.bfloat16),
        "bfc1": params["fc1_b"].reshape(1, N_HID).astype(jnp.float32),
        "Wfc2": params["fc2_w"].astype(jnp.bfloat16),
        "bfc2": params["fc2_b"].reshape(1, N_THETA).astype(jnp.float32),
        "R_ow": R_ow.astype(jnp.float32),
        "out_b": params["out_b"].reshape(1).astype(jnp.float32),
    }


# ----------------------------------------------------------------------------
# Forward
# ----------------------------------------------------------------------------
def stn_forward(prep, x_nchw):
    B, C, H, W = x_nchw.shape
    x2d = jnp.transpose(x_nchw, (0, 2, 3, 1)).reshape(B, H, W * C).astype(jnp.float32)
    theta = localization_fc(x2d, prep, H, W)            # (B, 1, 6)
    out = sampled_output(x2d, theta, prep, H, W)        # (B, 1, H*W)
    return out.reshape(B, 1, H, W)                      # NCHW


if __name__ == "__main__":
    key = jax.random.PRNGKey(0)
    kp, kx = jax.random.split(key)
    H, W = 26, 30
    params = init_params(kp, (H, W))
    prep = prepare_params(params, (H, W))
    x = jax.random.normal(kx, (2, C_IN, H, W), dtype=jnp.float32)

    fwd = jax.jit(stn_forward)
    y = jax.block_until_ready(fwd(prep, x))
    assert y.shape == (2, 1, H, W)
    assert bool(jnp.all(jnp.isfinite(y)))

    # With fc_loc[2] at its PyTorch init (zero weight, identity bias) theta is
    # the identity transform, so the full STN must reduce to the 1x1 output
    # conv applied to x -- a cheap end-to-end sanity check of the sampler.
    ref = (jnp.einsum("bchw,c->bhw", x, params["out_w"].reshape(C_IN))
           + params["out_b"][0]).reshape(2, 1, H, W)
    assert bool(jnp.allclose(y, ref, atol=2e-2, rtol=2e-2))

    print("KERNEL_OK")
</pallas_src>

<mosaic_0001>
module attributes {stable_mosaic.version = 11 : i64} {
  func.func @_loc_fc_kernel(%arg0: i32, %arg1: memref<1x26x90xf32, #tpu.memory_space<vmem>>, %arg2: memref<7x90x192xbf16, #tpu.memory_space<vmem>>, %arg3: memref<1x192xf32, #tpu.memory_space<vmem>>, %arg4: memref<5x184x80xbf16, #tpu.memory_space<vmem>>, %arg5: memref<1x80xf32, #tpu.memory_space<vmem>>, %arg6: memref<3x70x32xbf16, #tpu.memory_space<vmem>>, %arg7: memref<1x32xf32, #tpu.memory_space<vmem>>, %arg8: memref<32x6xbf16, #tpu.memory_space<vmem>>, %arg9: memref<1x6xf32, #tpu.memory_space<vmem>>, %arg10: memref<1x1x6xf32, #tpu.memory_space<vmem>>, %arg11: memref<26x90xbf16, #tpu.memory_space<vmem>>, %arg12: memref<10x184xbf16, #tpu.memory_space<vmem>>) attributes {dimension_semantics = [#tpu.dimension_semantics<parallel>], iteration_bounds = array<i64: 2>, scalar_prefetch = 0 : i64, scratch_operands = 2 : i64, tpu.core_type = #tpu.core_type<tc>, window_params = [{transform_indices = @transform_0, window_bounds = array<i64: 1, 26, 90>}, {pipeline_mode = #tpu.pipeline_mode<synchronous>, transform_indices = @transform_1, window_bounds = array<i64: 7, 90, 192>}, {pipeline_mode = #tpu.pipeline_mode<synchronous>, transform_indices = @transform_2, window_bounds = array<i64: 1, 192>}, {pipeline_mode = #tpu.pipeline_mode<synchronous>, transform_indices = @transform_3, window_bounds = array<i64: 5, 184, 80>}, {pipeline_mode = #tpu.pipeline_mode<synchronous>, transform_indices = @transform_4, window_bounds = array<i64: 1, 80>}, {pipeline_mode = #tpu.pipeline_mode<synchronous>, transform_indices = @transform_5, window_bounds = array<i64: 3, 70, 32>}, {pipeline_mode = #tpu.pipeline_mode<synchronous>, transform_indices = @transform_6, window_bounds = array<i64: 1, 32>}, {pipeline_mode = #tpu.pipeline_mode<synchronous>, transform_indices = @transform_7, window_bounds = array<i64: 32, 6>}, {pipeline_mode = #tpu.pipeline_mode<synchronous>, transform_indices = @transform_8, window_bounds = array<i64: 1, 6>}, {transform_indices = @transform_9, window_bounds = array<i64: 1, 1, 6>}]} {
    %c0 = arith.constant 0 : index
    %c0_0 = arith.constant 0 : index
    %c0_1 = arith.constant 0 : index
    %0 = vector.load %arg1[%c0, %c0_0, %c0_1] : memref<1x26x90xf32, #tpu.memory_space<vmem>>, vector<1x26x90xf32>
    %1 = vector.shape_cast %0 : vector<1x26x90xf32> to vector<26x90xf32>
    %2 = arith.truncf %1 : vector<26x90xf32> to vector<26x90xbf16>
    %c0_2 = arith.constant 0 : index
    %c0_3 = arith.constant 0 : index
    %3 = vector.load %arg11[%c0_2, %c0_3] : memref<26x90xbf16, #tpu.memory_space<vmem>>, vector<26x90xbf16>
    tpu.vector_store %arg11[%c0_2, %c0_3], %2 {strides = array<i32>} : memref<26x90xbf16, #tpu.memory_space<vmem>>, vector<26x90xbf16>,
    %cst = arith.constant 0.000000e+00 : f32
    %4 = vector.broadcast %cst : f32 to vector<20x192xf32>
    %c0_4 = arith.constant 0 : index
    %c0_5 = arith.constant 0 : index
    %5 = vector.load %arg11[%c0_4, %c0_5] : memref<26x90xbf16, #tpu.memory_space<vmem>>, vector<20x90xbf16>
    %c0_6 = arith.constant 0 : index
    %c0_7 = arith.constant 0 : index
    %c0_8 = arith.constant 0 : index
    %6 = vector.load %arg2[%c0_6, %c0_7, %c0_8] : memref<7x90x192xbf16, #tpu.memory_space<vmem>>, vector<1x90x192xbf16>
    %7 = vector.shape_cast %6 : vector<1x90x192xbf16> to vector<90x192xbf16>
    %cst_9 = arith.constant dense<0.000000e+00> : vector<20x192xf32>
    %8 = tpu.matmul %5, %7, %cst_9 {dimension_numbers = #tpu.dot_dimension_numbers<[1], [0], [0], [1], [0, 0, 1, 1], [], []>} : vector<20x90xbf16>, vector<90x192xbf16>, vector<20x192xf32> -> vector<20x192xf32>
    %9 = arith.addf %4, %8 : vector<20x192xf32>
    %c1 = arith.constant 1 : index
    %c0_10 = arith.constant 0 : index
    %10 = vector.load %arg11[%c1, %c0_10] : memref<26x90xbf16, #tpu.memory_space<vmem>>, vector<20x90xbf16>
    %c1_11 = arith.constant 1 : index
    %c0_12 = arith.constant 0 : index
    %c0_13 = arith.constant 0 : index
    %11 = vector.load %arg2[%c1_11, %c0_12, %c0_13] : memref<7x90x192xbf16, #tpu.memory_space<vmem>>, vector<1x90x192xbf16>
    %12 = vector.shape_cast %11 : vector<1x90x192xbf16> to vector<90x192xbf16>
    %cst_14 = arith.constant dense<0.000000e+00> : vector<20x192xf32>
    %13 = tpu.matmul %10, %12, %cst_14 {dimension_numbers = #tpu.dot_dimension_numbers<[1], [0], [0], [1], [0, 0, 1, 1], [], []>} : vector<20x90xbf16>, vector<90x192xbf16>, vector<20x192xf32> -> vector<20x192xf32>
    %14 = arith.addf %9, %13 : vector<20x192xf32>
    %c2 = arith.constant 2 : index
    %c0_15 = arith.constant 0 : index
    %15 = vector.load %arg11[%c2, %c0_15] : memref<26x90xbf16, #tpu.memory_space<vmem>>, vector<20x90xbf16>
    %c2_16 = arith.constant 2 : index
    %c0_17 = arith.constant 0 : index
    %c0_18 = arith.constant 0 : index
    %16 = vector.load %arg2[%c2_16, %c0_17, %c0_18] : memref<7x90x192xbf16, #tpu.memory_space<vmem>>, vector<1x90x192xbf16>
    %17 = vector.shape_cast %16 : vector<1x90x192xbf16> to vector<90x192xbf16>
    %cst_19 = arith.constant dense<0.000000e+00> : vector<20x192xf32>
    %18 = tpu.matmul %15, %17, %cst_19 {dimension_numbers = #tpu.dot_dimension_numbers<[1], [0], [0], [1], [0, 0, 1, 1], [], []>} : vector<20x90xbf16>, vector<90x192xbf16>, vector<20x192xf32> -> vector<20x192xf32>
    %19 = arith.addf %14, %18 : vector<20x192xf32>
    %c3 = arith.constant 3 : index
    %c0_20 = arith.constant 0 : index
    %20 = vector.load %arg11[%c3, %c0_20] : memref<26x90xbf16, #tpu.memory_space<vmem>>, vector<20x90xbf16>
    %c3_21 = arith.constant 3 : index
    %c0_22 = arith.constant 0 : index
    %c0_23 = arith.constant 0 : index
    %21 = vector.load %arg2[%c3_21, %c0_22, %c0_23] : memref<7x90x192xbf16, #tpu.memory_space<vmem>>, vector<1x90x192xbf16>
    %22 = vector.shape_cast %21 : vector<1x90x192xbf16> to vector<90x192xbf16>
    %cst_24 = arith.constant dense<0.000000e+00> : vector<20x192xf32>
    %23 = tpu.matmul %20, %22, %cst_24 {dimension_numbers = #tpu.dot_dimension_numbers<[1], [0], [0], [1], [0, 0, 1, 1], [], []>} : vector<20x90xbf16>, vector<90x192xbf16>, vector<20x192xf32> -> vector<20x192xf32>
    %24 = arith.addf %19, %23 : vector<20x192xf32>
    %c4 = arith.constant 4 : index
    %c0_25 = arith.constant 0 : index
    %25 = vector.load %arg11[%c4, %c0_25] : memref<26x90xbf16, #tpu.memory_space<vmem>>, vector<20x90xbf16>
    %c4_26 = arith.constant 4 : index
    %c0_27 = arith.constant 0 : index
    %c0_28 = arith.constant 0 : index
    %26 = vector.load %arg2[%c4_26, %c0_27, %c0_28] : memref<7x90x192xbf16, #tpu.memory_space<vmem>>, vector<1x90x192xbf16>
    %27 = vector.shape_cast %26 : vector<1x90x192xbf16> to vector<90x192xbf16>
    %cst_29 = arith.constant dense<0.000000e+00> : vector<20x192xf32>
    %28 = tpu.matmul %25, %27, %cst_29 {dimension_numbers = #tpu.dot_dimension_numbers<[1], [0], [0], [1], [0, 0, 1, 1], [], []>} : vector<20x90xbf16>, vector<90x192xbf16>, vector<20x192xf32> -> vector<20x192xf32>
    %29 = arith.addf %24, %28 : vector<20x192xf32>
    %c5 = arith.constant 5 : index
    %c0_30 = arith.constant 0 : index
    %30 = vector.load %arg11[%c5, %c0_30] : memref<26x90xbf16, #tpu.memory_space<vmem>>, vector<20x90xbf16>
    %c5_31 = arith.constant 5 : index
    %c0_32 = arith.constant 0 : index
    %c0_33 = arith.constant 0 : index
    %31 = vector.load %arg2[%c5_31, %c0_32, %c0_33] : memref<7x90x192xbf16, #tpu.memory_space<vmem>>, vector<1x90x192xbf16>
    %32 = vector.shape_cast %31 : vector<1x90x192xbf16> to vector<90x192xbf16>
    %cst_34 = arith.constant dense<0.000000e+00> : vector<20x192xf32>
    %33 = tpu.matmul %30, %32, %cst_34 {dimension_numbers = #tpu.dot_dimension_numbers<[1], [0], [0], [1], [0, 0, 1, 1], [], []>} : vector<20x90xbf16>, vector<90x192xbf16>, vector<20x192xf32> -> vector<20x192xf32>
    %34 = arith.addf %29, %33 : vector<20x192xf32>
    %c6 = arith.constant 6 : index
    %c0_35 = arith.constant 0 : index
    %35 = vector.load %arg11[%c6, %c0_35] : memref<26x90xbf16, #tpu.memory_space<vmem>>, vector<20x90xbf16>
    %c6_36 = arith.constant 6 : index
    %c0_37 = arith.constant 0 : index
    %c0_38 = arith.constant 0 : index
    %36 = vector.load %arg2[%c6_36, %c0_37, %c0_38] : memref<7x90x192xbf16, #tpu.memory_space<vmem>>, vector<1x90x192xbf16>
    %37 = vector.shape_cast %36 : vector<1x90x192xbf16> to vector<90x192xbf16>
    %cst_39 = arith.constant dense<0.000000e+00> : vector<20x192xf32>
    %38 = tpu.matmul %35, %37, %cst_39 {dimension_numbers = #tpu.dot_dimension_numbers<[1], [0], [0], [1], [0, 0, 1, 1], [], []>} : vector<20x90xbf16>, vector<90x192xbf16>, vector<20x192xf32> -> vector<20x192xf32>
    %39 = arith.addf %34, %38 : vector<20x192xf32>
    %c0_40 = arith.constant 0 : index
    %c0_41 = arith.constant 0 : index
    %40 = vector.load %arg3[%c0_40, %c0_41] : memref<1x192xf32, #tpu.memory_space<vmem>>, vector<1x192xf32>
    %41 = vector.broadcast %40 : vector<1x192xf32> to vector<20x192xf32>
    %42 = arith.addf %39, %41 : vector<20x192xf32>
    %43 = vector.shape_cast %42 : vector<20x192xf32> to vector<10x2x192xf32>
    %44 = vector.extract_strided_slice %43 {offsets = [0, 0, 0], sizes = [10, 1, 192], strides = [1, 1, 1]} : vector<10x2x192xf32> to vector<10x1x192xf32>
    %45 = vector.shape_cast %44 : vector<10x1x192xf32> to vector<10x192xf32>
    %46 = vector.extract_strided_slice %43 {offsets = [0, 1, 0], sizes = [10, 1, 192], strides = [1, 1, 1]} : vector<10x2x192xf32> to vector<10x1x192xf32>
    %47 = vector.shape_cast %46 : vector<10x1x192xf32> to vector<10x192xf32>
    %48 = arith.maximumf %45, %47 : vector<10x192xf32>
    %49 = vector.extract_strided_slice %48 {offsets = [0, 0], sizes = [10, 184], strides = [1, 1]} : vector<10x192xf32> to vector<10x184xf32>
    %50 = vector.extract_strided_slice %48 {offsets = [0, 8], sizes = [10, 184], strides = [1, 1]} : vector<10x192xf32> to vector<10x184xf32>
    %51 = arith.maximumf %49, %50 : vector<10x184xf32>
    %cst_42 = arith.constant 0.000000e+00 : f32
    %52 = vector.broadcast %cst_42 : f32 to vector<10x184xf32>
    %53 = arith.maximumf %51, %52 : vector<10x184xf32>
    %54 = arith.truncf %53 : vector<10x184xf32> to vector<10x184xbf16>
    %c0_43 = arith.constant 0 : index
    %c0_44 = arith.constant 0 : index
    %55 = vector.load %arg12[%c0_43, %c0_44] : memref<10x184xbf16, #tpu.memory_space<vmem>>, vector<10x184xbf16>
    tpu.vector_store %arg12[%c0_43, %c0_44], %54 {strides = array<i32>} : memref<10x184xbf16, #tpu.memory_space<vmem>>, vector<10x184xbf16>,
    %cst_45 = arith.constant 0.000000e+00 : f32
    %56 = vector.broadcast %cst_45 : f32 to vector<6x80xf32>
    %c0_46 = arith.constant 0 : index
    %c0_47 = arith.constant 0 : index
    %57 = vector.load %arg12[%c0_46, %c0_47] : memref<10x184xbf16, #tpu.memory_space<vmem>>, vector<6x184xbf16>
    %c0_48 = arith.constant 0 : index
    %c0_49 = arith.constant 0 : index
    %c0_50 = arith.constant 0 : index
    %58 = vector.load %arg4[%c0_48, %c0_49, %c0_50] : memref<5x184x80xbf16, #tpu.memory_space<vmem>>, vector<1x184x80xbf16>
    %59 = vector.shape_cast %58 : vector<1x184x80xbf16> to vector<184x80xbf16>
    %cst_51 = arith.constant dense<0.000000e+00> : vector<6x80xf32>
    %60 = tpu.matmul %57, %59, %cst_51 {dimension_numbers = #tpu.dot_dimension_numbers<[1], [0], [0], [1], [0, 0, 1, 1], [], []>} : vector<6x184xbf16>, vector<184x80xbf16>, vector<6x80xf32> -> vector<6x80xf32>
    %61 = arith.addf %56, %60 : vector<6x80xf32>
    %c1_52 = arith.constant 1 : index
    %c0_53 = arith.constant 0 : index
    %62 = vector.load %arg12[%c1_52, %c0_53] : memref<10x184xbf16, #tpu.memory_space<vmem>>, vector<6x184xbf16>
    %c1_54 = arith.constant 1 : index
    %c0_55 = arith.constant 0 : index
    %c0_56 = arith.constant 0 : index
    %63 = vector.load %arg4[%c1_54, %c0_55, %c0_56] : memref<5x184x80xbf16, #tpu.memory_space<vmem>>, vector<1x184x80xbf16>
    %64 = vector.shape_cast %63 : vector<1x184x80xbf16> to vector<184x80xbf16>
    %cst_57 = arith.constant dense<0.000000e+00> : vector<6x80xf32>
    %65 = tpu.matmul %62, %64, %cst_57 {dimension_numbers = #tpu.dot_dimension_numbers<[1], [0], [0], [1], [0, 0, 1, 1], [], []>} : vector<6x184xbf16>, vector<184x80xbf16>, vector<6x80xf32> -> vector<6x80xf32>
    %66 = arith.addf %61, %65 : vector<6x80xf32>
    %c2_58 = arith.constant 2 : index
    %c0_59 = arith.constant 0 : index
    %67 = vector.load %arg12[%c2_58, %c0_59] : memref<10x184xbf16, #tpu.memory_space<vmem>>, vector<6x184xbf16>
    %c2_60 = arith.constant 2 : index
    %c0_61 = arith.constant 0 : index
    %c0_62 = arith.constant 0 : index
    %68 = vector.load %arg4[%c2_60, %c0_61, %c0_62] : memref<5x184x80xbf16, #tpu.memory_space<vmem>>, vector<1x184x80xbf16>
    %69 = vector.shape_cast %68 : vector<1x184x80xbf16> to vector<184x80xbf16>
    %cst_63 = arith.constant dense<0.000000e+00> : vector<6x80xf32>
    %70 = tpu.matmul %67, %69, %cst_63 {dimension_numbers = #tpu.dot_dimension_numbers<[1], [0], [0], [1], [0, 0, 1, 1], [], []>} : vector<6x184xbf16>, vector<184x80xbf16>, vector<6x80xf32> -> vector<6x80xf32>
    %71 = arith.addf %66, %70 : vector<6x80xf32>
    %c3_64 = arith.constant 3 : index
    %c0_65 = arith.constant 0 : index
    %72 = vector.load %arg12[%c3_64, %c0_65] : memref<10x184xbf16, #tpu.memory_space<vmem>>, vector<6x184xbf16>
    %c3_66 = arith.constant 3 : index
    %c0_67 = arith.constant 0 : index
    %c0_68 = arith.constant 0 : index
    %73 = vector.load %arg4[%c3_66, %c0_67, %c0_68] : memref<5x184x80xbf16, #tpu.memory_space<vmem>>, vector<1x184x80xbf16>
    %74 = vector.shape_cast %73 : vector<1x184x80xbf16> to vector<184x80xbf16>
    %cst_69 = arith.constant dense<0.000000e+00> : vector<6x80xf32>
    %75 = tpu.matmul %72, %74, %cst_69 {dimension_numbers = #tpu.dot_dimension_numbers<[1], [0], [0], [1], [0, 0, 1, 1], [], []>} : vector<6x184xbf16>, vector<184x80xbf16>, vector<6x80xf32> -> vector<6x80xf32>
    %76 = arith.addf %71, %75 : vector<6x80xf32>
    %c4_70 = arith.constant 4 : index
    %c0_71 = arith.constant 0 : index
    %77 = vector.load %arg12[%c4_70, %c0_71] : memref<10x184xbf16, #tpu.memory_space<vmem>>, vector<6x184xbf16>
    %c4_72 = arith.constant 4 : index
    %c0_73 = arith.constant 0 : index
    %c0_74 = arith.constant 0 : index
    %78 = vector.load %arg4[%c4_72, %c0_73, %c0_74] : memref<5x184x80xbf16, #tpu.memory_space<vmem>>, vector<1x184x80xbf16>
    %79 = vector.shape_cast %78 : vector<1x184x80xbf16> to vector<184x80xbf16>
    %cst_75 = arith.constant dense<0.000000e+00> : vector<6x80xf32>
    %80 = tpu.matmul %77, %79, %cst_75 {dimension_numbers = #tpu.dot_dimension_numbers<[1], [0], [0], [1], [0, 0, 1, 1], [], []>} : vector<6x184xbf16>, vector<184x80xbf16>, vector<6x80xf32> -> vector<6x80xf32>
    %81 = arith.addf %76, %80 : vector<6x80xf32>
    %c0_76 = arith.constant 0 : index
    %c0_77 = arith.constant 0 : index
    %82 = vector.load %arg5[%c0_76, %c0_77] : memref<1x80xf32, #tpu.memory_space<vmem>>, vector<1x80xf32>
    %83 = vector.broadcast %82 : vector<1x80xf32> to vector<6x80xf32>
    %84 = arith.addf %81, %83 : vector<6x80xf32>
    %85 = vector.shape_cast %84 : vector<6x80xf32> to vector<3x2x80xf32>
    %86 = vector.extract_strided_slice %85 {offsets = [0, 0, 0], sizes = [3, 1, 80], strides = [1, 1, 1]} : vector<3x2x80xf32> to vector<3x1x80xf32>
    %87 = vector.shape_cast %86 : vector<3x1x80xf32> to vector<3x80xf32>
    %88 = vector.extract_strided_slice %85 {offsets = [0, 1, 0], sizes = [3, 1, 80], strides = [1, 1, 1]} : vector<3x2x80xf32> to vector<3x1x80xf32>
    %89 = vector.shape_cast %88 : vector<3x1x80xf32> to vector<3x80xf32>
    %90 = arith.maximumf %87, %89 : vector<3x80xf32>
    %91 = vector.extract_strided_slice %90 {offsets = [0, 0], sizes = [3, 70], strides = [1, 1]} : vector<3x80xf32> to vector<3x70xf32>
    %92 = vector.extract_strided_slice %90 {offsets = [0, 10], sizes = [3, 70], strides = [1, 1]} : vector<3x80xf32> to vector<3x70xf32>
    %93 = arith.maximumf %91, %92 : vector<3x70xf32>
    %cst_78 = arith.constant 0.000000e+00 : f32
    %94 = vector.broadcast %cst_78 : f32 to vector<3x70xf32>
    %95 = arith.maximumf %93, %94 : vector<3x70xf32>
    %96 = arith.truncf %95 : vector<3x70xf32> to vector<3x70xbf16>
    %c0_79 = arith.constant 0 : index
    %c0_80 = arith.constant 0 : index
    %97 = vector.load %arg7[%c0_79, %c0_80] : memref<1x32xf32, #tpu.memory_space<vmem>>, vector<1x32xf32>
    %98 = vector.extract_strided_slice %96 {offsets = [0, 0], sizes = [1, 70], strides = [1, 1]} : vector<3x70xbf16> to vector<1x70xbf16>
    %c0_81 = arith.constant 0 : index
    %c0_82 = arith.constant 0 : index
    %c0_83 = arith.constant 0 : index
    %99 = vector.load %arg6[%c0_81, %c0_82, %c0_83] : memref<3x70x32xbf16, #tpu.memory_space<vmem>>, vector<1x70x32xbf16>
    %100 = vector.shape_cast %99 : vector<1x70x32xbf16> to vector<70x32xbf16>
    %cst_84 = arith.constant dense<0.000000e+00> : vector<1x32xf32>
    %101 = tpu.matmul %98, %100, %cst_84 {dimension_numbers = #tpu.dot_dimension_numbers<[1], [0], [0], [1], [0, 0, 1, 1], [], []>} : vector<1x70xbf16>, vector<70x32xbf16>, vector<1x32xf32> -> vector<1x32xf32>
    %102 = arith.addf %97, %101 : vector<1x32xf32>
    %103 = vector.extract_strided_slice %96 {offsets = [1, 0], sizes = [1, 70], strides = [1, 1]} : vector<3x70xbf16> to vector<1x70xbf16>
    %c1_85 = arith.constant 1 : index
    %c0_86 = arith.constant 0 : index
    %c0_87 = arith.constant 0 : index
    %104 = vector.load %arg6[%c1_85, %c0_86, %c0_87] : memref<3x70x32xbf16, #tpu.memory_space<vmem>>, vector<1x70x32xbf16>
    %105 = vector.shape_cast %104 : vector<1x70x32xbf16> to vector<70x32xbf16>
    %cst_88 = arith.constant dense<0.000000e+00> : vector<1x32xf32>
    %106 = tpu.matmul %103, %105, %cst_88 {dimension_numbers = #tpu.dot_dimension_numbers<[1], [0], [0], [1], [0, 0, 1, 1], [], []>} : vector<1x70xbf16>, vector<70x32xbf16>, vector<1x32xf32> -> vector<1x32xf32>
    %107 = arith.addf %102, %106 : vector<1x32xf32>
    %108 = vector.extract_strided_slice %96 {offsets = [2, 0], sizes = [1, 70], strides = [1, 1]} : vector<3x70xbf16> to vector<1x70xbf16>
    %c2_89 = arith.constant 2 : index
    %c0_90 = arith.constant 0 : index
    %c0_91 = arith.constant 0 : index
    %109 = vector.load %arg6[%c2_89, %c0_90, %c0_91] : memref<3x70x32xbf16, #tpu.memory_space<vmem>>, vector<1x70x32xbf16>
    %110 = vector.shape_cast %109 : vector<1x70x32xbf16> to vector<70x32xbf16>
    %cst_92 = arith.constant dense<0.000000e+00> : vector<1x32xf32>
    %111 = tpu.matmul %108, %110, %cst_92 {dimension_numbers = #tpu.dot_dimension_numbers<[1], [0], [0], [1], [0, 0, 1, 1], [], []>} : vector<1x70xbf16>, vector<70x32xbf16>, vector<1x32xf32> -> vector<1x32xf32>
    %112 = arith.addf %107, %111 : vector<1x32xf32>
    %cst_93 = arith.constant 0.000000e+00 : f32
    %113 = vector.broadcast %cst_93 : f32 to vector<1x32xf32>
    %114 = arith.maximumf %112, %113 : vector<1x32xf32>
    %115 = arith.truncf %114 : vector<1x32xf32> to vector<1x32xbf16>
    %c0_94 = arith.constant 0 : index
    %c0_95 = arith.constant 0 : index
    %116 = vector.load %arg8[%c0_94, %c0_95] : memref<32x6xbf16, #tpu.memory_space<vmem>>, vector<32x6xbf16>
    %cst_96 = arith.constant dense<0.000000e+00> : vector<1x6xf32>
    %117 = tpu.matmul %115, %116, %cst_96 {dimension_numbers = #tpu.dot_dimension_numbers<[1], [0], [0], [1], [0, 0, 1, 1], [], []>} : vector<1x32xbf16>, vector<32x6xbf16>, vector<1x6xf32> -> vector<1x6xf32>
    %c0_97 = arith.constant 0 : index
    %c0_98 = arith.constant 0 : index
    %118 = vector.load %arg9[%c0_97, %c0_98] : memref<1x6xf32, #tpu.memory_space<vmem>>, vector<1x6xf32>
    %119 = arith.addf %117, %118 : vector<1x6xf32>
    %c0_99 = arith.constant 0 : index
    %c0_100 = arith.constant 0 : index
    %c0_101 = arith.constant 0 : index
    %120 = vector.load %arg10[%c0_99, %c0_100, %c0_101] : memref<1x1x6xf32, #tpu.memory_space<vmem>>, vector<1x1x6xf32>
    %121 = vector.shape_cast %120 : vector<1x1x6xf32> to vector<1x6xf32>
    %122 = vector.shape_cast %119 : vector<1x6xf32> to vector<1x1x6xf32>
    tpu.vector_store %arg10[%c0_99, %c0_100, %c0_101], %122 {strides = array<i32>} : memref<1x1x6xf32, #tpu.memory_space<vmem>>, vector<1x1x6xf32>,
    return
  }
  func.func @transform_0(%arg0: i32) -> (i32, i32, i32) {
    %c0_i32 = arith.constant 0 : i32
    %c0_i32_0 = arith.constant 0 : i32
    %c0_i32_1 = arith.constant 0 : i32
    return %arg0, %c0_i32, %c0_i32_0 : i32, i32, i32
  }
  func.func @transform_1(%arg0: i32) -> (i32, i32, i32) {
    %c0_i32 = arith.constant 0 : i32
    %c0_i32_0 = arith.constant 0 : i32
    %c0_i32_1 = arith.constant 0 : i32
    %c0_i32_2 = arith.constant 0 : i32
    return %c0_i32, %c0_i32_0, %c0_i32_1 : i32, i32, i32
  }
  func.func @transform_2(%arg0: i32) -> (i32, i32) {
    %c0_i32 = arith.constant 0 : i32
    %c0_i32_0 = arith.constant 0 : i32
    %c0_i32_1 = arith.constant 0 : i32
    return %c0_i32, %c0_i32_0 : i32, i32
  }
  func.func @transform_3(%arg0: i32) -> (i32, i32, i32) {
    %c0_i32 = arith.constant 0 : i32
    %c0_i32_0 = arith.constant 0 : i32
    %c0_i32_1 = arith.constant 0 : i32
    %c0_i32_2 = arith.constant 0 : i32
    return %c0_i32, %c0_i32_0, %c0_i32_1 : i32, i32, i32
  }
  func.func @transform_4(%arg0: i32) -> (i32, i32) {
    %c0_i32 = arith.constant 0 : i32
    %c0_i32_0 = arith.constant 0 : i32
    %c0_i32_1 = arith.constant 0 : i32
    return %c0_i32, %c0_i32_0 : i32, i32
  }
  func.func @transform_5(%arg0: i32) -> (i32, i32, i32) {
    %c0_i32 = arith.constant 0 : i32
    %c0_i32_0 = arith.constant 0 : i32
    %c0_i32_1 = arith.constant 0 : i32
    %c0_i32_2 = arith.constant 0 : i32
    return %c0_i32, %c0_i32_0, %c0_i32_1 : i32, i32, i32
  }
  func.func @transform_6(%arg0: i32) -> (i32, i32) {
    %c0_i32 = arith.constant 0 : i32
    %c0_i32_0 = arith.constant 0 : i32
    %c0_i32_1 = arith.constant 0 : i32
    return %c0_i32, %c0_i32_0 : i32, i32
  }
  func.func @transform_7(%arg0: i32) -> (i32, i32) {
    %c0_i32 = arith.constant 0 : i32
    %c0_i32_0 = arith.constant 0 : i32
    %c0_i32_1 = arith.constant 0 : i32
    return %c0_i32, %c0_i32_0 : i32, i32
  }
  func.func @transform_8(%arg0: i32) -> (i32, i32) {
    %c0_i32 = arith.constant 0 : i32
    %c0_i32_0 = arith.constant 0 : i32
    %c0_i32_1 = arith.constant 0 : i32
    return %c0_i32, %c0_i32_0 : i32, i32
  }
  func.func @transform_9(%arg0: i32) -> (i32, i32, i32) {
    %c0_i32 = arith.constant 0 : i32
    %c0_i32_0 = arith.constant 0 : i32
    %c0_i32_1 = arith.constant 0 : i32
    return %arg0, %c0_i32, %c0_i32_0 : i32, i32, i32
  }
}

module attributes {stable_mosaic.version = 11 : i64} {
  func.func @_sample_kernel(%arg0: i32, %arg1: memref<12xf32, #tpu.memory_space<smem>>, %arg2: memref<1xf32, #tpu.memory_space<smem>>, %arg3: memref<1x26x90xf32, #tpu.memory_space<vmem>>, %arg4: memref<90x30xf32, #tpu.memory_space<vmem>>, %arg5: memref<1x1x780xf32, #tpu.memory_space<vmem>>) attributes {dimension_semantics = [#tpu.dimension_semantics<parallel>], iteration_bounds = array<i64: 2>, scalar_prefetch = 2 : i64, scratch_operands = 0 : i64, tpu.core_type = #tpu.core_type<tc>, window_params = [{transform_indices = @transform_0, window_bounds = array<i64: 1, 26, 90>}, {pipeline_mode = #tpu.pipeline_mode<synchronous>, transform_indices = @transform_1, window_bounds = array<i64: 90, 30>}, {transform_indices = @transform_2, window_bounds = array<i64: 1, 1, 780>}]} {
    %c0 = arith.constant 0 : index
    %c0_0 = arith.constant 0 : index
    %c0_1 = arith.constant 0 : index
    %0 = vector.load %arg3[%c0, %c0_0, %c0_1] : memref<1x26x90xf32, #tpu.memory_space<vmem>>, vector<1x26x90xf32>
    %1 = vector.shape_cast %0 : vector<1x26x90xf32> to vector<26x90xf32>
    %c0_2 = arith.constant 0 : index
    %c0_3 = arith.constant 0 : index
    %2 = vector.load %arg4[%c0_2, %c0_3] : memref<90x30xf32, #tpu.memory_space<vmem>>, vector<90x30xf32>
    %cst = arith.constant dense<0.000000e+00> : vector<26x30xf32>
    %3 = tpu.matmul %1, %2, %cst {dimension_numbers = #tpu.dot_dimension_numbers<[1], [0], [0], [1], [0, 0, 1, 1], [], []>} : vector<26x90xf32>, vector<90x30xf32>, vector<26x30xf32> -> vector<26x30xf32>
    %4 = tpu.iota {dimensions = array<i32: 1>} : vector<1x780xi32>
    %5 = arith.sitofp %4 : vector<1x780xi32> to vector<1x780xf32>
    %cst_4 = arith.constant 5.000000e-01 : f32
    %6 = vector.broadcast %cst_4 : f32 to vector<1x780xf32>
    %7 = arith.addf %5, %6 : vector<1x780xf32>
    %cst_5 = arith.constant 0.0333333351 : f32
    %8 = vector.broadcast %cst_5 : f32 to vector<1x780xf32>
    %9 = arith.mulf %7, %8 : vector<1x780xf32>
    %10 = math.floor %9 : vector<1x780xf32>
    %cst_6 = arith.constant 3.000000e+01 : f32
    %11 = vector.broadcast %cst_6 : f32 to vector<1x780xf32>
    %12 = arith.mulf %10, %11 : vector<1x780xf32>
    %13 = arith.subf %5, %12 : vector<1x780xf32>
    %cst_7 = arith.constant 2.000000e+00 : f32
    %14 = vector.broadcast %cst_7 : f32 to vector<1x780xf32>
    %15 = arith.mulf %14, %13 : vector<1x780xf32>
    %cst_8 = arith.constant 1.000000e+00 : f32
    %16 = vector.broadcast %cst_8 : f32 to vector<1x780xf32>
    %17 = arith.addf %15, %16 : vector<1x780xf32>
    %cst_9 = arith.constant 3.000000e+01 : f32
    %18 = vector.broadcast %cst_9 : f32 to vector<1x780xf32>
    %19 = arith.divf %17, %18 : vector<1x780xf32>
    %cst_10 = arith.constant 1.000000e+00 : f32
    %20 = vector.broadcast %cst_10 : f32 to vector<1x780xf32>
    %21 = arith.subf %19, %20 : vector<1x780xf32>
    %cst_11 = arith.constant 2.000000e+00 : f32
    %22 = vector.broadcast %cst_11 : f32 to vector<1x780xf32>
    %23 = arith.mulf %22, %10 : vector<1x780xf32>
    %cst_12 = arith.constant 1.000000e+00 : f32
    %24 = vector.broadcast %cst_12 : f32 to vector<1x780xf32>
    %25 = arith.addf %23, %24 : vector<1x780xf32>
    %cst_13 = arith.constant 2.600000e+01 : f32
    %26 = vector.broadcast %cst_13 : f32 to vector<1x780xf32>
    %27 = arith.divf %25, %26 : vector<1x780xf32>
    %cst_14 = arith.constant 1.000000e+00 : f32
    %28 = vector.broadcast %cst_14 : f32 to vector<1x780xf32>
    %29 = arith.subf %27, %28 : vector<1x780xf32>
    %c6_i32 = arith.constant 6 : i32
    %30 = arith.muli %c6_i32, %arg0 : i32
    %c0_i32 = arith.constant 0 : i32
    %31 = arith.addi %30, %c0_i32 : i32
    %32 = arith.index_cast %31 : i32 to index
    %33 = memref.load %arg1[%32] : memref<12xf32, #tpu.memory_space<smem>>
    %c6_i32_15 = arith.constant 6 : i32
    %34 = arith.muli %c6_i32_15, %arg0 : i32
    %c1_i32 = arith.constant 1 : i32
    %35 = arith.addi %34, %c1_i32 : i32
    %36 = arith.index_cast %35 : i32 to index
    %37 = memref.load %arg1[%36] : memref<12xf32, #tpu.memory_space<smem>>
    %c6_i32_16 = arith.constant 6 : i32
    %38 = arith.muli %c6_i32_16, %arg0 : i32
    %c2_i32 = arith.constant 2 : i32
    %39 = arith.addi %38, %c2_i32 : i32
    %40 = arith.index_cast %39 : i32 to index
    %41 = memref.load %arg1[%40] : memref<12xf32, #tpu.memory_space<smem>>
    %c6_i32_17 = arith.constant 6 : i32
    %42 = arith.muli %c6_i32_17, %arg0 : i32
    %c3_i32 = arith.constant 3 : i32
    %43 = arith.addi %42, %c3_i32 : i32
    %44 = arith.index_cast %43 : i32 to index
    %45 = memref.load %arg1[%44] : memref<12xf32, #tpu.memory_space<smem>>
    %c6_i32_18 = arith.constant 6 : i32
    %46 = arith.muli %c6_i32_18, %arg0 : i32
    %c4_i32 = arith.constant 4 : i32
    %47 = arith.addi %46, %c4_i32 : i32
    %48 = arith.index_cast %47 : i32 to index
    %49 = memref.load %arg1[%48] : memref<12xf32, #tpu.memory_space<smem>>
    %c6_i32_19 = arith.constant 6 : i32
    %50 = arith.muli %c6_i32_19, %arg0 : i32
    %c5_i32 = arith.constant 5 : i32
    %51 = arith.addi %50, %c5_i32 : i32
    %52 = arith.index_cast %51 : i32 to index
    %53 = memref.load %arg1[%52] : memref<12xf32, #tpu.memory_space<smem>>
    %54 = vector.broadcast %33 : f32 to vector<1x780xf32>
    %55 = arith.mulf %54, %21 : vector<1x780xf32>
    %56 = vector.broadcast %37 : f32 to vector<1x780xf32>
    %57 = arith.mulf %56, %29 : vector<1x780xf32>
    %58 = arith.addf %55, %57 : vector<1x780xf32>
    %59 = vector.broadcast %41 : f32 to vector<1x780xf32>
    %60 = arith.addf %58, %59 : vector<1x780xf32>
    %61 = vector.broadcast %45 : f32 to vector<1x780xf32>
    %62 = arith.mulf %61, %21 : vector<1x780xf32>
    %63 = vector.broadcast %49 : f32 to vector<1x780xf32>
    %64 = arith.mulf %63, %29 : vector<1x780xf32>
    %65 = arith.addf %62, %64 : vector<1x780xf32>
    %66 = vector.broadcast %53 : f32 to vector<1x780xf32>
    %67 = arith.addf %65, %66 : vector<1x780xf32>
    %cst_20 = arith.constant 1.000000e+00 : f32
    %68 = vector.broadcast %cst_20 : f32 to vector<1x780xf32>
    %69 = arith.addf %60, %68 : vector<1x780xf32>
    %cst_21 = arith.constant 3.000000e+01 : f32
    %70 = vector.broadcast %cst_21 : f32 to vector<1x780xf32>
    %71 = arith.mulf %69, %70 : vector<1x780xf32>
    %cst_22 = arith.constant 1.000000e+00 : f32
    %72 = vector.broadcast %cst_22 : f32 to vector<1x780xf32>
    %73 = arith.subf %71, %72 : vector<1x780xf32>
    %cst_23 = arith.constant 5.000000e-01 : f32
    %74 = vector.broadcast %cst_23 : f32 to vector<1x780xf32>
    %75 = arith.mulf %73, %74 : vector<1x780xf32>
    %cst_24 = arith.constant 1.000000e+00 : f32
    %76 = vector.broadcast %cst_24 : f32 to vector<1x780xf32>
    %77 = arith.addf %67, %76 : vector<1x780xf32>
    %cst_25 = arith.constant 2.600000e+01 : f32
    %78 = vector.broadcast %cst_25 : f32 to vector<1x780xf32>
    %79 = arith.mulf %77, %78 : vector<1x780xf32>
    %cst_26 = arith.constant 1.000000e+00 : f32
    %80 = vector.broadcast %cst_26 : f32 to vector<1x780xf32>
    %81 = arith.subf %79, %80 : vector<1x780xf32>
    %cst_27 = arith.constant 5.000000e-01 : f32
    %82 = vector.broadcast %cst_27 : f32 to vector<1x780xf32>
    %83 = arith.mulf %81, %82 : vector<1x780xf32>
    %84 = math.floor %75 : vector<1x780xf32>
    %85 = math.floor %83 : vector<1x780xf32>
    %86 = arith.subf %75, %84 : vector<1x780xf32>
    %87 = arith.subf %83, %85 : vector<1x780xf32>
    %88 = arith.fptosi %84 : vector<1x780xf32> to vector<1x780xi32>
    %89 = arith.fptosi %85 : vector<1x780xf32> to vector<1x780xi32>
    %90 = tpu.iota {dimensions = array<i32: 0>} : vector<30x780xi32>
    %91 = vector.broadcast %88 : vector<1x780xi32> to vector<30x780xi32>
    %92 = arith.cmpi eq, %90, %91 : vector<30x780xi32>
    %93 = arith.extui %92 : vector<30x780xi1> to vector<30x780xi32>
    %94 = arith.sitofp %93 : vector<30x780xi32> to vector<30x780xf32>
    %cst_28 = arith.constant 1.000000e+00 : f32
    %95 = vector.broadcast %cst_28 : f32 to vector<1x780xf32>
    %96 = arith.subf %95, %86 : vector<1x780xf32>
    %97 = vector.broadcast %96 : vector<1x780xf32> to vector<30x780xf32>
    %98 = arith.mulf %94, %97 : vector<30x780xf32>
    %c1_i32_29 = arith.constant 1 : i32
    %99 = vector.broadcast %c1_i32_29 : i32 to vector<1x780xi32>
    %100 = arith.addi %88, %99 : vector<1x780xi32>
    %101 = vector.broadcast %100 : vector<1x780xi32> to vector<30x780xi32>
    %102 = arith.cmpi eq, %90, %101 : vector<30x780xi32>
    %103 = arith.extui %102 : vector<30x780xi1> to vector<30x780xi32>
    %104 = arith.sitofp %103 : vector<30x780xi32> to vector<30x780xf32>
    %105 = vector.broadcast %86 : vector<1x780xf32> to vector<30x780xf32>
    %106 = arith.mulf %104, %105 : vector<30x780xf32>
    %107 = arith.addf %98, %106 : vector<30x780xf32>
    %cst_30 = arith.constant dense<0.000000e+00> : vector<26x780xf32>
    %108 = tpu.matmul %3, %107, %cst_30 {dimension_numbers = #tpu.dot_dimension_numbers<[1], [0], [0], [1], [0, 0, 1, 1], [], []>} : vector<26x30xf32>, vector<30x780xf32>, vector<26x780xf32> -> vector<26x780xf32>
    %109 = tpu.iota {dimensions = array<i32: 0>} : vector<26x780xi32>
    %110 = vector.broadcast %89 : vector<1x780xi32> to vector<26x780xi32>
    %111 = arith.cmpi eq, %109, %110 : vector<26x780xi32>
    %112 = arith.extui %111 : vector<26x780xi1> to vector<26x780xi32>
    %113 = arith.sitofp %112 : vector<26x780xi32> to vector<26x780xf32>
    %cst_31 = arith.constant 1.000000e+00 : f32
    %114 = vector.broadcast %cst_31 : f32 to vector<1x780xf32>
    %115 = arith.subf %114, %87 : vector<1x780xf32>
    %116 = vector.broadcast %115 : vector<1x780xf32> to vector<26x780xf32>
    %117 = arith.mulf %113, %116 : vector<26x780xf32>
    %c1_i32_32 = arith.constant 1 : i32
    %118 = vector.broadcast %c1_i32_32 : i32 to vector<1x780xi32>
    %119 = arith.addi %89, %118 : vector<1x780xi32>
    %120 = vector.broadcast %119 : vector<1x780xi32> to vector<26x780xi32>
    %121 = arith.cmpi eq, %109, %120 : vector<26x780xi32>
    %122 = arith.extui %121 : vector<26x780xi1> to vector<26x780xi32>
    %123 = arith.sitofp %122 : vector<26x780xi32> to vector<26x780xf32>
    %124 = vector.broadcast %87 : vector<1x780xf32> to vector<26x780xf32>
    %125 = arith.mulf %123, %124 : vector<26x780xf32>
    %126 = arith.addf %117, %125 : vector<26x780xf32>
    %127 = arith.mulf %126, %108 : vector<26x780xf32>
    %cst_33 = arith.constant dense<0.000000e+00> : vector<780xf32>
    %128 = vector.multi_reduction <add>, %127, %cst_33 [0] : vector<26x780xf32> to vector<780xf32>
    %129 = vector.shape_cast %128 : vector<780xf32> to vector<1x780xf32>
    %c0_34 = arith.constant 0 : index
    %130 = memref.load %arg2[%c0_34] : memref<1xf32, #tpu.memory_space<smem>>
    %131 = vector.broadcast %130 : f32 to vector<1x780xf32>
    %132 = arith.addf %129, %131 : vector<1x780xf32>
    %c0_35 = arith.constant 0 : index
    %c0_36 = arith.constant 0 : index
    %c0_37 = arith.constant 0 : index
    %133 = vector.load %arg5[%c0_35, %c0_36, %c0_37] : memref<1x1x780xf32, #tpu.memory_space<vmem>>, vector<1x1x780xf32>
    %134 = vector.shape_cast %133 : vector<1x1x780xf32> to vector<1x780xf32>
    %135 = vector.shape_cast %132 : vector<1x780xf32> to vector<1x1x780xf32>
    tpu.vector_store %arg5[%c0_35, %c0_36, %c0_37], %135 {strides = array<i32>} : memref<1x1x780xf32, #tpu.memory_space<vmem>>, vector<1x1x780xf32>,
    return
  }
  func.func @transform_0(%arg0: i32, %arg1: memref<12xf32, #tpu.memory_space<smem>>, %arg2: memref<1xf32, #tpu.memory_space<smem>>) -> (i32, i32, i32) {
    %c0_i32 = arith.constant 0 : i32
    %c0_i32_0 = arith.constant 0 : i32
    %c0_i32_1 = arith.constant 0 : i32
    return %arg0, %c0_i32, %c0_i32_0 : i32, i32, i32
  }
  func.func @transform_1(%arg0: i32, %arg1: memref<12xf32, #tpu.memory_space<smem>>, %arg2: memref<1xf32, #tpu.memory_space<smem>>) -> (i32, i32) {
    %c0_i32 = arith.constant 0 : i32
    %c0_i32_0 = arith.constant 0 : i32
    %c0_i32_1 = arith.constant 0 : i32
    return %c0_i32, %c0_i32_0 : i32, i32
  }
  func.func @transform_2(%arg0: i32, %arg1: memref<12xf32, #tpu.memory_space<smem>>, %arg2: memref<1xf32, #tpu.memory_space<smem>>) -> (i32, i32, i32) {
    %c0_i32 = arith.constant 0 : i32
    %c0_i32_0 = arith.constant 0 : i32
    %c0_i32_1 = arith.constant 0 : i32
    return %arg0, %c0_i32, %c0_i32_0 : i32, i32, i32
  }
}

</mosaic_0001>

<bundles_post_ra>
// kernel: stn_forward.3
= control target key start
LH: loop header
LB: loop body
LE: loop exit
PB: predicated region body
PF: predicated region fallthrough
CT: control target
= control target key end

     0   :  { %s1738_s20 = smov [#allocation3]   ;;  %s2753_s0 = inlined_call_operand.vmem [shape: f32[12], index: 0, kind: input, shape index: {}]   ;;  %s2754_s1 = inlined_call_operand.<no memory space> [shape: f32[1], index: 1, kind: input, shape index: {}]   ;;  %s2755_s2 = inlined_call_operand.vmem [shape: f32[2,26,90], index: 2, kind: input, shape index: {}]   ;;  %s2756_s3 = inlined_call_operand.vmem [shape: f32[90,30], index: 3, kind: input, shape index: {}]   ;;  %s2757_s4 = inlined_call_operand.vmem [shape: f32[2,1,780], index: 4, kind: output, shape index: {}]  }
   0x1   :  { %s10_s17 = sshll.u32 %s2753_s0, 4  ;;  %14 = sst [smem:[#allocation4]] %s2754_s1  ;;  %s11_s17 = int_to_ptr.vmem [resolvable:$true] %s10_s17 }
   0x2   :  { %13 = dma.vmem_to_smem %s11_s17, 16, %s1738_s20, [#allocation2] }
   0x3   :  { %1732 = dma.done.wait [#allocation2], 16 }
   0x4   :  { %1733 = vsyncadd [#allocation2], 4294967280 }
   0x5   :  { %17 = sfence }
   0x6   :  { %s1773_s21 = smov 0  }
   0x7 LB: > { %s1779_s0 = sadd.s32 4294967295, %s1736_s21   ;;  %p1481_p0 = scmp.ge.s32.totalorder %s1736_s21, 1  ;;  %s1736_s21 = sphi %s1773_s21, %s23_s21  }
   0x8   : > { %p123_p1 = scmp.lt.s32.totalorder %s1736_s21, 3 }
   0xa   : > { %p124_p2 = pnand %p1481_p0, %p123_p1 }
   0xb   : > { %p144_p3 = scmp.lt.s32.totalorder (!%p124_p2), %s1779_s0, 1  ;;  %s1835_s24 = smul.u32 (!%p124_p2), 6, %s1779_s0 }
   0xc   : > { %127 = sbr.rel (%p124_p2) target bundleno = 381 (0x17d), region = 28  ;;  %s1385_s10 = sld [smem:[#allocation4]] (!%p124_p2) }
   0xd   : > { %s337_s25 = sadd.s32 (!%p124_p2), 1, %s1835_s24  ;;  %s336_s26 = sld [smem:[#allocation3 + %s1835_s24]] (!%p124_p2) }
   0xe   : > { %s339_s27 = sadd.s32 (!%p124_p2), 2, %s1835_s24  ;;  %s341_s29 = sadd.s32 (!%p124_p2), 3, %s1835_s24 }
   0xf   : > { %s340_s28 = sld [smem:[#allocation3 + %s339_s27]] (!%p124_p2)  ;;  %s343_s30 = sadd.s32 (!%p124_p2), 4, %s1835_s24 }
  0x10   : > { %s342_s5 = sld [smem:[#allocation3 + %s341_s29]] (!%p124_p2)  ;;  %s345_s7 = sadd.s32 (!%p124_p2), 5, %s1835_s24 }
  0x11   : > { %v168_v0 = vld [vmem:[%s2756_s3 + $0x58] sm:$0x3]  ;;  %vm182_vm0 = vcmask 1041408   ;;  %v167_v1 = vld [vmem:[%s2756_s3 + $0x50] sm:$0xff]  ;;  %v166_v2 = vld [vmem:[%s2756_s3 + $0x48] sm:$0xff]  ;;  %s1807_s9 = scalar_select %p144_p3, %s1779_s0, 1  ;;  %v2758_v10 = vlaneseq }
  0x12   : > { %1484 = vmatpush.msk.msra.mxu0 %vm182_vm0, %v168_v0  ;;  %v165_v3 = vld [vmem:[%s2756_s3 + $0x40] sm:$0xff]  ;;  %v164_v4 = vld [vmem:[%s2756_s3 + $0x38] sm:$0xff]  ;;  %v163_v5 = vld [vmem:[%s2756_s3 + $0x30] sm:$0xff]  ;;  %v1739_v11 = vmov 30.0   ;;  %v1740_v14 = vmov 26.0   ;;  %vm169_vm1 = vcmask 736256  }
  0x13   : > { %v162_v6 = vld [vmem:[%s2756_s3 + $0x28] sm:$0xff]  ;;  %v161_v7 = vld [vmem:[%s2756_s3 + $0x20] sm:$0xff]  ;;  %v160_v8 = vld [vmem:[%s2756_s3 + $0x18] sm:$0xff]  ;;  %s1666_s14 = sshll.u32 %s1807_s9, 5  ;;  %1712 = vrcp.f32 %v1739_v11  ;;  %v1828_v13 = vand.u32 127, %v2758_v10  ;;  %s338_s0 = sld [smem:[#allocation3 + %s337_s25]]  ;;  %v1856_v47 = vstv %s336_s26 }
  0x14   : > { %191 = vmatpush.msra.mxu0 %v167_v1  ;;  %v159_v9 = vld [vmem:[%s2756_s3 + $0x10] sm:$0xff]  ;;  %v158_v12 = vld [vmem:[%s2756_s3 + $0x8] sm:$0xff]  ;;  %s1825_s1 = scalar_lea.vmem %s2755_s2, %s1666_s14  ;;  %1714 = vrcp.f32 %v1740_v14  ;;  %v157_v15 = vld [vmem:[%s2756_s3] sm:$0xff]  ;;  %vm791_vm6 = vcmask 1045504   ;;  %s344_s6 = sld [smem:[#allocation3 + %s343_s30]] }
  0x15   : > { %v223_v16 = vcvt.s32.f32 %v1828_v13  ;;  %v153_v17 = vld [vmem:[%s1825_s1] sm:$0xff]  ;;  %v154_v30 = vld [vmem:[%s1825_s1 + $0x8] sm:$0xff]  ;;  %v217_v41 = vadd.s32 128, %v1828_v13  ;;  %v155_v46 = vld [vmem:[%s1825_s1 + $0x10] sm:$0xff]  ;;  %v1865_v53 = vstv %s340_s28  ;;  %s346_s8 = sld [smem:[#allocation3 + %s345_s7]]  ;;  %s1671_s11 = smul.u32 7, %s1807_s9 }
  0x16   : > { %192 = vmatpush.msra.mxu0 %v166_v2  ;;  %v156_v59 = vld [vmem:[%s1825_s1 + $0x18] sm:$0x3]  ;;  %v1872_v2 = vshrl.u32 %v2758_v10, 7 }
  0x17   : > { %v230_v18 = vadd.f32 0.5, %v223_v16  ;;  %v224_v45 = vcvt.s32.f32 %v217_v41  ;;  %s152_s14 = scalar_lea.vmem %s2757_s4, %s1671_s11 }
  0x18   : > { %193 = vmatpush.msra.mxu0 %v165_v3  ;;  %v1879_v11 = vadd.s32 24, %v1872_v2 }
  0x19   : > { %v1713_v19 = vpop.eup %1712  ;;  %v237_v21 = vmul.f32 0.033333335, %v230_v18  ;;  %v1850_v42 = vstv %s338_s0  ;;  %v231_v50 = vadd.f32 0.5, %v224_v45 }
  0x1a   : > { %194 = vmatpush.msra.mxu0 %v164_v4  ;;  %v1715_v20 = vpop.eup %1714  ;;  %v280_v22 = vmul.f32 30.0, %v1713_v19  ;;  %vm284_vm2 = vweird.f32 %v1713_v19 }
  0x1b   : > { %v315_v23 = vmul.f32 26.0, %v1715_v20  ;;  %v244_v24 = vfloor.f32 %v237_v21  ;;  %vm319_vm3 = vweird.f32 %v1715_v20  ;;  %v238_v52 = vmul.f32 0.033333335, %v231_v50 }
  0x1c   : > { %195 = vmatpush.msra.mxu0 %v163_v5  ;;  %v281_v25 = vsub.f32 1.0, %v280_v22 }
  0x1d   : > { %v316_v26 = vsub.f32 1.0, %v315_v23  ;;  %v251_v27 = vmul.f32 30.0, %v244_v24  ;;  %v300_v29 = vmul.f32 2.0, %v244_v24  ;;  %v245_v55 = vfloor.f32 %v238_v52 }
  0x1e   : > { %196 = vmatpush.msra.mxu0 %v162_v6  ;;  %v282_v28 = vmul.f32 %v1713_v19, %v281_v25  ;;  %v218_v6 = vadd.s32 256, %v1828_v13  ;;  %v2759_v24 = vmov 0.0  }
  0x1f   : > { %v317_v31 = vmul.f32 %v1715_v20, %v316_v26  ;;  %v258_v32 = vsub.f32 %v223_v16, %v251_v27  ;;  %v307_v34 = vadd.f32 1.0, %v300_v29  ;;  %v252_v57 = vmul.f32 30.0, %v245_v55 }
  0x20   : > { %197 = vmatpush.msra.mxu0 %v161_v7  ;;  %v283_v33 = vadd.f32 %v1713_v19, %v282_v28  ;;  %v301_v58 = vmul.f32 2.0, %v245_v55 }
  0x21   : > { %v318_v35 = vadd.f32 %v1715_v20, %v317_v31  ;;  %v265_v36 = vmul.f32 2.0, %v258_v32  ;;  %v259_v61 = vsub.f32 %v224_v45, %v252_v57 }
  0x22   : > { %198 = vmatpush.msra.mxu0 %v160_v8  ;;  %v1844_v37 = vsel %vm284_vm2, %v1713_v19, %v283_v33  ;;  %v308_v62 = vadd.f32 1.0, %v301_v58 }
  0x23   : > { %v1846_v38 = vsel %vm319_vm3, %v1715_v20, %v318_v35  ;;  %v272_v39 = vadd.f32 1.0, %v265_v36  ;;  %v266_v0 = vmul.f32 2.0, %v259_v61  ;;  %v222_v36 = vadd.s32 768, %v1828_v13 }
  0x24   : > { %199 = vmatpush.msra.mxu0 %v159_v9  ;;  %v321_v40 = vmul.f32 %v1846_v38, %v307_v34  ;;  %v322_v1 = vmul.f32 %v1846_v38, %v308_v62  ;;  %v225_v9 = vcvt.s32.f32 %v218_v6 }
  0x25   : > { %v286_v43 = vmul.f32 %v1844_v37, %v272_v39  ;;  %v273_v4 = vadd.f32 1.0, %v266_v0  ;;  %v229_v45 = vcvt.s32.f32 %v222_v36 }
  0x26   : > { %200 = vmatpush.msra.mxu0 %v158_v12  ;;  %v1853_v44 = vadd.f32 -1.0, %v321_v40  ;;  %v1874_v5 = vadd.f32 -1.0, %v322_v1  ;;  %v232_v16 = vadd.f32 0.5, %v225_v9 }
  0x27   : > { %v1858_v48 = vadd.f32 -1.0, %v286_v43  ;;  %v287_v8 = vmul.f32 %v1844_v37, %v273_v4 }
  0x28   : > { %201 = vmatpush.msra.mxu0 %v157_v15  ;;  %v356_v49 = vmul.f32 %v1853_v44, %v1850_v42  ;;  %v357_v15 = vmul.f32 %v1874_v5, %v1850_v42  ;;  %v239_v20 = vmul.f32 0.033333335, %v232_v16 }
  0x29   : > { %1485 = vmatmul.msk.f32.vlgmr.msra.gmra.mxu0 %vm169_vm1, %v153_v17  ;;  %v348_v51 = vmul.f32 %v1858_v48, %v1856_v47  ;;  %v1881_v14 = vadd.f32 -1.0, %v287_v8 }
  0x2a   : > { %v246_v26 = vfloor.f32 %v239_v20 }
  0x2b   : > { %v363_v54 = vadd.f32 %v356_v49, %v348_v51  ;;  %v349_v19 = vmul.f32 %v1881_v14, %v1856_v47  ;;  %v236_v51 = vadd.f32 0.5, %v229_v45 }
  0x2c   : > { %v302_v31 = vmul.f32 2.0, %v246_v26 }
  0x2d   : > { %v371_v56 = vadd.f32 %v1865_v53, %v363_v54  ;;  %v364_v23 = vadd.f32 %v357_v15, %v349_v19  ;;  %v243_v55 = vmul.f32 0.033333335, %v236_v51 }
  0x2e   : > { %v309_v35 = vadd.f32 1.0, %v302_v31 }
  0x2f   : > { %v409_v60 = vadd.f32 1.0, %v371_v56  ;;  %v372_v28 = vadd.f32 %v1865_v53, %v364_v23 }
  0x30   : > { %v323_v43 = vmul.f32 %v1846_v38, %v309_v35 }
  0x31   : > { %1486 = vmatmul.msk.f32.gmra.mxu0 %vm169_vm1, %v154_v30  ;;  %v416_v63 = vmul.f32 30.0, %v409_v60  ;;  %v253_v30 = vmul.f32 30.0, %v246_v26  ;;  %v410_v33 = vadd.f32 1.0, %v372_v28 }
  0x32   : > { %v1909_v50 = vadd.f32 -1.0, %v323_v43  ;;  %v1964_v43 = vadd.s32 8, %v1872_v2 }
  0x33   : > { %v1503_v3 = vadd.f32 -1.0, %v416_v63  ;;  %v260_v34 = vsub.f32 %v225_v9, %v253_v30  ;;  %v417_v40 = vmul.f32 30.0, %v410_v33 }
  0x34   : > { %v358_v58 = vmul.f32 %v1909_v50, %v1850_v42 }
  0x35   : > { %v430_v7 = vmul.f32 0.5, %v1503_v3  ;;  %v267_v41 = vmul.f32 2.0, %v260_v34 }
  0x37   : > { %v465_v12 = vfloor.f32 %v430_v7  ;;  %v274_v49 = vadd.f32 1.0, %v267_v41 }
  0x39   : > { %1487 = vmatmul.msk.f32.gmra.mxu0 %vm169_vm1, %v155_v46  ;;  %v1885_v17 = vsub.f32 %v430_v7, %v465_v12  ;;  %v1887_v18 = vcvt.f32.s32 %v465_v12  ;;  %v1504_v46 = vadd.f32 -1.0, %v417_v40  ;;  %v288_v54 = vmul.f32 %v1844_v37, %v274_v49 }
  0x3b   : > { %vm533_vm4 = vcmp.eq.s32.totalorder %v1879_v11, %v1887_v18  ;;  %v1894_v21 = vsub.f32 1.0, %v1885_v17  ;;  %v1897_v22 = vadd.s32 1, %v1887_v18  ;;  %v431_v52 = vmul.f32 0.5, %v1504_v46 }
  0x3c   : > { %v1538_v25 = vsel %vm533_vm4, 1.0, %v2759_v24  ;;  %v1912_v57 = vadd.f32 -1.0, %v288_v54  ;;  %vm519_vm13 = vcmp.eq.s32.totalorder %v1964_v43, %v1887_v18 }
  0x3d   : > { %v624_v27 = vmul.f32 %v1538_v25, %v1894_v21  ;;  %vm659_vm5 = vcmp.eq.s32.totalorder %v1879_v11, %v1897_v22  ;;  %v466_v56 = vfloor.f32 %v431_v52  ;;  %vm645_vm14 = vcmp.eq.s32.totalorder %v1964_v43, %v1897_v22 }
  0x3e   : > { %v1566_v29 = vsel %vm659_vm5, 1.0, %v2759_v24  ;;  %v350_v62 = vmul.f32 %v1912_v57, %v1856_v47 }
  0x3f   : > { %v743_v32 = vmul.f32 %v1566_v29, %v1885_v17  ;;  %v1916_v60 = vsub.f32 %v431_v52, %v466_v56  ;;  %v1918_v61 = vcvt.f32.s32 %v466_v56 }
  0x40   : > { %v365_v6 = vadd.f32 %v358_v58, %v350_v62  ;;  %v1524_v58 = vsel %vm519_vm13, 1.0, %v2759_v24  ;;  %v1552_v62 = vsel %vm645_vm14, 1.0, %v2759_v24 }
  0x41   : > { %1488 = vmatmul.msk.f32.gmra.mxu0 %vm169_vm1, %v156_v59  ;;  %v771_v39 = vadd.f32 %v743_v32, %v624_v27  ;;  %v250_v59 = vfloor.f32 %v243_v55  ;;  %vm534_vm7 = vcmp.eq.s32.totalorder %v1879_v11, %v1918_v61  ;;  %v1925_v1 = vsub.f32 1.0, %v1916_v60 }
  0x42   : > { %v1928_v3 = vadd.s32 1, %v1918_v61  ;;  %v1539_v4 = vsel %vm534_vm7, 1.0, %v2759_v24  ;;  %v373_v15 = vadd.f32 %v1865_v53, %v365_v6  ;;  %v1941_v27 = vadd.s32 16, %v1872_v2 }
  0x43   : > { %1573 = vmatpush.msk.msra.mxu1 %vm791_vm6, %v771_v39  ;;  %v257_v63 = vmul.f32 30.0, %v250_v59  ;;  %v306_v0 = vmul.f32 2.0, %v250_v59  ;;  %v625_v9 = vmul.f32 %v1539_v4, %v1925_v1  ;;  %vm520_vm15 = vcmp.eq.s32.totalorder %v1964_v43, %v1918_v61 }
  0x44   : > { %vm660_vm8 = vcmp.eq.s32.totalorder %v1879_v11, %v1928_v3  ;;  %v411_v23 = vadd.f32 1.0, %v373_v15  ;;  %vm526_vm9 = vcmp.eq.s32.totalorder %v1941_v27, %v1887_v18  ;;  %vm652_vm10 = vcmp.eq.s32.totalorder %v1941_v27, %v1897_v22 }
  0x45   : > { %v264_v7 = vsub.f32 %v229_v45, %v257_v63  ;;  %v313_v8 = vadd.f32 1.0, %v306_v0  ;;  %v1567_v12 = vsel %vm660_vm8, 1.0, %v2759_v24  ;;  %v1531_v32 = vsel %vm526_vm9, 1.0, %v2759_v24 }
  0x46   : > { %v744_v20 = vmul.f32 %v1567_v12, %v1916_v60  ;;  %v418_v29 = vmul.f32 30.0, %v411_v23  ;;  %vm527_vm11 = vcmp.eq.s32.totalorder %v1941_v27, %v1918_v61  ;;  %vm653_vm12 = vcmp.eq.s32.totalorder %v1941_v27, %v1928_v3 }
  0x47   : > { %v271_v16 = vmul.f32 2.0, %v264_v7  ;;  %v327_v19 = vmul.f32 %v1846_v38, %v313_v8  ;;  %v617_v35 = vmul.f32 %v1531_v32, %v1894_v21  ;;  %v1559_v36 = vsel %vm652_vm10, 1.0, %v2759_v24 }
  0x48   : > { %v772_v28 = vadd.f32 %v744_v20, %v625_v9  ;;  %v1505_v33 = vadd.f32 -1.0, %v418_v29  ;;  %v736_v39 = vmul.f32 %v1559_v36, %v1885_v17  ;;  %v1532_v40 = vsel %vm527_vm11, 1.0, %v2759_v24 }
  0x49   : > { %v278_v25 = vadd.f32 1.0, %v271_v16  ;;  %v1938_v26 = vadd.f32 -1.0, %v327_v19  ;;  %v1560_v41 = vsel %vm653_vm12, 1.0, %v2759_v24  ;;  %v618_v49 = vmul.f32 %v1532_v40, %v1925_v1 }
  0x4a   : > { %1578 = vmatpush.msk.msra.mxu2 %vm791_vm6, %v772_v28  ;;  %v432_v45 = vmul.f32 0.5, %v1505_v33  ;;  %v737_v51 = vmul.f32 %v1560_v41, %v1916_v60  ;;  %v764_v52 = vadd.f32 %v736_v39, %v617_v35  ;;  %v610_v59 = vmul.f32 %v1524_v58, %v1894_v21 }
  0x4b   : > { %v292_v30 = vmul.f32 %v1844_v37, %v278_v25  ;;  %v362_v31 = vmul.f32 %v1938_v26, %v1850_v42  ;;  %v1525_v63 = vsel %vm520_vm15, 1.0, %v2759_v24  ;;  %vm646_vm1 = vcmp.eq.s32.totalorder %v1964_v43, %v1928_v3 }
  0x4c   : > { %v467_v54 = vfloor.f32 %v432_v45  ;;  %v765_v56 = vadd.f32 %v737_v51, %v618_v49  ;;  %826 = vmatpush.msra.mxu1 %v764_v52  ;;  %v729_v7 = vmul.f32 %v1552_v62, %v1885_v17  ;;  %v611_v8 = vmul.f32 %v1525_v63, %v1925_v1 }
  0x4d   : > { %v1956_v34 = vadd.f32 -1.0, %v292_v30  ;;  %v1553_v9 = vsel %vm646_vm1, 1.0, %v2759_v24  ;;  %v219_v41 = vadd.s32 384, %v1828_v13  ;;  %vm512_vm15 = vcmp.eq.s32.totalorder %v1872_v2, %v1887_v18 }
  0x4e   : > { %v1982_v0 = vsub.f32 %v432_v45, %v467_v54  ;;  %v1984_v4 = vcvt.f32.s32 %v467_v54  ;;  %855 = vmatpush.msra.mxu2 %v765_v56  ;;  %v757_v20 = vadd.f32 %v729_v7, %v610_v59  ;;  %v730_v23 = vmul.f32 %v1553_v9, %v1916_v60 }
  0x4f   : > { %v354_v46 = vmul.f32 %v1956_v34, %v1856_v47  ;;  %v2023_v56 = vadd.s32 512, %v1828_v13  ;;  %v2027_v59 = vadd.s32 640, %v1828_v13  ;;  %vm638_vm1 = vcmp.eq.s32.totalorder %v1872_v2, %v1897_v22 }
  0x50   : > { %vm535_vm2 = vcmp.eq.s32.totalorder %v1879_v11, %v1984_v4  ;;  %v1993_v12 = vsub.f32 1.0, %v1982_v0  ;;  %v1996_v15 = vadd.s32 1, %v1984_v4  ;;  %vm528_vm3 = vcmp.eq.s32.totalorder %v1941_v27, %v1984_v4  ;;  %827 = vmatpush.msra.mxu1 %v757_v20 }
  0x51   : > { %v369_v55 = vadd.f32 %v362_v31, %v354_v46  ;;  %v1540_v19 = vsel %vm535_vm2, 1.0, %v2759_v24  ;;  %v1533_v29 = vsel %vm528_vm3, 1.0, %v2759_v24  ;;  %v758_v32 = vadd.f32 %v730_v23, %v611_v8 }
  0x52   : > { %v626_v25 = vmul.f32 %v1540_v19, %v1993_v12  ;;  %vm661_vm4 = vcmp.eq.s32.totalorder %v1879_v11, %v1996_v15  ;;  %v619_v31 = vmul.f32 %v1533_v29, %v1993_v12  ;;  %vm654_vm5 = vcmp.eq.s32.totalorder %v1941_v27, %v1996_v15 }
  0x53   : > { %v377_v6 = vadd.f32 %v1865_v53, %v369_v55  ;;  %v1568_v30 = vsel %vm661_vm4, 1.0, %v2759_v24  ;;  %v1561_v36 = vsel %vm654_vm5, 1.0, %v2759_v24  ;;  %vm521_vm7 = vcmp.eq.s32.totalorder %v1964_v43, %v1984_v4  ;;  %856 = vmatpush.msra.mxu2 %v758_v32 }
  0x54   : > { %v745_v33 = vmul.f32 %v1568_v30, %v1982_v0  ;;  %v738_v39 = vmul.f32 %v1561_v36, %v1982_v0  ;;  %v1526_v40 = vsel %vm521_vm7, 1.0, %v2759_v24  ;;  %vm647_vm8 = vcmp.eq.s32.totalorder %v1964_v43, %v1996_v15 }
  0x55   : > { %v415_v16 = vadd.f32 1.0, %v377_v6  ;;  %v612_v49 = vmul.f32 %v1526_v40, %v1993_v12  ;;  %v1554_v51 = vsel %vm647_vm8, 1.0, %v2759_v24  ;;  %v226_v55 = vcvt.s32.f32 %v219_v41 }
  0x56   : > { %v773_v45 = vadd.f32 %v745_v33, %v626_v25  ;;  %v766_v52 = vadd.f32 %v738_v39, %v619_v31  ;;  %v731_v54 = vmul.f32 %v1554_v51, %v1982_v0  ;;  %v227_v6 = vcvt.s32.f32 %v2023_v56 }
  0x57   : > { %v422_v28 = vmul.f32 30.0, %v415_v16  ;;  %v233_v63 = vadd.f32 0.5, %v226_v55  ;;  %v228_v19 = vcvt.s32.f32 %v2027_v59  ;;  %vm513_vm2 = vcmp.eq.s32.totalorder %v1872_v2, %v1918_v61 }
  0x58   : > { %1583 = vmatpush.msk.msra.mxu3 %vm791_vm6, %v773_v45  ;;  %v759_v62 = vadd.f32 %v731_v54, %v612_v49  ;;  %v234_v16 = vadd.f32 0.5, %v227_v6  ;;  %vm639_vm3 = vcmp.eq.s32.totalorder %v1872_v2, %v1928_v3  ;;  %vm514_vm4 = vcmp.eq.s32.totalorder %v1872_v2, %v1984_v4 }
  0x59   : > { %v1509_v35 = vadd.f32 -1.0, %v422_v28  ;;  %v240_v9 = vmul.f32 0.033333335, %v233_v63  ;;  %vm640_vm5 = vcmp.eq.s32.totalorder %v1872_v2, %v1996_v15 }
  0x5a   : > { %884 = vmatpush.msra.mxu3 %v766_v52  ;;  %v235_v52 = vadd.f32 0.5, %v228_v19 }
  0x5b   : > { %v436_v46 = vmul.f32 0.5, %v1509_v35  ;;  %v247_v28 = vfloor.f32 %v240_v9  ;;  %v1517_v9 = vsel %vm512_vm15, 1.0, %v2759_v24 }
  0x5c   : > { %885 = vmatpush.msra.mxu3 %v759_v62  ;;  %v603_v18 = vmul.f32 %v1517_v9, %v1894_v21 }
  0x5d   : > { %v471_v58 = vfloor.f32 %v436_v46  ;;  %v254_v45 = vmul.f32 30.0, %v247_v28  ;;  %v303_v62 = vmul.f32 2.0, %v247_v28 }
  0x5f   : > { %v2030_v7 = vsub.f32 %v436_v46, %v471_v58  ;;  %v1685_v8 = vcvt.f32.s32 %v471_v58  ;;  %v241_v46 = vmul.f32 0.033333335, %v234_v16  ;;  %v261_v58 = vsub.f32 %v226_v55, %v254_v45 }
  0x60   : > { %v1545_v55 = vsel %vm638_vm1, 1.0, %v2759_v24  ;;  %v1518_v16 = vsel %vm513_vm2, 1.0, %v2759_v24 }
  0x61   : > { %vm539_vm9 = vcmp.eq.s32.totalorder %v1879_v11, %v1685_v8  ;;  %v602_v20 = vsub.f32 1.0, %v2030_v7  ;;  %v637_v13 = vadd.s32 1, %v1685_v8  ;;  %vm532_vm10 = vcmp.eq.s32.totalorder %v1941_v27, %v1685_v8 }
  0x62   : > { %v1544_v23 = vsel %vm539_vm9, 1.0, %v2759_v24  ;;  %v1537_v25 = vsel %vm532_vm10, 1.0, %v2759_v24  ;;  %vm525_vm11 = vcmp.eq.s32.totalorder %v1964_v43, %v1685_v8  ;;  %v248_v63 = vfloor.f32 %v241_v46 }
  0x63   : > { %v630_v29 = vmul.f32 %v1544_v23, %v602_v20  ;;  %vm665_vm12 = vcmp.eq.s32.totalorder %v1879_v11, %v637_v13  ;;  %v623_v30 = vmul.f32 %v1537_v25, %v602_v20  ;;  %vm658_vm13 = vcmp.eq.s32.totalorder %v1941_v27, %v637_v13 }
  0x64   : > { %v1572_v31 = vsel %vm665_vm12, 1.0, %v2759_v24  ;;  %v1565_v32 = vsel %vm658_vm13, 1.0, %v2759_v24  ;;  %v1530_v33 = vsel %vm525_vm11, 1.0, %v2759_v24  ;;  %vm651_vm14 = vcmp.eq.s32.totalorder %v1964_v43, %v637_v13 }
  0x65   : > { %v749_v35 = vmul.f32 %v1572_v31, %v2030_v7  ;;  %v742_v36 = vmul.f32 %v1565_v32, %v2030_v7  ;;  %v616_v39 = vmul.f32 %v1530_v33, %v602_v20  ;;  %v1558_v40 = vsel %vm651_vm14, 1.0, %v2759_v24 }
  0x66   : > { %v735_v41 = vmul.f32 %v1558_v40, %v2030_v7  ;;  %v1546_v23 = vsel %vm639_vm3, 1.0, %v2759_v24  ;;  %v722_v22 = vmul.f32 %v1545_v55, %v1885_v17  ;;  %v604_v25 = vmul.f32 %v1518_v16, %v1925_v1 }
  0x67   : > { %v2051_v49 = vadd.f32 %v749_v35, %v630_v29  ;;  %v2053_v51 = vadd.f32 %v742_v36, %v623_v30  ;;  %v723_v61 = vmul.f32 %v1546_v23, %v1916_v60  ;;  %vm518_vm7 = vcmp.eq.s32.totalorder %v1872_v2, %v1685_v8 }
  0x68   : > { %v2057_v54 = vadd.f32 %v735_v41, %v616_v39  ;;  %vm644_vm8 = vcmp.eq.s32.totalorder %v1872_v2, %v637_v13  ;;  %v750_v3 = vadd.f32 %v722_v22, %v603_v18  ;;  %v1519_v17 = vsel %vm514_vm4, 1.0, %v2759_v24 }
  0x69   : > { %1603 = vmatpush.msk.msrb.mxu0 %vm791_vm6, %v2051_v49  ;;  %v751_v21 = vadd.f32 %v723_v61, %v604_v25  ;;  %v1547_v1 = vsel %vm640_vm5, 1.0, %v2759_v24  ;;  %v605_v60 = vmul.f32 %v1519_v17, %v1993_v12  ;;  %v1523_v4 = vsel %vm518_vm7, 1.0, %v2759_v24 }
  0x6a   : > { %v724_v28 = vmul.f32 %v1547_v1, %v1982_v0  ;;  %v1551_v15 = vsel %vm644_vm8, 1.0, %v2759_v24  ;;  %828 = vmatpush.msra.mxu1 %v750_v3  ;;  %v609_v8 = vmul.f32 %v1523_v4, %v602_v20  ;;  %v268_v29 = vmul.f32 2.0, %v261_v58 }
  0x6b   : > { %1000 = vmatpush.msrb.mxu0 %v2053_v51  ;;  %857 = vmatpush.msra.mxu2 %v751_v21  ;;  %v728_v13 = vmul.f32 %v1551_v15, %v2030_v7  ;;  %v310_v31 = vadd.f32 1.0, %v303_v62  ;;  %v255_v32 = vmul.f32 30.0, %v248_v63  ;;  %v304_v33 = vmul.f32 2.0, %v248_v63 }
  0x6c   : > { %v752_v30 = vadd.f32 %v724_v28, %v605_v60  ;;  %v275_v36 = vadd.f32 1.0, %v268_v29  ;;  %v242_v12 = vmul.f32 0.033333335, %v235_v52  ;;  %vm778_vm9 = vcmask 244736  }
  0x6d   : > { %1001 = vmatpush.msrb.mxu0 %v2057_v54  ;;  %v2092_v35 = vadd.f32 %v728_v13, %v609_v8  ;;  %v324_v0 = vmul.f32 %v1846_v38, %v310_v31  ;;  %v262_v39 = vsub.f32 %v227_v6, %v255_v32  ;;  %v311_v40 = vadd.f32 1.0, %v304_v33 }
  0x6e   : > { %886 = vmatpush.msra.mxu3 %v752_v30  ;;  %v289_v7 = vmul.f32 %v1844_v37, %v275_v36  ;;  %v249_v20 = vfloor.f32 %v242_v12 }
  0x6f   : > { %1002 = vmatpush.msrb.mxu0 %v2092_v35  ;;  %v2099_v41 = vadd.f32 -1.0, %v324_v0  ;;  %v269_v45 = vmul.f32 2.0, %v262_v39  ;;  %v325_v46 = vmul.f32 %v1846_v38, %v311_v40 }
  0x70   : > { %v2102_v58 = vadd.f32 -1.0, %v289_v7  ;;  %v256_v52 = vmul.f32 30.0, %v249_v20  ;;  %v305_v62 = vmul.f32 2.0, %v249_v20 }
  0x71   : > { %v359_v63 = vmul.f32 %v2099_v41, %v1850_v42  ;;  %v276_v56 = vadd.f32 1.0, %v269_v45  ;;  %v2106_v6 = vadd.f32 -1.0, %v325_v46 }
  0x72   : > { %v351_v9 = vmul.f32 %v2102_v58, %v1856_v47  ;;  %v263_v55 = vsub.f32 %v228_v19, %v256_v52  ;;  %v312_v16 = vadd.f32 1.0, %v305_v62 }
  0x73   : > { %v290_v23 = vmul.f32 %v1844_v37, %v276_v56  ;;  %v360_v3 = vmul.f32 %v2106_v6, %v1850_v42 }
  0x74   : > { %v366_v18 = vadd.f32 %v359_v63, %v351_v9  ;;  %v270_v22 = vmul.f32 2.0, %v263_v55  ;;  %v326_v25 = vmul.f32 %v1846_v38, %v312_v16 }
  0x75   : > { %v2114_v61 = vadd.f32 -1.0, %v290_v23 }
  0x76   : > { %v374_v21 = vadd.f32 %v1865_v53, %v366_v18  ;;  %v277_v17 = vadd.f32 1.0, %v270_v22  ;;  %v2119_v1 = vadd.f32 -1.0, %v326_v25 }
  0x77   : > { %v352_v59 = vmul.f32 %v2114_v61, %v1856_v47 }
  0x78   : > { %v412_v19 = vadd.f32 1.0, %v374_v21  ;;  %v291_v60 = vmul.f32 %v1844_v37, %v277_v17  ;;  %v361_v38 = vmul.f32 %v2119_v1, %v1850_v42 }
  0x79   : > { %v367_v28 = vadd.f32 %v360_v3, %v352_v59 }
  0x7a   : > { %v419_v4 = vmul.f32 30.0, %v412_v19  ;;  %v2124_v15 = vadd.f32 -1.0, %v291_v60 }
  0x7b   : > { %v375_v8 = vadd.f32 %v1865_v53, %v367_v28 }
  0x7c   : > { %v1506_v13 = vadd.f32 -1.0, %v419_v4  ;;  %v353_v29 = vmul.f32 %v2124_v15, %v1856_v47 }
  0x7d   : > { %v413_v30 = vadd.f32 1.0, %v375_v8 }
  0x7e   : > { %v433_v31 = vmul.f32 0.5, %v1506_v13  ;;  %v368_v32 = vadd.f32 %v361_v38, %v353_v29 }
  0x7f   : > { %v420_v33 = vmul.f32 30.0, %v413_v30 }
  0x80   : > { %v468_v36 = vfloor.f32 %v433_v31  ;;  %v376_v37 = vadd.f32 %v1865_v53, %v368_v32 }
  0x81   : > { %v1507_v12 = vadd.f32 -1.0, %v420_v33 }
  0x82   : > { %v2132_v0 = vsub.f32 %v433_v31, %v468_v36  ;;  %v2134_v39 = vcvt.f32.s32 %v468_v36  ;;  %v414_v40 = vadd.f32 1.0, %v376_v37 }
  0x83   : > { %v434_v42 = vmul.f32 0.5, %v1507_v12 }
  0x84   : > { %vm536_vm10 = vcmp.eq.s32.totalorder %v1879_v11, %v2134_v39  ;;  %v2139_v47 = vsub.f32 1.0, %v2132_v0  ;;  %v2142_v7 = vadd.s32 1, %v2134_v39  ;;  %v421_v20 = vmul.f32 30.0, %v414_v40 }
  0x85   : > { %v1541_v53 = vsel %vm536_vm10, 1.0, %v2759_v24  ;;  %v469_v45 = vfloor.f32 %v434_v42  ;;  %vm529_vm11 = vcmp.eq.s32.totalorder %v1941_v27, %v2134_v39  ;;  %vm522_vm12 = vcmp.eq.s32.totalorder %v1964_v43, %v2134_v39 }
  0x86   : > { %v627_v46 = vmul.f32 %v1541_v53, %v2139_v47  ;;  %vm662_vm13 = vcmp.eq.s32.totalorder %v1879_v11, %v2142_v7  ;;  %v1508_v52 = vadd.f32 -1.0, %v421_v20  ;;  %v1534_v62 = vsel %vm529_vm11, 1.0, %v2759_v24 }
  0x87   : > { %v1569_v63 = vsel %vm662_vm13, 1.0, %v2759_v24  ;;  %v2154_v56 = vsub.f32 %v434_v42, %v469_v45  ;;  %v2156_v9 = vcvt.f32.s32 %v469_v45  ;;  %v620_v55 = vmul.f32 %v1534_v62, %v2139_v47 }
  0x88   : > { %v746_v16 = vmul.f32 %v1569_v63, %v2132_v0  ;;  %v435_v23 = vmul.f32 0.5, %v1508_v52  ;;  %vm655_vm14 = vcmp.eq.s32.totalorder %v1941_v27, %v2142_v7  ;;  %v1527_v18 = vsel %vm522_vm12, 1.0, %v2759_v24 }
  0x89   : > { %vm537_vm15 = vcmp.eq.s32.totalorder %v1879_v11, %v2156_v9  ;;  %v2166_v22 = vsub.f32 1.0, %v2154_v56  ;;  %v2169_v25 = vadd.s32 1, %v2156_v9  ;;  %v1562_v3 = vsel %vm655_vm14, 1.0, %v2759_v24 }
  0x8a   : > { %v774_v17 = vadd.f32 %v746_v16, %v627_v46  ;;  %v1542_v59 = vsel %vm537_vm15, 1.0, %v2759_v24  ;;  %v470_v19 = vfloor.f32 %v435_v23  ;;  %v739_v60 = vmul.f32 %v1562_v3, %v2132_v0 }
  0x8b   : > { %v628_v28 = vmul.f32 %v1542_v59, %v2166_v22  ;;  %vm663_vm1 = vcmp.eq.s32.totalorder %v1879_v11, %v2169_v25  ;;  %vm530_vm2 = vcmp.eq.s32.totalorder %v1941_v27, %v2156_v9  ;;  %vm656_vm3 = vcmp.eq.s32.totalorder %v1941_v27, %v2169_v25 }
  0x8c   : > { %1588 = vmatpush.msk.msrb.mxu1 %vm791_vm6, %v774_v17  ;;  %v1570_v4 = vsel %vm663_vm1, 1.0, %v2759_v24  ;;  %v2189_v38 = vsub.f32 %v435_v23, %v470_v19  ;;  %v2191_v8 = vcvt.f32.s32 %v470_v19  ;;  %v767_v13 = vadd.f32 %v739_v60, %v620_v55 }
  0x8d   : > { %v747_v29 = vmul.f32 %v1570_v4, %v2154_v56  ;;  %v1535_v30 = vsel %vm530_vm2, 1.0, %v2759_v24  ;;  %v613_v31 = vmul.f32 %v1527_v18, %v2139_v47  ;;  %v1563_v40 = vsel %vm656_vm3, 1.0, %v2759_v24 }
  0x8e   : > { %vm538_vm4 = vcmp.eq.s32.totalorder %v1879_v11, %v2191_v8  ;;  %v2203_v32 = vsub.f32 1.0, %v2189_v38  ;;  %v2206_v33 = vadd.s32 1, %v2191_v8  ;;  %913 = vmatpush.msrb.mxu1 %v767_v13  ;;  %v621_v36 = vmul.f32 %v1535_v30, %v2166_v22 }
  0x8f   : > { %v775_v37 = vadd.f32 %v747_v29, %v628_v28  ;;  %v1543_v12 = vsel %vm538_vm4, 1.0, %v2759_v24  ;;  %vm531_vm5 = vcmp.eq.s32.totalorder %v1941_v27, %v2191_v8  ;;  %v740_v20 = vmul.f32 %v1563_v40, %v2154_v56 }
  0x90   : > { %v629_v42 = vmul.f32 %v1543_v12, %v2203_v32  ;;  %vm664_vm7 = vcmp.eq.s32.totalorder %v1879_v11, %v2206_v33  ;;  %v1536_v53 = vsel %vm531_vm5, 1.0, %v2759_v24  ;;  %vm657_vm8 = vcmp.eq.s32.totalorder %v1941_v27, %v2206_v33 }
  0x91   : > { %1593 = vmatpush.msk.msrb.mxu2 %vm791_vm6, %v775_v37  ;;  %v1571_v45 = vsel %vm664_vm7, 1.0, %v2759_v24  ;;  %v622_v46 = vmul.f32 %v1536_v53, %v2203_v32  ;;  %vm648_vm10 = vcmp.eq.s32.totalorder %v1964_v43, %v2142_v7  ;;  %v768_v63 = vadd.f32 %v740_v20, %v621_v36 }
  0x92   : > { %v748_v52 = vmul.f32 %v1571_v45, %v2189_v38  ;;  %v1564_v55 = vsel %vm657_vm8, 1.0, %v2759_v24  ;;  %v1555_v16 = vsel %vm648_vm10, 1.0, %v2759_v24  ;;  %vm523_vm11 = vcmp.eq.s32.totalorder %v1964_v43, %v2156_v9 }
  0x93   : > { %v741_v23 = vmul.f32 %v1564_v55, %v2189_v38  ;;  %v732_v18 = vmul.f32 %v1555_v16, %v2132_v0  ;;  %942 = vmatpush.msrb.mxu2 %v768_v63  ;;  %v1528_v17 = vsel %vm523_vm11, 1.0, %v2759_v24  ;;  %vm649_vm12 = vcmp.eq.s32.totalorder %v1964_v43, %v2169_v25 }
  0x94   : > { %v776_v3 = vadd.f32 %v748_v52, %v629_v42  ;;  %vm524_vm13 = vcmp.eq.s32.totalorder %v1964_v43, %v2191_v8  ;;  %v614_v60 = vmul.f32 %v1528_v17, %v2166_v22  ;;  %v1556_v28 = vsel %vm649_vm12, 1.0, %v2759_v24 }
  0x95   : > { %v769_v59 = vadd.f32 %v741_v23, %v622_v46  ;;  %v760_v19 = vadd.f32 %v732_v18, %v613_v31  ;;  %v733_v4 = vmul.f32 %v1556_v28, %v2154_v56  ;;  %v1529_v13 = vsel %vm524_vm13, 1.0, %v2759_v24 }
  0x96   : > { %1598 = vmatpush.msk.msrb.mxu3 %vm791_vm6, %v776_v3  ;;  %vm650_vm14 = vcmp.eq.s32.totalorder %v1964_v43, %v2206_v33  ;;  %vm515_vm15 = vcmp.eq.s32.totalorder %v1872_v2, %v2134_v39  ;;  %v615_v29 = vmul.f32 %v1529_v13, %v2203_v32  ;;  %vm641_vm1 = vcmp.eq.s32.totalorder %v1872_v2, %v2142_v7 }
  0x97   : > { %914 = vmatpush.msrb.mxu1 %v760_v19  ;;  %v1557_v30 = vsel %vm650_vm14, 1.0, %v2759_v24  ;;  %v1520_v31 = vsel %vm515_vm15, 1.0, %v2759_v24  ;;  %v761_v36 = vadd.f32 %v733_v4, %v614_v60  ;;  %v1548_v40 = vsel %vm641_vm1, 1.0, %v2759_v24 }
  0x98   : > { %971 = vmatpush.msrb.mxu3 %v769_v59  ;;  %v734_v37 = vmul.f32 %v1557_v30, %v2189_v38  ;;  %v606_v12 = vmul.f32 %v1520_v31, %v2139_v47  ;;  %v725_v39 = vmul.f32 %v1548_v40, %v2132_v0  ;;  %vm516_vm2 = vcmp.eq.s32.totalorder %v1872_v2, %v2156_v9 }
  0x99   : > { %vm642_vm3 = vcmp.eq.s32.totalorder %v1872_v2, %v2169_v25  ;;  %vm517_vm4 = vcmp.eq.s32.totalorder %v1872_v2, %v2191_v8  ;;  %943 = vmatpush.msrb.mxu2 %v761_v36  ;;  %v1521_v20 = vsel %vm516_vm2, 1.0, %v2759_v24  ;;  %vm643_vm5 = vcmp.eq.s32.totalorder %v1872_v2, %v2206_v33 }
  0x9a   : > { %v762_v42 = vadd.f32 %v734_v37, %v615_v29  ;;  %v1549_v47 = vsel %vm642_vm3, 1.0, %v2759_v24  ;;  %v1522_v53 = vsel %vm517_vm4, 1.0, %v2759_v24  ;;  %v753_v0 = vadd.f32 %v725_v39, %v606_v12 }
  0x9b   : > { %v607_v9 = vmul.f32 %v1521_v20, %v2166_v22  ;;  %v726_v25 = vmul.f32 %v1549_v47, %v2154_v56  ;;  %v608_v8 = vmul.f32 %v1522_v53, %v2203_v32  ;;  %v1550_v46 = vsel %vm643_vm5, 1.0, %v2759_v24 }
  0x9c   : > { %972 = vmatpush.msrb.mxu3 %v762_v42  ;;  %915 = vmatpush.msrb.mxu1 %v753_v0  ;;  %v727_v52 = vmul.f32 %v1550_v46, %v2189_v38  ;;  %v2327_v33 = vstv %s346_s8 }
  0x9d   : > { %v754_v45 = vadd.f32 %v726_v25, %v607_v9 }
  0x9e   : > { %v755_v56 = vadd.f32 %v727_v52, %v608_v8 }
  0x9f   : > { %944 = vmatpush.msrb.mxu2 %v754_v45 }
  0xa0   : > { %973 = vmatpush.msrb.mxu3 %v755_v56 }
  0xa6   : > { %v2172_v21 = vpop.f32.mrf.mxu0 }
  0xa7   : > { %1574 = vmatmul.msk.f32.vlgmr.msra.gmra.mxu1 %vm778_vm9, %v2172_v21  ;;  %1579 = vmatmul.msk.f32.vlgmr.msra.gmra.mxu2 %vm778_vm9, %v2172_v21 }
  0xa8   : > { %1584 = vmatmul.msk.f32.vlgmr.msra.gmra.mxu3 %vm778_vm9, %v2172_v21  ;;  %1604 = vmatmul.msk.f32.vlgmr.msrb.gmra.mxu0 %vm778_vm9, %v2172_v21 }
  0xa9   : > { %1667 = vmatpush.msk.msra.mxu1 %vm791_vm6, %v2051_v49  ;;  %v2315_v49 = vstv %s342_s5 }
  0xaa   : > { %v385_v38 = vmul.f32 %v1956_v34, %v2315_v49  ;;  %v380_v55 = vmul.f32 %v1881_v14, %v2315_v49  ;;  %v381_v34 = vmul.f32 %v1912_v57, %v2315_v49  ;;  %v382_v9 = vmul.f32 %v2102_v58, %v2315_v49 }
  0xab   : > { %1668 = vmatpush.msra.mxu1 %v2053_v51  ;;  %v2317_v51 = vstv %s344_s6 }
  0xac   : > { %v393_v32 = vmul.f32 %v1938_v26, %v2317_v51  ;;  %v389_v26 = vmul.f32 %v1909_v50, %v2317_v51  ;;  %v390_v25 = vmul.f32 %v2099_v41, %v2317_v51 }
  0xad   : > { %1669 = vmatpush.msra.mxu1 %v2057_v54  ;;  %v379_v54 = vmul.f32 %v1858_v48, %v2315_v49  ;;  %v388_v48 = vmul.f32 %v1874_v5, %v2317_v51 }
  0xae   : > { %v2226_v62 = vpop.f32.mrf.mxu0  ;;  %v400_v63 = vadd.f32 %v393_v32, %v385_v38  ;;  %v396_v17 = vadd.f32 %v389_v26, %v381_v34  ;;  %v397_v41 = vadd.f32 %v390_v25, %v382_v9  ;;  %v391_v38 = vmul.f32 %v2106_v6, %v2317_v51 }
  0xaf   : > { %1575 = vmatmul.msk.f32.gmra.mxu1 %vm778_vm9, %v2226_v62  ;;  %1580 = vmatmul.msk.f32.gmra.mxu2 %vm778_vm9, %v2226_v62  ;;  %v395_v23 = vadd.f32 %v388_v48, %v380_v55  ;;  %v392_v34 = vmul.f32 %v2119_v1, %v2317_v51 }
  0xb0   : > { %1585 = vmatmul.msk.f32.gmra.mxu3 %vm778_vm9, %v2226_v62  ;;  %1605 = vmatmul.msk.f32.gmra.mxu0 %vm778_vm9, %v2226_v62  ;;  %v404_v60 = vadd.f32 %v2327_v33, %v396_v17  ;;  %v405_v55 = vadd.f32 %v2327_v33, %v397_v41 }
  0xb1   : > { %1670 = vmatpush.msra.mxu1 %v2092_v35  ;;  %v387_v35 = vmul.f32 %v1853_v44, %v2317_v51  ;;  %v408_v44 = vadd.f32 %v2327_v33, %v400_v63  ;;  %v403_v59 = vadd.f32 %v2327_v33, %v395_v23 }
  0xb2   : > { %v439_v13 = vadd.f32 1.0, %v404_v60 }
  0xb3   : > { %v443_v3 = vadd.f32 1.0, %v408_v44  ;;  %v438_v5 = vadd.f32 1.0, %v403_v59  ;;  %v384_v44 = vmul.f32 %v2124_v15, %v2315_v49 }
  0xb4   : > { %v446_v31 = vmul.f32 26.0, %v439_v13 }
  0xb5   : > { %v450_v14 = vmul.f32 26.0, %v443_v3  ;;  %v445_v29 = vmul.f32 26.0, %v438_v5  ;;  %v440_v3 = vadd.f32 1.0, %v405_v55  ;;  %v399_v17 = vadd.f32 %v392_v34, %v384_v44 }
  0xb6   : > { %v209_v7 = vpop.f32.mrf.mxu0  ;;  %v1512_v12 = vadd.f32 -1.0, %v446_v31 }
  0xb7   : > { %1576 = vmatmul.msk.f32.gmra.mxu1 %vm778_vm9, %v209_v7  ;;  %1581 = vmatmul.msk.f32.gmra.mxu2 %vm778_vm9, %v209_v7  ;;  %v1516_v4 = vadd.f32 -1.0, %v450_v14  ;;  %v1511_v36 = vadd.f32 -1.0, %v445_v29  ;;  %v407_v13 = vadd.f32 %v2327_v33, %v399_v17 }
  0xb8   : > { %1586 = vmatmul.msk.f32.gmra.mxu3 %vm778_vm9, %v209_v7  ;;  %1606 = vmatmul.msk.f32.gmra.mxu0 %vm778_vm9, %v209_v7  ;;  %v460_v42 = vmul.f32 0.5, %v1512_v12 }
  0xb9   : > { %v464_v57 = vmul.f32 0.5, %v1516_v4  ;;  %v459_v40 = vmul.f32 0.5, %v1511_v36  ;;  %v447_v4 = vmul.f32 26.0, %v440_v3  ;;  %v442_v9 = vadd.f32 1.0, %v407_v13 }
  0xba   : > { %v474_v0 = vfloor.f32 %v460_v42 }
  0xbb   : > { %v478_v37 = vfloor.f32 %v464_v57  ;;  %v473_v47 = vfloor.f32 %v459_v40 }
  0xbc   : > { %v2374_v58 = vcvt.f32.s32 %v474_v0  ;;  %v2393_v48 = vsub.f32 %v460_v42, %v474_v0  ;;  %v1513_v0 = vadd.f32 -1.0, %v447_v4 }
  0xbd   : > { %v2364_v45 = vsub.f32 %v464_v57, %v478_v37  ;;  %v2368_v56 = vcvt.f32.s32 %v473_v47 }
  0xbe   : > { %v212_v22 = vpop.f32.mrf.mxu0  ;;  %vm1018_vm14 = vcmp.eq.s32.totalorder %v1872_v2, %v2374_v58  ;;  %vm1025_vm5 = vcmp.eq.s32.totalorder %v1964_v43, %v2374_v58  ;;  %v461_v34 = vmul.f32 0.5, %v1513_v0 }
  0xbf   : > { %1577 = vmatmul.msk.f32.gmra.mxu1 %vm778_vm9, %v212_v22  ;;  %1582 = vmatmul.msk.f32.gmra.mxu2 %vm778_vm9, %v212_v22  ;;  %v2388_v63 = vadd.s32 1, %v2368_v56  ;;  %vm1017_vm10 = vcmp.eq.s32.totalorder %v1872_v2, %v2368_v56  ;;  %v1610_v5 = vsel %vm1018_vm14, 1.0, %v2759_v24  ;;  %vm1024_vm3 = vcmp.eq.s32.totalorder %v1964_v43, %v2368_v56 }
  0xc0   : > { %1587 = vmatmul.msk.f32.gmra.mxu3 %vm778_vm9, %v212_v22  ;;  %v1609_v15 = vsel %vm1017_vm10, 1.0, %v2759_v24 }
  0xc1   : > { %vm1143_vm11 = vcmp.eq.s32.totalorder %v1872_v2, %v2388_v63  ;;  %vm1150_vm4 = vcmp.eq.s32.totalorder %v1964_v43, %v2388_v63 }
  0xc2   : > { %v1637_v59 = vsel %vm1143_vm11, 1.0, %v2759_v24  ;;  %vm1031_vm11 = vcmp.eq.s32.totalorder %v1941_v27, %v2368_v56 }
  0xc7   : > { %1589 = vmatmul.msk.f32.vlgmr.msrb.gmra.mxu1 %vm778_vm9, %v2172_v21  ;;  %1594 = vmatmul.msk.f32.vlgmr.msrb.gmra.mxu2 %vm778_vm9, %v2172_v21 }
  0xc8   : > { %1599 = vmatmul.msk.f32.vlgmr.msrb.gmra.mxu3 %vm778_vm9, %v2172_v21  ;;  %v394_v21 = vadd.f32 %v387_v35, %v379_v54 }
  0xcf   : > { %1590 = vmatmul.msk.f32.gmra.mxu1 %vm778_vm9, %v2226_v62  ;;  %1595 = vmatmul.msk.f32.gmra.mxu2 %vm778_vm9, %v2226_v62 }
  0xd0   : > { %1600 = vmatmul.msk.f32.gmra.mxu3 %vm778_vm9, %v2226_v62  ;;  %v402_v62 = vadd.f32 %v2327_v33, %v394_v21  ;;  %v2381_v21 = vsub.f32 1.0, %v2364_v45 }
  0xd2   : > { %v437_v16 = vadd.f32 1.0, %v402_v62 }
  0xd4   : > { %v444_v18 = vmul.f32 26.0, %v437_v16  ;;  %v2396_v16 = vadd.s32 1, %v2374_v58 }
  0xd6   : > { %v1510_v19 = vadd.f32 -1.0, %v444_v18  ;;  %vm1144_vm15 = vcmp.eq.s32.totalorder %v1872_v2, %v2396_v16  ;;  %vm1158_vm14 = vcmp.eq.s32.totalorder %v1941_v27, %v2396_v16 }
  0xd7   : > { %1591 = vmatmul.msk.f32.gmra.mxu1 %vm778_vm9, %v209_v7  ;;  %1596 = vmatmul.msk.f32.gmra.mxu2 %vm778_vm9, %v209_v7 }
  0xd8   : > { %1601 = vmatmul.msk.f32.gmra.mxu3 %vm778_vm9, %v209_v7  ;;  %v458_v28 = vmul.f32 0.5, %v1510_v19  ;;  %v2346_v7 = vcvt.f32.s32 %v478_v37 }
  0xda   : > { %v472_v30 = vfloor.f32 %v458_v28  ;;  %v2355_v53 = vadd.s32 1, %v2346_v7  ;;  %vm1022_vm7 = vcmp.eq.s32.totalorder %v1872_v2, %v2346_v7  ;;  %vm1029_vm1 = vcmp.eq.s32.totalorder %v1964_v43, %v2346_v7 }
  0xdb   : > { %v1614_v32 = vsel %vm1022_vm7, 1.0, %v2759_v24  ;;  %v1621_v57 = vsel %vm1029_vm1, 1.0, %v2759_v24 }
  0xdc   : > { %v2341_v50 = vcvt.f32.s32 %v472_v30  ;;  %v2348_v20 = vsub.f32 %v458_v28, %v472_v30  ;;  %vm1148_vm8 = vcmp.eq.s32.totalorder %v1872_v2, %v2355_v53  ;;  %v1113_v23 = vmul.f32 %v1614_v32, %v2381_v21 }
  0xdd   : > { %v1642_v62 = vsel %vm1148_vm8, 1.0, %v2759_v24  ;;  %vm1155_vm2 = vcmp.eq.s32.totalorder %v1964_v43, %v2355_v53  ;;  %v1638_v28 = vsel %vm1144_vm15, 1.0, %v2759_v24  ;;  %vm1036_vm8 = vcmp.eq.s32.totalorder %v1941_v27, %v2346_v7 }
  0xde   : > { %v2344_v39 = vadd.s32 1, %v2341_v50  ;;  %vm1016_vm6 = vcmp.eq.s32.totalorder %v1872_v2, %v2341_v50  ;;  %v2362_v8 = vsub.f32 1.0, %v2348_v20  ;;  %v1232_v18 = vmul.f32 %v1642_v62, %v2364_v45 }
  0xdf   : > { %1592 = vmatmul.msk.f32.gmra.mxu1 %vm778_vm9, %v212_v22  ;;  %1597 = vmatmul.msk.f32.gmra.mxu2 %vm778_vm9, %v212_v22  ;;  %v1608_v46 = vsel %vm1016_vm6, 1.0, %v2759_v24  ;;  %vm1023_vm12 = vcmp.eq.s32.totalorder %v1964_v43, %v2341_v50  ;;  %vm1151_vm6 = vcmp.eq.s32.totalorder %v1964_v43, %v2396_v16  ;;  %v1617_v62 = vsel %vm1025_vm5, 1.0, %v2759_v24 }
  0xe0   : > { %1602 = vmatmul.msk.f32.gmra.mxu3 %vm778_vm9, %v212_v22  ;;  %v1107_v54 = vmul.f32 %v1608_v46, %v2362_v8  ;;  %vm1149_vm13 = vcmp.eq.s32.totalorder %v1964_v43, %v2344_v39  ;;  %v1615_v19 = vsel %vm1023_vm12, 1.0, %v2759_v24  ;;  %v2438_v29 = vadd.f32 %v1232_v18, %v1113_v23 }
  0xe1   : > { %v1643_v14 = vsel %vm1149_vm13, 1.0, %v2759_v24  ;;  %v1114_v37 = vmul.f32 %v1615_v19, %v2362_v8  ;;  %vm1156_vm7 = vcmp.eq.s32.totalorder %v1941_v27, %v2344_v39  ;;  %v449_v23 = vmul.f32 26.0, %v442_v9 }
  0xe2   : > { %v1233_v12 = vmul.f32 %v1643_v14, %v2348_v20  ;;  %v1628_v19 = vsel %vm1036_vm8, 1.0, %v2759_v24  ;;  %vm1162_vm10 = vcmp.eq.s32.totalorder %v1941_v27, %v2355_v53  ;;  %vm1157_vm12 = vcmp.eq.s32.totalorder %v1941_v27, %v2388_v63 }
  0xe3   : > { %vm1032_vm13 = vcmp.eq.s32.totalorder %v1941_v27, %v2374_v58  ;;  %v1515_v4 = vadd.f32 -1.0, %v449_v23  ;;  %vm1037_vm15 = vcmp.eq.s32.totalorder %v1879_v11, %v2341_v50  ;;  %vm1163_vm1 = vcmp.eq.s32.totalorder %v1879_v11, %v2344_v39 }
  0xe4   : > { %vm1039_vm5 = vcmp.eq.s32.totalorder %v1879_v11, %v2374_v58 }
  0xe7   : > { %1607 = vmatmul.msk.f32.vlgmr.msra.gmra.mxu1 %vm778_vm9, %v212_v22  ;;  %vm1142_vm9 = vcmp.eq.s32.totalorder %v1872_v2, %v2344_v39  ;;  %v383_v22 = vmul.f32 %v2114_v61, %v2315_v49  ;;  %v2391_v61 = vsub.f32 %v459_v40, %v473_v47  ;;  %v2423_v49 = vsub.f32 1.0, %v2393_v48 }
  0xe8   : > { %v1636_v52 = vsel %vm1142_vm9, 1.0, %v2759_v24  ;;  %v1649_v40 = vsel %vm1155_vm2, 1.0, %v2759_v24  ;;  %v1228_v47 = vmul.f32 %v1638_v28, %v2393_v48  ;;  %vm1030_vm9 = vcmp.eq.s32.totalorder %v1941_v27, %v2341_v50 }
  0xe9   : > { %v1226_v35 = vmul.f32 %v1636_v52, %v2348_v20  ;;  %v398_v6 = vadd.f32 %v391_v38, %v383_v22  ;;  %v2416_v1 = vsub.f32 1.0, %v2391_v61  ;;  %v1227_v36 = vmul.f32 %v1637_v59, %v2391_v61 }
  0xea   : > { %v1109_v42 = vmul.f32 %v1610_v5, %v2423_v49  ;;  %v1239_v25 = vmul.f32 %v1649_v40, %v2364_v45  ;;  %v2464_v22 = vadd.f32 %v1233_v12, %v1114_v37  ;;  %v1622_v44 = vsel %vm1030_vm9, 1.0, %v2759_v24 }
  0xeb   : > { %v2404_v26 = vadd.f32 %v1226_v35, %v1107_v54  ;;  %v406_v51 = vadd.f32 %v2327_v33, %v398_v6  ;;  %v1108_v30 = vmul.f32 %v1609_v15, %v2416_v1  ;;  %v1120_v33 = vmul.f32 %v1621_v57, %v2381_v21 }
  0xec   : > { %v1616_v54 = vsel %vm1024_vm3, 1.0, %v2759_v24  ;;  %v1644_v35 = vsel %vm1150_vm4, 1.0, %v2759_v24  ;;  %v2470_v32 = vadd.f32 %v1228_v47, %v1109_v42  ;;  %v1645_v6 = vsel %vm1151_vm6, 1.0, %v2759_v24 }
  0xed   : > { %v441_v31 = vadd.f32 1.0, %v406_v51  ;;  %v2462_v41 = vadd.f32 %v1227_v36, %v1108_v30  ;;  %v2481_v18 = vadd.f32 %v1239_v25, %v1120_v33  ;;  %v1115_v3 = vmul.f32 %v1616_v54, %v2416_v1 }
  0xee   : > { %v1234_v15 = vmul.f32 %v1644_v35, %v2391_v61  ;;  %v1116_v17 = vmul.f32 %v1617_v62, %v2423_v49  ;;  %v1650_v59 = vsel %vm1156_vm7, 1.0, %v2759_v24  ;;  %v1235_v14 = vmul.f32 %v1645_v6, %v2393_v48 }
  0xef   : > { %v448_v46 = vmul.f32 26.0, %v441_v31  ;;  %v1121_v5 = vmul.f32 %v1622_v44, %v2362_v8  ;;  %v475_v28 = vfloor.f32 %v461_v34  ;;  %v1240_v13 = vmul.f32 %v1650_v59, %v2348_v20 }
  0xf0   : > { %v1127_v30 = vmul.f32 %v1628_v19, %v2381_v21  ;;  %v1656_v57 = vsel %vm1162_vm10, 1.0, %v2759_v24  ;;  %v1623_v37 = vsel %vm1031_vm11, 1.0, %v2759_v24  ;;  %v1651_v12 = vsel %vm1157_vm12, 1.0, %v2759_v24 }
  0xf1   : > { %v1514_v51 = vadd.f32 -1.0, %v448_v46  ;;  %v1624_v42 = vsel %vm1032_vm13, 1.0, %v2759_v24  ;;  %v1652_v47 = vsel %vm1158_vm14, 1.0, %v2759_v24  ;;  %vm1038_vm2 = vcmp.eq.s32.totalorder %v1879_v11, %v2368_v56 }
  0xf2   : > { %vm1164_vm3 = vcmp.eq.s32.totalorder %v1879_v11, %v2388_v63  ;;  %vm1370_vm4 = vcmask 97280   ;;  %vm1165_vm6 = vcmp.eq.s32.totalorder %v1879_v11, %v2396_v16  ;;  %v2525_v50 = vcvt.f32.s32 %v475_v28 }
  0xf3   : > { %v462_v31 = vmul.f32 0.5, %v1514_v51  ;;  %v463_v39 = vmul.f32 0.5, %v1515_v4  ;;  %v1246_v9 = vmul.f32 %v1656_v57, %v2364_v45  ;;  %v1629_v56 = vsel %vm1037_vm15, 1.0, %v2759_v24 }
  0xf4   : > { %v1657_v25 = vsel %vm1163_vm1, 1.0, %v2759_v24  ;;  %v1122_v46 = vmul.f32 %v1623_v37, %v2416_v1  ;;  %v1241_v54 = vmul.f32 %v1651_v12, %v2391_v61  ;;  %v1630_v35 = vsel %vm1038_vm2, 1.0, %v2759_v24 }
  0xf5   : > { %v476_v63 = vfloor.f32 %v462_v31  ;;  %v1658_v58 = vsel %vm1164_vm3, 1.0, %v2759_v24  ;;  %v1123_v16 = vmul.f32 %v1624_v42, %v2423_v49  ;;  %v1242_v62 = vmul.f32 %v1652_v47, %v2393_v48 }
  0xf6   : > { %v1631_v6 = vsel %vm1039_vm5, 1.0, %v2759_v24  ;;  %v1659_v44 = vsel %vm1165_vm6, 1.0, %v2759_v24  ;;  %v1128_v23 = vmul.f32 %v1629_v56, %v2362_v8  ;;  %v1247_v51 = vmul.f32 %v1657_v25, %v2348_v20 }
  0xf7   : > { %v2541_v59 = vadd.s32 1, %v2525_v50  ;;  %v477_v19 = vfloor.f32 %v463_v39  ;;  %v1129_v4 = vmul.f32 %v1630_v35, %v2416_v1  ;;  %v1248_v57 = vmul.f32 %v1658_v58, %v2391_v61 }
  0xf8   : > { %v2545_v37 = vsub.f32 %v461_v34, %v475_v28  ;;  %v2547_v12 = vcvt.f32.s32 %v476_v63  ;;  %v1262_v42 = vadd.f32 %v1234_v15, %v1115_v3  ;;  %v1263_v47 = vadd.f32 %v1235_v14, %v1116_v17 }
  0xf9   : > { %v1130_v8 = vmul.f32 %v1631_v6, %v2423_v49  ;;  %v1249_v20 = vmul.f32 %v1659_v44, %v2393_v48  ;;  %v1268_v25 = vadd.f32 %v1240_v13, %v1121_v5  ;;  %v2554_v24 = vadd.f32 %v1246_v9, %v1127_v30 }
  0xfa   : > { %vm1019_vm9 = vcmp.eq.s32.totalorder %v1872_v2, %v2525_v50  ;;  %v1269_v61 = vadd.f32 %v1241_v54, %v1122_v46  ;;  %v2560_v34 = vadd.f32 %v1242_v62, %v1123_v16  ;;  %vm1145_vm7 = vcmp.eq.s32.totalorder %v1872_v2, %v2541_v59 }
  0xfb   : > { %v2564_v49 = vcvt.f32.s32 %v477_v19  ;;  %v1275_v48 = vadd.f32 %v1247_v51, %v1128_v23  ;;  %v2566_v15 = vadd.f32 %v1248_v57, %v1129_v4  ;;  %v2572_v17 = vadd.s32 1, %v2547_v12 }
  0xfc   : > { %v2574_v5 = vadd.f32 %v1249_v20, %v1130_v8  ;;  %v2761_v28 = vmov 0.0   ;;  %v2577_v30 = vsub.f32 %v462_v31, %v476_v63  ;;  %vm1026_vm8 = vcmp.eq.s32.totalorder %v1964_v43, %v2525_v50 }
  0xfd   : > { %v1611_v13 = vsel %vm1019_vm9, 1.0, %v2761_v28  ;;  %v1639_v54 = vsel %vm1145_vm7, 1.0, %v2761_v28  ;;  %vm1020_vm10 = vcmp.eq.s32.totalorder %v1872_v2, %v2547_v12  ;;  %v2593_v31 = vsub.f32 %v463_v39, %v477_v19 }
  0xfe   : > { %v2596_v63 = vadd.s32 1, %v2564_v49  ;;  %vm1146_vm11 = vcmp.eq.s32.totalorder %v1872_v2, %v2572_v17  ;;  %v2606_v39 = vsub.f32 1.0, %v2577_v30  ;;  %vm1021_vm12 = vcmp.eq.s32.totalorder %v1872_v2, %v2564_v49 }
  0xff   : > { %v1612_v62 = vsel %vm1020_vm10, 1.0, %v2761_v28  ;;  %vm1152_vm13 = vcmp.eq.s32.totalorder %v1964_v43, %v2541_v59  ;;  %v1640_v44 = vsel %vm1146_vm11, 1.0, %v2761_v28  ;;  %v2620_v23 = vsub.f32 1.0, %v2593_v31 }
 0x100   : > { %vm1147_vm14 = vcmp.eq.s32.totalorder %v1872_v2, %v2596_v63  ;;  %vm1027_vm15 = vcmp.eq.s32.totalorder %v1964_v43, %v2547_v12  ;;  %v1111_v4 = vmul.f32 %v1612_v62, %v2606_v39  ;;  %v1646_v57 = vsel %vm1152_vm13, 1.0, %v2761_v28 }
 0x101   : > { %v1230_v2 = vmul.f32 %v1640_v44, %v2577_v30  ;;  %vm1153_vm1 = vcmp.eq.s32.totalorder %v1964_v43, %v2572_v17  ;;  %vm1028_vm2 = vcmp.eq.s32.totalorder %v1964_v43, %v2564_v49  ;;  %vm1154_vm3 = vcmp.eq.s32.totalorder %v1964_v43, %v2596_v63 }
 0x102   : > { %vm1033_vm5 = vcmp.eq.s32.totalorder %v1941_v27, %v2525_v50  ;;  %vm1159_vm6 = vcmp.eq.s32.totalorder %v1941_v27, %v2541_v59  ;;  %vm1040_vm9 = vcmp.eq.s32.totalorder %v1879_v11, %v2525_v50  ;;  %vm1166_vm7 = vcmp.eq.s32.totalorder %v1879_v11, %v2541_v59 }
 0x103   : > { %vm1160_vm10 = vcmp.eq.s32.totalorder %v1941_v27, %v2572_v17  ;;  %vm1035_vm11 = vcmp.eq.s32.totalorder %v1941_v27, %v2564_v49  ;;  %vm1041_vm13 = vcmp.eq.s32.totalorder %v1879_v11, %v2547_v12 }
 0x124   : > { %v2433_v60 = vpop.f32.mrf.mxu1 }
 0x125   : > { %v1004_v33 = vpop.f32.mrf.mxu0 }
 0x126   : > { %v1288_v56 = vmul.f32 %v2438_v29, %v1004_v33  ;;  %v2569_v29 = vsub.f32 1.0, %v2545_v37  ;;  %v1282_v33 = vmul.f32 %v2404_v26, %v2433_v60 }
 0x128   : > { %v2584_v9 = vsel %vm1370_vm4, %v1288_v56, 0.0  ;;  %v1110_v60 = vmul.f32 %v1611_v13, %v2569_v29  ;;  %v1619_v56 = vsel %vm1027_vm15, 1.0, %v2761_v28  ;;  %v1236_v13 = vmul.f32 %v1646_v57, %v2545_v37 }
 0x129   : > { %v1118_v43 = vmul.f32 %v1619_v56, %v2606_v39  ;;  %vm1042_vm15 = vcmp.eq.s32.totalorder %v1879_v11, %v2564_v49 }
 0x12a   : > { %v2460_v52 = vpop.f32.mrf.mxu2 }
 0x12b   : > { %v2468_v38 = vpop.f32.mrf.mxu3  ;;  %v1283_v35 = vmul.f32 %v2462_v41, %v2460_v52  ;;  %v1229_v41 = vmul.f32 %v1639_v54, %v2545_v37 }
 0x12c   : > { %v2477_v55 = vpop.f32.mrf.mxu1 }
 0x12d   : > { %v1007_v14 = vpop.f32.mrf.mxu0  ;;  %v1289_v46 = vmul.f32 %v2464_v22, %v2477_v55  ;;  %v1618_v22 = vsel %vm1026_vm8, 1.0, %v2761_v28  ;;  %v2631_v19 = vadd.f32 %v1229_v41, %v1110_v60  ;;  %v1648_v60 = vsel %vm1154_vm3, 1.0, %v2761_v28 }
 0x12e   : > { %v1295_v26 = vmul.f32 %v2481_v18, %v1007_v14  ;;  %v1284_v18 = vmul.f32 %v2470_v32, %v2468_v38  ;;  %v1613_v32 = vsel %vm1021_vm12, 1.0, %v2761_v28  ;;  %v1117_v51 = vmul.f32 %v1618_v22, %v2569_v29 }
 0x12f   : > { %v1310_v58 = vadd.f32 %v1289_v46, %v1282_v33  ;;  %v1112_v20 = vmul.f32 %v1613_v32, %v2620_v23  ;;  %v1647_v46 = vsel %vm1153_vm1, 1.0, %v2761_v28  ;;  %v1625_v22 = vsel %vm1033_vm5, 1.0, %v2761_v28 }
 0x130   : > { %v2625_v38 = vsel %vm1370_vm4, %v1295_v26, 0.0  ;;  %v1264_v41 = vadd.f32 %v1236_v13, %v1117_v51  ;;  %vm1034_vm8 = vcmp.eq.s32.totalorder %v1941_v27, %v2547_v12  ;;  %vm1161_vm12 = vcmp.eq.s32.totalorder %v1941_v27, %v2596_v63 }
 0x131   : > { %v1627_v27 = vsel %vm1035_vm11, 1.0, %v2761_v28  ;;  %v1655_v13 = vsel %vm1161_vm12, 1.0, %v2761_v28  ;;  %vm1168_vm1 = vcmp.eq.s32.totalorder %v1879_v11, %v2596_v63  ;;  %vm1169_vm3 = vcmp.eq.s32.totalorder %v1879_v11, %v2355_v53 }
 0x132   : > { %v2503_v36 = vpop.f32.mrf.mxu2  ;;  %v1245_v12 = vmul.f32 %v1655_v13, %v2593_v31  ;;  %v1634_v63 = vsel %vm1042_vm15, 1.0, %v2761_v28  ;;  %v1663_v53 = vsel %vm1169_vm3, 1.0, %v2761_v28  ;;  %vm1376_vm5 = vcmask 91136  }
 0x133   : > { %v2511_v40 = vpop.f32.mrf.mxu3  ;;  %v1290_v55 = vmul.f32 %v1262_v42, %v2503_v36 }
 0x134   : > { %v2519_v0 = vpop.f32.mrf.mxu1  ;;  %v1291_v36 = vmul.f32 %v1263_v47, %v2511_v40  ;;  %v1641_v47 = vsel %vm1147_vm14, 1.0, %v2761_v28  ;;  %vm1167_vm14 = vcmp.eq.s32.totalorder %v1879_v11, %v2572_v17  ;;  %v1633_v17 = vsel %vm1041_vm13, 1.0, %v2761_v28 }
 0x135   : > { %v1320_v40 = vadd.f32 %v1290_v55, %v1283_v35  ;;  %v1296_v42 = vmul.f32 %v1268_v25, %v2519_v0  ;;  %v1231_v33 = vmul.f32 %v1641_v47, %v2593_v31  ;;  %v1620_v35 = vsel %vm1028_vm2, 1.0, %v2761_v28 }
 0x136   : > { %v1330_v8 = vadd.f32 %v1291_v36, %v1284_v18  ;;  %v1237_v18 = vmul.f32 %v1647_v46, %v2577_v30  ;;  %v1626_v47 = vsel %vm1034_vm8, 1.0, %v2761_v28  ;;  %vm1043_vm2 = vcmp.eq.s32.totalorder %v1879_v11, %v2346_v7 }
 0x137   : > { %v1311_v54 = vadd.f32 %v1310_v58, %v1296_v42  ;;  %v1653_v58 = vsel %vm1159_vm6, 1.0, %v2761_v28  ;;  %v2671_v44 = vadd.f32 %v1231_v33, %v1112_v20  ;;  %v1125_v46 = vmul.f32 %v1626_v47, %v2606_v39 }
 0x138   : > { %v1265_v51 = vadd.f32 %v1237_v18, %v1118_v43  ;;  %v1635_v11 = vsel %vm1043_vm2, 1.0, %v2761_v28  ;;  %vm1407_vm6 = vcmask 1040384   ;;  %vm1416_vm8 = vcmask 1043456  }
 0x13a   : > { %v2549_v10 = vpop.f32.mrf.mxu2 }
 0x13b   : > { %v2556_v1 = vpop.f32.mrf.mxu3  ;;  %v1297_v14 = vmul.f32 %v1269_v61, %v2549_v10  ;;  %v2656_v10 = vadd.f32 %v1230_v2, %v1111_v4  ;;  %v1660_v4 = vsel %vm1166_vm7, 1.0, %v2761_v28  ;;  %vm1414_vm7 = vcmask 1045508  }
 0x13c   : > { %v839_v3 = vpop.f32.mrf.mxu1  ;;  %v1250_v33 = vmul.f32 %v1660_v4, %v2545_v37 }
 0x13d   : > { %v1303_v0 = vmul.f32 %v1275_v48, %v839_v3  ;;  %v1298_v3 = vmul.f32 %v2560_v34, %v2556_v1  ;;  %v1321_v62 = vadd.f32 %v1320_v40, %v1297_v14  ;;  %v1119_v1 = vmul.f32 %v1620_v35, %v2620_v23 }
 0x13e   : > { %v1238_v34 = vmul.f32 %v1648_v60, %v2593_v31  ;;  %v1632_v40 = vsel %vm1040_vm9, 1.0, %v2761_v28  ;;  %v1661_v35 = vsel %vm1167_vm14, 1.0, %v2761_v28  ;;  %vm1412_vm9 = vcmask 1044484  }
 0x13f   : > { %v1312_v36 = vsel %vm182_vm0, %v1303_v0, 0.0  ;;  %v1131_v0 = vmul.f32 %v1632_v40, %v2569_v29 }
 0x140   : > { %v2691_v50 = vadd.f32 %v1312_v36, %v1311_v54  ;;  %v1266_v2 = vadd.f32 %v1238_v34, %v1119_v1 }
 0x142   : > { %v868_v52 = vpop.f32.mrf.mxu2 }
 0x143   : > { %v897_v16 = vpop.f32.mrf.mxu3  ;;  %v1304_v48 = vmul.f32 %v2566_v15, %v868_v52  ;;  %v1124_v15 = vmul.f32 %v1625_v22, %v2569_v29  ;;  %v1243_v52 = vmul.f32 %v1653_v58, %v2545_v37  ;;  %v1126_v29 = vmul.f32 %v1627_v27, %v2620_v23 }
 0x144   : > { %v2616_v6 = vpop.f32.mrf.mxu1  ;;  %v1305_v55 = vmul.f32 %v2574_v5, %v897_v16  ;;  %v1331_v16 = vadd.f32 %v1330_v8, %v1298_v3  ;;  %v1654_v8 = vsel %vm1160_vm10, 1.0, %v2761_v28  ;;  %v1278_v3 = vadd.f32 %v1250_v33, %v1131_v0 }
 0x145   : > { %v1322_v5 = vsel %vm182_vm0, %v1304_v48, 0.0  ;;  %v1271_v14 = vadd.f32 %v1243_v52, %v1124_v15  ;;  %v1244_v54 = vmul.f32 %v1654_v8, %v2577_v30  ;;  %v1662_v48 = vsel %vm1168_vm1, 1.0, %v2761_v28 }
 0x146   : > { %v1332_v32 = vsel %vm182_vm0, %v1305_v55, 0.0  ;;  %v1323_v57 = vadd.f32 %v1322_v5, %v1321_v62  ;;  %v1285_v60 = vmul.f32 %v2631_v19, %v2616_v6  ;;  %v1132_v58 = vmul.f32 %v1633_v17, %v2606_v39 }
 0x147   : > { %v1333_v20 = vadd.f32 %v1332_v32, %v1331_v16  ;;  %v1251_v62 = vmul.f32 %v1661_v35, %v2577_v30  ;;  %v1273_v1 = vadd.f32 %v1245_v12, %v1126_v29  ;;  %v1133_v15 = vmul.f32 %v1634_v63, %v2620_v23 }
 0x148   : > { %v1324_v43 = vrot.slane %v1323_v57, 4  ;;  %v1252_v6 = vmul.f32 %v1662_v48, %v2593_v31  ;;  %v1134_v52 = vmul.f32 %v1635_v11, %v2381_v21  ;;  %v1253_v28 = vmul.f32 %v1663_v53, %v2364_v45 }
 0x149   : > { %v1334_v49 = vrot.slane %v1333_v20, 4  ;;  %v1314_v32 = vrot.slane %v2691_v50, 4  ;;  %v1279_v47 = vadd.f32 %v1251_v62, %v1132_v58 }
 0x14a   : > { %v2650_v25 = vpop.f32.mrf.mxu2  ;;  %v1325_v55 = vadd.f32 %v1324_v43, %v1323_v57 }
 0x14b   : > { %v2658_v61 = vpop.f32.mrf.mxu3  ;;  %v1335_v19 = vadd.f32 %v1334_v49, %v1333_v20  ;;  %v1286_v31 = vmul.f32 %v2656_v10, %v2650_v25  ;;  %v1280_v20 = vadd.f32 %v1252_v6, %v1133_v15  ;;  %v1315_v27 = vadd.f32 %v1314_v32, %v2691_v50 }
 0x14c   : > { %v920_v26 = vpop.f32.mrf.mxu1  ;;  %v1326_v30 = vrot.slane %v1325_v55, 2  ;;  %v1287_v45 = vmul.f32 %v2671_v44, %v2658_v61  ;;  %v1386_v15 = vstv %s1385_s10 }
 0x14d   : > { %v1292_v37 = vmul.f32 %v1264_v41, %v920_v26  ;;  %v1010_v26 = vpop.f32.mrf.mxu0  ;;  %v1272_v41 = vadd.f32 %v1244_v54, %v1125_v46  ;;  %v1336_v21 = vrot.slane %v1335_v19, 2  ;;  %v1316_v17 = vrot.slane %v1315_v27, 2 }
 0x14e   : > { %v1302_v16 = vmul.f32 %v2554_v24, %v1010_v26  ;;  %v1327_v25 = vadd.f32 %v1326_v30, %v1325_v55 }
 0x14f   : > { %v1340_v36 = vadd.f32 %v1292_v37, %v1285_v60  ;;  %v1337_v44 = vadd.f32 %v1336_v21, %v1335_v19  ;;  %v1317_v55 = vadd.f32 %v1316_v17, %v1315_v27 }
 0x150   : > { %v1328_v60 = vrot.slane %v1327_v25, 1 }
 0x152   : > { %v949_v59 = vpop.f32.mrf.mxu2 }
 0x153   : > { %v978_v42 = vpop.f32.mrf.mxu3  ;;  %v1293_v39 = vmul.f32 %v1265_v51, %v949_v59  ;;  %v1373_v59 = vadd.f32 %v2625_v38, %v2584_v9  ;;  %v1374_v51 = vsel %vm1370_vm4, %v1302_v16, 0.0  ;;  %vm1409_vm4 = vcmask 1042434  }
 0x154   : > { %v923_v56 = vpop.f32.mrf.mxu1  ;;  %v1294_v4 = vmul.f32 %v1266_v2, %v978_v42 }
 0x155   : > { %v1299_v7 = vmul.f32 %v1271_v14, %v923_v56  ;;  %v1281_v56 = vadd.f32 %v1253_v28, %v1134_v52  ;;  %v1350_v42 = vadd.f32 %v1293_v39, %v1286_v31  ;;  %v1375_v29 = vadd.f32 %v1374_v51, %v1373_v59 }
 0x156   : > { %v1360_v10 = vadd.f32 %v1294_v4, %v1287_v45 }
 0x157   : > { %v1341_v40 = vadd.f32 %v1340_v36, %v1299_v7  ;;  %v1338_v7 = vrot.slane %v1337_v44, 1  ;;  %v1329_v36 = vadd.f32 %v1328_v60, %v1327_v25 }
 0x159   : > { %v1388_v39 = vadd.f32 %v1386_v15, %v1329_v36 }
 0x15a   : > { %v952_v22 = vpop.f32.mrf.mxu2 }
 0x15b   : > { %v981_v18 = vpop.f32.mrf.mxu3  ;;  %v1300_v23 = vmul.f32 %v1272_v41, %v952_v22  ;;  %v1401_v21 = vrot.slane %v1388_v39, 7 }
 0x15c   : > { %v926_v34 = vpop.f32.mrf.mxu1  ;;  %v1301_v24 = vmul.f32 %v1273_v1, %v981_v18  ;;  %v1339_v1 = vadd.f32 %v1338_v7, %v1337_v44 }
 0x15d   : > { %v1306_v5 = vmul.f32 %v1278_v3, %v926_v34  ;;  %v1351_v33 = vadd.f32 %v1350_v42, %v1300_v23 }
 0x15e   : > { %v1361_v43 = vadd.f32 %v1360_v10, %v1301_v24  ;;  %v2762_v10 = vlaneseq }
 0x15f   : > { %v1342_v57 = vsel %vm182_vm0, %v1306_v5, 0.0  ;;  %v1318_v5 = vrot.slane %v1317_v55, 1 }
 0x160   : > { %v1343_v8 = vadd.f32 %v1342_v57, %v1341_v40  ;;  %v1389_v40 = vadd.f32 %v1386_v15, %v1339_v1  ;;  %vm1421_vm10 = vcmp.lt.s32.totalorder %v2762_v10, 780 }
 0x162   : > { %v1344_v2 = vrot.slane %v1343_v8, 4  ;;  %v955_v14 = vpop.f32.mrf.mxu2  ;;  %v1402_v45 = vrot.slane %v1389_v40, 6 }
 0x163   : > { %v1307_v13 = vmul.f32 %v1279_v47, %v955_v14  ;;  %v984_v0 = vpop.f32.mrf.mxu3  ;;  %v1319_v47 = vadd.f32 %v1318_v5, %v1317_v55 }
 0x164   : > { %v1345_v46 = vadd.f32 %v1344_v2, %v1343_v8  ;;  %v1308_v54 = vmul.f32 %v1280_v20, %v984_v0  ;;  %v1013_v61 = vpop.f32.mrf.mxu1 }
 0x165   : > { %v1352_v9 = vsel %vm182_vm0, %v1307_v13, 0.0  ;;  %v1309_v38 = vmul.f32 %v1281_v56, %v1013_v61  ;;  %v1387_v51 = vadd.f32 %v1386_v15, %v1319_v47 }
 0x166   : > { %v1346_v37 = vrot.slane %v1345_v46, 2  ;;  %v1353_v12 = vadd.f32 %v1352_v9, %v1351_v33  ;;  %v1362_v50 = vsel %vm182_vm0, %v1308_v54, 0.0 }
 0x167   : > { %v1363_v35 = vadd.f32 %v1362_v50, %v1361_v43  ;;  %v1377_v49 = vsel %vm1376_vm5, %v1309_v38, 0.0  ;;  %v1408_v27 = vsel %vm1407_vm6, %v1387_v51, %v1401_v21 }
 0x168   : > { %v1347_v3 = vadd.f32 %v1346_v37, %v1345_v46  ;;  %v1354_v63 = vrot.slane %v1353_v12, 4  ;;  %v1378_v48 = vadd.f32 %v1377_v49, %v1375_v29 }
 0x169   : > { %v1364_v22 = vrot.slane %v1363_v35, 4 }
 0x16a   : > { %v1348_v11 = vrot.slane %v1347_v3, 1  ;;  %v1355_v53 = vadd.f32 %v1354_v63, %v1353_v12  ;;  %v1379_v26 = vrot.slane %v1378_v48, 4 }
 0x16b   : > { %v1365_v41 = vadd.f32 %v1364_v22, %v1363_v35 }
 0x16c   : > { %v1349_v18 = vadd.f32 %v1348_v11, %v1347_v3  ;;  %v1356_v58 = vrot.slane %v1355_v53, 2  ;;  %v1380_v62 = vadd.f32 %v1379_v26, %v1378_v48 }
 0x16d   : > { %v1366_v34 = vrot.slane %v1365_v41, 2 }
 0x16e   : > { %v1357_v6 = vadd.f32 %v1356_v58, %v1355_v53  ;;  %v1381_v19 = vrot.slane %v1380_v62, 2  ;;  %v1390_v52 = vadd.f32 %v1386_v15, %v1349_v18 }
 0x16f   : > { %v1367_v28 = vadd.f32 %v1366_v34, %v1365_v41 }
 0x170   : > { %v1358_v16 = vrot.slane %v1357_v6, 1  ;;  %v1382_v32 = vadd.f32 %v1381_v19, %v1380_v62  ;;  %v1403_v31 = vrot.slane %v1390_v52, 5 }
 0x171   : > { %v1368_v30 = vrot.slane %v1367_v28, 1 }
 0x172   : > { %v1359_v4 = vadd.f32 %v1358_v16, %v1357_v6  ;;  %v1383_v57 = vrot.slane %v1382_v32, 1  ;;  %v1410_v42 = vsel %vm1409_vm4, %v1402_v45, %v1403_v31 }
 0x173   : > { %v1369_v23 = vadd.f32 %v1368_v30, %v1367_v28  ;;  %v1411_v13 = vsel %vm182_vm0, %v1408_v27, %v1410_v42 }
 0x174   : > { %v1391_v8 = vadd.f32 %v1386_v15, %v1359_v4  ;;  %v1384_v20 = vadd.f32 %v1383_v57, %v1382_v32 }
 0x175   : > { %v1392_v24 = vadd.f32 %v1386_v15, %v1369_v23 }
 0x176   : > { %v1404_v56 = vrot.slane %v1391_v8, 4  ;;  %v1393_v59 = vadd.f32 %v1386_v15, %v1384_v20 }
 0x177   : > { %v1405_v2 = vrot.slane %v1392_v24, 3 }
 0x178   : > { %v1406_v14 = vrot.slane %v1393_v59, 2 }
 0x179   : > { %v1413_v25 = vsel %vm1412_vm9, %v1404_v56, %v1405_v2 }
 0x17a   : > { %v1415_v0 = vsel %vm1414_vm7, %v1413_v25, %v1406_v14 }
 0x17b   : > { %v1417_v33 = vsel %vm1416_vm8, %v1411_v13, %v1415_v0 }
 0x17c   : > { %1423 = vst.msk [vmem:[%s152_s14] sm:$0x7f] %vm1421_vm10, %v1417_v33 }
 0x17d PF: > { %s23_s21 = sadd.s32 1, %s1736_s21  }
 0x17e   : > { %p20_p4 = scmp.ge.s32.totalorder %s23_s21, 4  }
 0x180   :  { %22 = sbr.rel (!%p20_p4) target bundleno = 7 (0x7), region = 58 }

// kernel: stn_forward.2
= control target key start
LH: loop header
LB: loop body
LE: loop exit
PB: predicated region body
PF: predicated region fallthrough
CT: control target
= control target key end

     0   :  { %s3744_s30 = smov 0   ;;  %s4737_s0 = inlined_call_operand.vmem [shape: f32[2,26,90], index: 0, kind: input, shape index: {}]   ;;  %s4738_s1 = inlined_call_operand.vmem [shape: bf16[7,90,192], index: 1, kind: input, shape index: {}]   ;;  %s4739_s2 = inlined_call_operand.vmem [shape: f32[1,192], index: 2, kind: input, shape index: {}]   ;;  %s4740_s3 = inlined_call_operand.vmem [shape: bf16[5,184,80], index: 3, kind: input, shape index: {}]   ;;  %s4741_s4 = inlined_call_operand.vmem [shape: f32[1,80], index: 4, kind: input, shape index: {}]   ;;  %s4742_s5 = inlined_call_operand.vmem [shape: bf16[3,70,32], index: 5, kind: input, shape index: {}]   ;;  %s4743_s6 = inlined_call_operand.vmem [shape: f32[1,32], index: 6, kind: input, shape index: {}]   ;;  %s4744_s7 = inlined_call_operand.vmem [shape: bf16[32,6], index: 7, kind: input, shape index: {}]   ;;  %s4745_s8 = inlined_call_operand.vmem [shape: f32[1,6], index: 8, kind: input, shape index: {}]   ;;  %s4746_s9 = inlined_call_operand.vmem [shape: f32[2,1,6], index: 9, kind: output, shape index: {}]  }
   0x1 LB: > { %s2632_s10 = sadd.s32 4294967295, %s3690_s30   ;;  %p2636_p0 = scmp.ge.s32.totalorder %s3690_s30, 1  ;;  %s3690_s30 = sphi %s3744_s30, %s19_s30  }
   0x2   : > { %p287_p1 = scmp.lt.s32.totalorder %s3690_s30, 3 }
   0x4   : > { %p288_p2 = pnand %p2636_p0, %p287_p1 }
   0x5   : > { %p3792_p3 = scmp.lt.s32.totalorder (!%p288_p2), %s2632_s10, 1  ;;  %s3692_s22 = smov (!%p288_p2), 120  }
   0x6   : > { %291 = sbr.rel (%p288_p2) target bundleno = 1042 (0x412), region = 56  ;;  %s3693_s20 = smov (!%p288_p2), 118  }
   0xb   : > { %v2693_v0 = vld [vmem:[%s4738_s1 + $0xb0] sm:$0xf]  ;;  %v3513_v1 = vld [vmem:[%s4738_s1 + $0xb4] sm:$0x10]  ;;  %vm462_vm0 = vcmask 1044480   ;;  %s4751_s10 = smov (!%p3792_p3, %s2632_s10), 1 }
   0xc   : > { %v2694_v2 = vor.u32 %v3513_v1, %v2693_v0  ;;  %v3512_v3 = vld [vmem:[%s4738_s1 + $0xb4] sm:$0xf]  ;;  %v2695_v4 = vld [vmem:[%s4738_s1 + $0xb8] sm:$0x10]  ;;  %v2745_v5 = vld [vmem:[%s4738_s1 + $0x50] sm:$0xf]  ;;  %s328_s13 = scalar_lea.vmem %s4746_s9, %s4751_s10 }
   0xd   : > { %v2698_v6 = vor.u32 %v3512_v3, %v2695_v4  ;;  %v3501_v7 = vld [vmem:[%s4738_s1 + $0x54] sm:$0x10]  ;;  %v3500_v8 = vld [vmem:[%s4738_s1 + $0x54] sm:$0xf]  ;;  %v2747_v9 = vld [vmem:[%s4738_s1 + $0x58] sm:$0x10] }
   0xe   : > { %v464_v10 = vsel %vm462_vm0, %v2694_v2, 0  ;;  %v2746_v11 = vor.u32 %v3501_v7, %v2745_v5  ;;  %v2750_v12 = vor.u32 %v3500_v8, %v2747_v9  ;;  %v2685_v13 = vld [vmem:[%s4738_s1 + $0xa0] sm:$0xf]  ;;  %v3511_v14 = vld [vmem:[%s4738_s1 + $0xa4] sm:$0xf0]  ;;  %s3489_s14 = sshll.u32 %s4751_s10, 5 }
   0xf   : > { %471 = vmatpush.bf16.msra.mxu0 %v464_v10  ;;  %v467_v15 = vsel %vm462_vm0, %v2698_v6, 0  ;;  %v2686_v16 = vor.u32 %v3511_v14, %v2685_v13  ;;  %v3510_v17 = vld [vmem:[%s4738_s1 + $0xa4] sm:$0xf]  ;;  %v2687_v18 = vld [vmem:[%s4738_s1 + $0xa8] sm:$0xf0]  ;;  %s3916_s18 = scalar_lea.vmem %s4737_s0, %s3489_s14  ;;  %vm338_vm1 = vcmask 732160  }
  0x10   : > { %489 = vmatpush.bf16.msra.mxu1 %v467_v15  ;;  %v572_v19 = vsel %vm462_vm0, %v2746_v11, 0  ;;  %v575_v20 = vsel %vm462_vm0, %v2750_v12, 0  ;;  %v2690_v21 = vor.u32 %v3510_v17, %v2687_v18  ;;  %v2737_v22 = vld [vmem:[%s4738_s1 + $0x40] sm:$0xf]  ;;  %v3499_v23 = vld [vmem:[%s4738_s1 + $0x44] sm:$0xf0] }
  0x11   : > { %579 = vmatpush.bf16.msra.mxu2 %v572_v19  ;;  %597 = vmatpush.bf16.msra.mxu3 %v575_v20  ;;  %v2738_v24 = vor.u32 %v3499_v23, %v2737_v22  ;;  %v3498_v25 = vld [vmem:[%s4738_s1 + $0x44] sm:$0xf]  ;;  %v2739_v26 = vld [vmem:[%s4738_s1 + $0x48] sm:$0xf0]  ;;  %v2677_v27 = vld [vmem:[%s4738_s1 + $0x90] sm:$0xf] }
  0x12   : > { %v2742_v28 = vor.u32 %v3498_v25, %v2739_v26  ;;  %v3509_v29 = vld [vmem:[%s4738_s1 + $0x94] sm:$0xf0]  ;;  %v3508_v30 = vld [vmem:[%s4738_s1 + $0x94] sm:$0xf]  ;;  %v2679_v31 = vld [vmem:[%s4738_s1 + $0x98] sm:$0xf0] }
  0x13   : > { %472 = vmatpush.bf16.msra.mxu0 %v2686_v16  ;;  %v2678_v32 = vor.u32 %v3509_v29, %v2677_v27  ;;  %v2729_v33 = vld [vmem:[%s4738_s1 + $0x30] sm:$0xf]  ;;  %v3497_v34 = vld [vmem:[%s4738_s1 + $0x34] sm:$0xf0]  ;;  %v3496_v35 = vld [vmem:[%s4738_s1 + $0x34] sm:$0xf]  ;;  %v2682_v36 = vor.u32 %v3508_v30, %v2679_v31 }
  0x14   : > { %490 = vmatpush.bf16.msra.mxu1 %v2690_v21  ;;  %v2731_v37 = vld [vmem:[%s4738_s1 + $0x38] sm:$0xf0]  ;;  %v2669_v38 = vld [vmem:[%s4738_s1 + $0x80] sm:$0xf]  ;;  %v3507_v39 = vld [vmem:[%s4738_s1 + $0x84] sm:$0xf0]  ;;  %v2730_v40 = vor.u32 %v3497_v34, %v2729_v33 }
  0x15   : > { %580 = vmatpush.bf16.msra.mxu2 %v2738_v24  ;;  %598 = vmatpush.bf16.msra.mxu3 %v2742_v28  ;;  %v2734_v41 = vor.u32 %v3496_v35, %v2731_v37  ;;  %v3506_v42 = vld [vmem:[%s4738_s1 + $0x84] sm:$0xf]  ;;  %v2671_v43 = vld [vmem:[%s4738_s1 + $0x88] sm:$0xf0]  ;;  %v2721_v44 = vld [vmem:[%s4738_s1 + $0x20] sm:$0xf]  ;;  %v2670_v48 = vor.u32 %v3507_v39, %v2669_v38 }
  0x16   : > { %v3495_v45 = vld [vmem:[%s4738_s1 + $0x24] sm:$0xf0]  ;;  %v3494_v46 = vld [vmem:[%s4738_s1 + $0x24] sm:$0xf]  ;;  %v2723_v47 = vld [vmem:[%s4738_s1 + $0x28] sm:$0xf0]  ;;  %v2674_v49 = vor.u32 %v3506_v42, %v2671_v43 }
  0x17   : > { %473 = vmatpush.bf16.msra.mxu0 %v2678_v32  ;;  %v2661_v50 = vld [vmem:[%s4738_s1 + $0x70] sm:$0xf]  ;;  %v3505_v51 = vld [vmem:[%s4738_s1 + $0x74] sm:$0xf0]  ;;  %v3504_v52 = vld [vmem:[%s4738_s1 + $0x74] sm:$0xf]  ;;  %v2722_v53 = vor.u32 %v3495_v45, %v2721_v44  ;;  %v2726_v54 = vor.u32 %v3494_v46, %v2723_v47 }
  0x18   : > { %491 = vmatpush.bf16.msra.mxu1 %v2682_v36  ;;  %v2663_v55 = vld [vmem:[%s4738_s1 + $0x78] sm:$0xf0]  ;;  %v2713_v56 = vld [vmem:[%s4738_s1 + $0x10] sm:$0xf]  ;;  %v3493_v57 = vld [vmem:[%s4738_s1 + $0x14] sm:$0xf0]  ;;  %v2662_v61 = vor.u32 %v3505_v51, %v2661_v50 }
  0x19   : > { %581 = vmatpush.bf16.msra.mxu2 %v2730_v40  ;;  %599 = vmatpush.bf16.msra.mxu3 %v2734_v41  ;;  %v3492_v58 = vld [vmem:[%s4738_s1 + $0x14] sm:$0xf]  ;;  %v2715_v59 = vld [vmem:[%s4738_s1 + $0x18] sm:$0xf0]  ;;  %v2653_v60 = vld [vmem:[%s4738_s1 + $0x60] sm:$0xf]  ;;  %v2666_v1 = vor.u32 %v3504_v52, %v2663_v55  ;;  %v2714_v6 = vor.u32 %v3493_v57, %v2713_v56 }
  0x1a   : > { %v3503_v62 = vld [vmem:[%s4738_s1 + $0x64] sm:$0xf0]  ;;  %v3502_v63 = vld [vmem:[%s4738_s1 + $0x64] sm:$0xf]  ;;  %v2655_v0 = vld [vmem:[%s4738_s1 + $0x68] sm:$0xf0]  ;;  %v2718_v7 = vor.u32 %v3492_v58, %v2715_v59 }
  0x1b   : > { %474 = vmatpush.bf16.msra.mxu0 %v2670_v48  ;;  %v2705_v2 = vld [vmem:[%s4738_s1] sm:$0xf]  ;;  %v3491_v3 = vld [vmem:[%s4738_s1 + $0x4] sm:$0xf0]  ;;  %v3490_v4 = vld [vmem:[%s4738_s1 + $0x4] sm:$0xf]  ;;  %v2654_v11 = vor.u32 %v3503_v62, %v2653_v60  ;;  %v2658_v20 = vor.u32 %v3502_v63, %v2655_v0 }
  0x1c   : > { %492 = vmatpush.bf16.msra.mxu1 %v2674_v49  ;;  %v2707_v5 = vld [vmem:[%s4738_s1 + $0x8] sm:$0xf0]  ;;  %v3524_v8 = vld [vmem:[%s4738_s1 + $0x114] sm:$0xf]  ;;  %v2811_v9 = vld [vmem:[%s4738_s1 + $0x118] sm:$0x10]  ;;  %v2706_v24 = vor.u32 %v3491_v3, %v2705_v2 }
  0x1d   : > { %582 = vmatpush.bf16.msra.mxu2 %v2722_v53  ;;  %600 = vmatpush.bf16.msra.mxu3 %v2726_v54  ;;  %v2809_v10 = vld [vmem:[%s4738_s1 + $0x110] sm:$0xf]  ;;  %v330_v12 = vld [vmem:[%s3916_s18] sm:$0xff]  ;;  %v331_v13 = vld [vmem:[%s3916_s18 + $0x8] sm:$0xff]  ;;  %v2814_v18 = vor.u32 %v3524_v8, %v2811_v9  ;;  %v2710_v25 = vor.u32 %v3490_v4, %v2707_v5  ;;  %vm455_vm2 = vcmask 736256   ;;  %vm342_vm5 = vcmask 729088  }
  0x1e   : > { %v332_v14 = vld [vmem:[%s3916_s18 + $0x10] sm:$0xff]  ;;  %v334_v15 = vpack.c.bf16 %v330_v12, %v330_v12  ;;  %v335_v16 = vpack.c.bf16 %v331_v13, %v331_v13  ;;  %v3525_v19 = vld [vmem:[%s4738_s1 + $0x114] sm:$0x10]  ;;  %v2801_v22 = vld [vmem:[%s4738_s1 + $0x100] sm:$0xf]  ;;  %vm630_vm6 = vcmask 1046528  }
  0x1f   : > { %475 = vmatpush.bf16.msra.mxu0 %v2662_v61  ;;  %v336_v17 = vpack.c.bf16 %v332_v14, %v332_v14  ;;  %v2810_v21 = vor.u32 %v3525_v19, %v2809_v10  ;;  %v3523_v23 = vld [vmem:[%s4738_s1 + $0x104] sm:$0xf0]  ;;  %v2873_v26 = vld [vmem:[%s4738_s1 + $0x170] sm:$0xf]  ;;  %v3537_v27 = vld [vmem:[%s4738_s1 + $0x174] sm:$0x10] }
  0x20   : > { %493 = vmatpush.bf16.msra.mxu1 %v2666_v1  ;;  %339 = vst.msk [vmem:[#allocation2] sm:$0xf] %vm338_vm1, %v334_v15  ;;  %v3522_v29 = vld [vmem:[%s4738_s1 + $0x104] sm:$0xf]  ;;  %v2874_v30 = vor.u32 %v3537_v27, %v2873_v26  ;;  %v3536_v31 = vld [vmem:[%s4738_s1 + $0x174] sm:$0xf]  ;;  %v2802_v35 = vor.u32 %v3523_v23, %v2801_v22 }
  0x21   : > { %583 = vmatpush.bf16.msra.mxu2 %v2714_v6  ;;  %601 = vmatpush.bf16.msra.mxu3 %v2718_v7  ;;  %340 = vst.msk [vmem:[#allocation2 + $0x4] sm:$0xf] %vm338_vm1, %v335_v16  ;;  %v699_v28 = vsel %vm462_vm0, %v2810_v21, 0  ;;  %v702_v32 = vsel %vm462_vm0, %v2814_v18, 0  ;;  %v2875_v33 = vld [vmem:[%s4738_s1 + $0x178] sm:$0x10] }
  0x22   : > { %341 = vst.msk [vmem:[#allocation2 + $0x8] sm:$0xf] %vm338_vm1, %v336_v17  ;;  %v2803_v34 = vld [vmem:[%s4738_s1 + $0x108] sm:$0xf0]  ;;  %v846_v36 = vsel %vm462_vm0, %v2874_v30, 0  ;;  %v2878_v37 = vor.u32 %v3536_v31, %v2875_v33  ;;  %vm910_vm8 = vcmask 1045504  }
  0x23   : > { %476 = vmatpush.bf16.msra.mxu0 %v2654_v11  ;;  %v2793_v38 = vld [vmem:[%s4738_s1 + $0xf0] sm:$0xf]  ;;  %v3521_v39 = vld [vmem:[%s4738_s1 + $0xf4] sm:$0xf0]  ;;  %v2865_v40 = vld [vmem:[%s4738_s1 + $0x160] sm:$0xf]  ;;  %v2806_v45 = vor.u32 %v3522_v29, %v2803_v34 }
  0x24   : > { %494 = vmatpush.bf16.msra.mxu1 %v2658_v20  ;;  %v3535_v41 = vld [vmem:[%s4738_s1 + $0x164] sm:$0xf0]  ;;  %v849_v42 = vsel %vm462_vm0, %v2878_v37, 0  ;;  %v3534_v43 = vld [vmem:[%s4738_s1 + $0x164] sm:$0xf]  ;;  %v2794_v50 = vor.u32 %v3521_v39, %v2793_v38  ;;  %vm1339_vm9 = vcmask 1043458  }
  0x25   : > { %584 = vmatpush.bf16.msra.mxu2 %v2706_v24  ;;  %602 = vmatpush.bf16.msra.mxu3 %v2710_v25  ;;  %v2867_v44 = vld [vmem:[%s4738_s1 + $0x168] sm:$0xf0]  ;;  %v3520_v46 = vld [vmem:[%s4738_s1 + $0xf4] sm:$0xf]  ;;  %v2795_v47 = vld [vmem:[%s4738_s1 + $0xf8] sm:$0xf0]  ;;  %v2866_v48 = vor.u32 %v3535_v41, %v2865_v40 }
  0x26   : > { %v2857_v49 = vld [vmem:[%s4738_s1 + $0x150] sm:$0xf]  ;;  %v2870_v51 = vor.u32 %v3534_v43, %v2867_v44  ;;  %v3533_v52 = vld [vmem:[%s4738_s1 + $0x154] sm:$0xf0]  ;;  %v3532_v53 = vld [vmem:[%s4738_s1 + $0x154] sm:$0xf]  ;;  %v2798_v62 = vor.u32 %v3520_v46, %v2795_v47 }
  0x27   : > { %706 = vmatpush.bf16.msrb.mxu0 %v699_v28  ;;  %v2859_v54 = vld [vmem:[%s4738_s1 + $0x158] sm:$0xf0]  ;;  %v2785_v56 = vld [vmem:[%s4738_s1 + $0xe0] sm:$0xf]  ;;  %v3519_v57 = vld [vmem:[%s4738_s1 + $0xe4] sm:$0xf0]  ;;  %v2858_v1 = vor.u32 %v3533_v52, %v2857_v49 }
  0x28   : > { %724 = vmatpush.bf16.msrb.mxu1 %v702_v32  ;;  %v4000_v55 = vld [vmem:[#allocation2] sm:$0xff]   ;;  %v2787_v0 = vld [vmem:[%s4738_s1 + $0xe8] sm:$0xf0]  ;;  %v2862_v3 = vor.u32 %v3532_v53, %v2859_v54  ;;  %v2786_v4 = vor.u32 %v3519_v57, %v2785_v56  ;;  %v3531_v6 = vld [vmem:[%s4738_s1 + $0x144] sm:$0xf0]  ;;  %vm1342_vm10 = vcmask 1045508  }
  0x29   : > { %853 = vmatpush.bf16.msrb.mxu2 %v846_v36  ;;  %871 = vmatpush.bf16.msrb.mxu3 %v849_v42  ;;  %v359_v58 = vld [vmem:[#allocation2 + $0x8] sm:$0x7]  ;;  %v385_v59 = vshll.u32 %v4000_v55, 16  ;;  %v383_v61 = vshrl.u32 %v4000_v55, 16  ;;  %v3518_v63 = vld [vmem:[%s4738_s1 + $0xe4] sm:$0xf]  ;;  %v3647_v30 = vunpack.c.h.b16 %v4000_v55 }
  0x2a   : > { %2751 = vmatmul.msk.bf16.vlgmr.msra.gmra.mxu2 %vm455_vm2, %v4000_v55  ;;  %2753 = vmatmul.msk.bf16.vlgmr.msra.gmra.mxu3 %vm455_vm2, %v4000_v55  ;;  %v378_v60 = vunpack.c.l.b16 %v359_v58  ;;  %v2849_v5 = vld [vmem:[%s4738_s1 + $0x140] sm:$0xf]  ;;  %vm381_vm3 = vsmask.f32 7424  ;;  %v3530_v8 = vld [vmem:[%s4738_s1 + $0x144] sm:$0xf]  ;;  %v2790_v15 = vor.u32 %v3518_v63, %v2787_v0 }
  0x2b   : > { %707 = vmatpush.bf16.msrb.mxu0 %v2802_v35  ;;  %v387_v2 = vrot.slane %v385_v59, 1  ;;  %v2851_v9 = vld [vmem:[%s4738_s1 + $0x148] sm:$0xf0]  ;;  %v2777_v10 = vld [vmem:[%s4738_s1 + $0xd0] sm:$0xf]  ;;  %v2850_v16 = vor.u32 %v3531_v6, %v2849_v5  ;;  %v4044_v18 = vld [vmem:[#allocation2 + $0x4] sm:$0xff]  }
  0x2c   : > { %725 = vmatpush.bf16.msrb.mxu1 %v2806_v45  ;;  %v4026_v7 = vpack.c.b16 %v378_v60, %v378_v60  ;;  %v3517_v11 = vld [vmem:[%s4738_s1 + $0xd4] sm:$0xf0]  ;;  %v346_v14 = vld [vmem:[#allocation2 + $0x8] sm:$0x3]  ;;  %v3516_v17 = vld [vmem:[%s4738_s1 + $0xd4] sm:$0xf]  ;;  %v2854_v23 = vor.u32 %v3530_v8, %v2851_v9  ;;  %v761_v32 = vunpack.c.h.b16 %v4044_v18 }
  0x2d   : > { %854 = vmatpush.bf16.msrb.mxu2 %v2866_v48  ;;  %872 = vmatpush.bf16.msrb.mxu3 %v2870_v51  ;;  %v388_v12 = vor.u32 %v387_v2, %v383_v61  ;;  %v2779_v19 = vld [vmem:[%s4738_s1 + $0xd8] sm:$0xf0]  ;;  %v2841_v20 = vld [vmem:[%s4738_s1 + $0x130] sm:$0xf]  ;;  %v3529_v21 = vld [vmem:[%s4738_s1 + $0x134] sm:$0xf0]  ;;  %v2778_v24 = vor.u32 %v3517_v11, %v2777_v10  ;;  %v506_v27 = vunpack.c.l.b16 %v346_v14 }
  0x2e   : > { %v390_v13 = vshll.u32 %v4026_v7, 16  ;;  %v3528_v25 = vld [vmem:[%s4738_s1 + $0x134] sm:$0xf]  ;;  %v2843_v26 = vld [vmem:[%s4738_s1 + $0x138] sm:$0xf0]  ;;  %v2782_v34 = vor.u32 %v3516_v17, %v2779_v19  ;;  %v2842_v35 = vor.u32 %v3529_v21, %v2841_v20  ;;  %vm1337_vm11 = vcmask 1041408  }
  0x2f   : > { %708 = vmatpush.bf16.msrb.mxu0 %v2794_v50  ;;  %v2769_v28 = vld [vmem:[%s4738_s1 + $0xc0] sm:$0xf]  ;;  %v3515_v29 = vld [vmem:[%s4738_s1 + $0xc4] sm:$0xf0]  ;;  %v3514_v36 = vld [vmem:[%s4738_s1 + $0xc4] sm:$0xf]  ;;  %v2846_v42 = vor.u32 %v3528_v25, %v2843_v26  ;;  %v507_v47 = vpack.c.b16 %v506_v27, %v506_v27  ;;  %v4105_v50 = vpack.c.b16 %v761_v32, %v761_v32 }
  0x30   : > { %726 = vmatpush.bf16.msrb.mxu1 %v2798_v62  ;;  %v4055_v22 = vrot.slane %v390_v13, 1  ;;  %v613_v31 = vld [vmem:[#allocation2] sm:$0xe]  ;;  %v2771_v37 = vld [vmem:[%s4738_s1 + $0xc8] sm:$0xf0]  ;;  %v2770_v43 = vor.u32 %v3515_v29, %v2769_v28  ;;  %vm1448_vm12 = vcmask 982016  }
  0x31   : > { %855 = vmatpush.bf16.msrb.mxu2 %v2858_v1  ;;  %873 = vmatpush.bf16.msrb.mxu3 %v2862_v3  ;;  %v628_v38 = vunpack.c.l.b16 %v613_v31  ;;  %v2833_v39 = vld [vmem:[%s4738_s1 + $0x120] sm:$0xf]  ;;  %v3527_v40 = vld [vmem:[%s4738_s1 + $0x124] sm:$0xf0]  ;;  %v3548_v41 = vld [vmem:[%s4738_s1 + $0x1d4] sm:$0xf]  ;;  %v2774_v53 = vor.u32 %v3514_v36, %v2771_v37 }
  0x32   : > { %v393_v33 = vsel %vm381_vm3, %v388_v12, %v4055_v22  ;;  %v2939_v44 = vld [vmem:[%s4738_s1 + $0x1d8] sm:$0x10]  ;;  %v2937_v45 = vld [vmem:[%s4738_s1 + $0x1d0] sm:$0xf]  ;;  %v3549_v46 = vld [vmem:[%s4738_s1 + $0x1d4] sm:$0x10]  ;;  %v2834_v54 = vor.u32 %v3527_v40, %v2833_v39 }
  0x33   : > { %709 = vmatpush.bf16.msrb.mxu0 %v2786_v4  ;;  %2701 = vmatmul.msk.bf16.vlgmr.msra.gmra.mxu1 %vm455_vm2, %v393_v33  ;;  %v3526_v48 = vld [vmem:[%s4738_s1 + $0x124] sm:$0xf]  ;;  %v2835_v49 = vld [vmem:[%s4738_s1 + $0x128] sm:$0xf0]  ;;  %v2942_v51 = vor.u32 %v3548_v41, %v2939_v44  ;;  %v2938_v52 = vor.u32 %v3549_v46, %v2937_v45  ;;  %v4109_v56 = vpack.c.b16 %v3647_v30, %v628_v38  ;;  %v2929_v61 = vld [vmem:[%s4738_s1 + $0x1c0] sm:$0xf] }
  0x34   : > { %727 = vmatpush.bf16.msrb.mxu1 %v2790_v15  ;;  %2699 = vmatmul.msk.bf16.vlgmr.msra.gmra.mxu0 %vm455_vm2, %v393_v33  ;;  %v3546_v57 = vld [vmem:[%s4738_s1 + $0x1c4] sm:$0xf]  ;;  %v2931_v58 = vld [vmem:[%s4738_s1 + $0x1c8] sm:$0xf0]  ;;  %v3005_v62 = vld [vmem:[%s4738_s1 + $0x230] sm:$0xf]  ;;  %v2838_v63 = vor.u32 %v3526_v48, %v2835_v49 }
  0x35   : > { %856 = vmatpush.bf16.msrb.mxu2 %v2850_v16  ;;  %874 = vmatpush.bf16.msrb.mxu3 %v2854_v23  ;;  %v982_v59 = vsel %vm462_vm0, %v2942_v51, 0  ;;  %v979_v60 = vsel %vm462_vm0, %v2938_v52, 0  ;;  %v3547_v0 = vld [vmem:[%s4738_s1 + $0x1c4] sm:$0xf0]  ;;  %v3562_v1 = vld [vmem:[%s4738_s1 + $0x234] sm:$0x10]  ;;  %v2934_v13 = vor.u32 %v3546_v57, %v2931_v58 }
  0x36   : > { %v3561_v2 = vld [vmem:[%s4738_s1 + $0x234] sm:$0xf]  ;;  %v773_v3 = vshrl.u32 %v4105_v50, 16  ;;  %v3006_v4 = vor.u32 %v3562_v1, %v3005_v62  ;;  %v3007_v5 = vld [vmem:[%s4738_s1 + $0x238] sm:$0x10]  ;;  %v765_v6 = vshrl.u32 %v4109_v56, 16  ;;  %v2930_v14 = vor.u32 %v3547_v0, %v2929_v61 }
  0x37   : > { %710 = vmatpush.bf16.msrb.mxu0 %v2778_v24  ;;  %v768_v8 = vshll.u32 %v4109_v56, 16  ;;  %v776_v9 = vshll.u32 %v4105_v50, 16  ;;  %v3010_v10 = vor.u32 %v3561_v2, %v3007_v5  ;;  %v2997_v11 = vld [vmem:[%s4738_s1 + $0x220] sm:$0xf]  ;;  %v394_v12 = vshrl.u32 %v4026_v7, 16 }
  0x38   : > { %728 = vmatpush.bf16.msrb.mxu1 %v2782_v34  ;;  %v1136_v15 = vsel %vm462_vm0, %v3006_v4, 0  ;;  %v3560_v16 = vld [vmem:[%s4738_s1 + $0x224] sm:$0xf0]  ;;  %v3559_v17 = vld [vmem:[%s4738_s1 + $0x224] sm:$0xf]  ;;  %v767_v28 = vrot.slane %v765_v6, 1 }
  0x39   : > { %857 = vmatpush.bf16.msrb.mxu2 %v2842_v35  ;;  %875 = vmatpush.bf16.msrb.mxu3 %v2846_v42  ;;  %v1139_v19 = vsel %vm462_vm0, %v3010_v10, 0  ;;  %v3544_v20 = vld [vmem:[%s4738_s1 + $0x1b4] sm:$0xf]  ;;  %v2998_v21 = vor.u32 %v3560_v16, %v2997_v11  ;;  %v2999_v23 = vld [vmem:[%s4738_s1 + $0x228] sm:$0xf0]  ;;  %v770_v29 = vrot.slane %v768_v8, 2  ;;  %v396_v33 = vor.u32 %v394_v12, %v4055_v22 }
  0x3a   : > { %2752 = vmatmul.msk.bf16.gmra.mxu2 %vm455_vm2, %v507_v47  ;;  %2754 = vmatmul.msk.bf16.gmra.mxu3 %vm455_vm2, %v507_v47  ;;  %v2923_v24 = vld [vmem:[%s4738_s1 + $0x1b8] sm:$0xf0]  ;;  %v2921_v25 = vld [vmem:[%s4738_s1 + $0x1b0] sm:$0xf]  ;;  %v3545_v26 = vld [vmem:[%s4738_s1 + $0x1b4] sm:$0xf0]  ;;  %v3002_v27 = vor.u32 %v3559_v17, %v2999_v23 }
  0x3b   : > { %711 = vmatpush.bf16.msrb.mxu0 %v2770_v43  ;;  %v775_v31 = vrot.slane %v773_v3, 1  ;;  %v778_v32 = vrot.slane %v776_v9, 2  ;;  %v2926_v34 = vor.u32 %v3544_v20, %v2923_v24  ;;  %v2922_v35 = vor.u32 %v3545_v26, %v2921_v25  ;;  %v2989_v36 = vld [vmem:[%s4738_s1 + $0x210] sm:$0xf]  ;;  %v3558_v37 = vld [vmem:[%s4738_s1 + $0x214] sm:$0xf0] }
  0x3c   : > { %729 = vmatpush.bf16.msrb.mxu1 %v2774_v53  ;;  %v3557_v38 = vld [vmem:[%s4738_s1 + $0x214] sm:$0xf]  ;;  %vm763_vm4 = vsmask.f32 6400  ;;  %v771_v22 = vor.u32 %v770_v29, %v767_v28  ;;  %v2990_v40 = vor.u32 %v3558_v37, %v2989_v36  ;;  %v2991_v41 = vld [vmem:[%s4738_s1 + $0x218] sm:$0xf0] }
  0x3d   : > { %858 = vmatpush.bf16.msrb.mxu2 %v2834_v54  ;;  %876 = vmatpush.bf16.msrb.mxu3 %v2838_v63  ;;  %v4180_v39 = vor.u32 %v778_v32, %v775_v31  ;;  %v333_v42 = vld [vmem:[%s3916_s18 + $0x18] sm:$0x3]  ;;  %v3542_v43 = vld [vmem:[%s4738_s1 + $0x1a4] sm:$0xf]  ;;  %v2915_v44 = vld [vmem:[%s4738_s1 + $0x1a8] sm:$0xf0]  ;;  %v2994_v45 = vor.u32 %v3557_v38, %v2991_v41 }
  0x3e   : > { %v2913_v46 = vld [vmem:[%s4738_s1 + $0x1a0] sm:$0xf]  ;;  %v2918_v47 = vor.u32 %v3542_v43, %v2915_v44  ;;  %v3543_v48 = vld [vmem:[%s4738_s1 + $0x1a4] sm:$0xf0]  ;;  %v3555_v53 = vld [vmem:[%s4738_s1 + $0x204] sm:$0xf]  ;;  %v337_v3 = vpack.c.bf16 %v333_v42, %v333_v42 }
  0x3f   : > { %986 = vmatpush.bf16.msra.mxu0 %v979_v60  ;;  %v2981_v49 = vld [vmem:[%s4738_s1 + $0x200] sm:$0xf]  ;;  %v3556_v51 = vld [vmem:[%s4738_s1 + $0x204] sm:$0xf0]  ;;  %v2914_v52 = vor.u32 %v3543_v48, %v2913_v46  ;;  %v2983_v54 = vld [vmem:[%s4738_s1 + $0x208] sm:$0xf0]  ;;  %v780_v58 = vsel %vm763_vm4, %v771_v22, %v4180_v39 }
  0x40   : > { %1004 = vmatpush.bf16.msra.mxu1 %v982_v59  ;;  %v3540_v57 = vld [vmem:[%s4738_s1 + $0x194] sm:$0xf]  ;;  %v2982_v59 = vor.u32 %v3556_v51, %v2981_v49  ;;  %v2986_v60 = vor.u32 %v3555_v53, %v2983_v54  ;;  %v2907_v61 = vld [vmem:[%s4738_s1 + $0x198] sm:$0xf0]  ;;  %v2905_v62 = vld [vmem:[%s4738_s1 + $0x190] sm:$0xf] }
  0x41   : > { %1143 = vmatpush.bf16.msra.mxu2 %v1136_v15  ;;  %1161 = vmatpush.bf16.msra.mxu3 %v1139_v19  ;;  %v3541_v63 = vld [vmem:[%s4738_s1 + $0x194] sm:$0xf0]  ;;  %v2973_v0 = vld [vmem:[%s4738_s1 + $0x1f0] sm:$0xf]  ;;  %v3553_v2 = vld [vmem:[%s4738_s1 + $0x1f4] sm:$0xf]  ;;  %v2910_v4 = vor.u32 %v3540_v57, %v2907_v61 }
  0x42   : > { %v3554_v1 = vld [vmem:[%s4738_s1 + $0x1f4] sm:$0xf0]  ;;  %v2906_v5 = vor.u32 %v3541_v63, %v2905_v62  ;;  %v2975_v6 = vld [vmem:[%s4738_s1 + $0x1f8] sm:$0xf0]  ;;  %v3538_v8 = vld [vmem:[%s4738_s1 + $0x184] sm:$0xf] }
  0x43   : > { %987 = vmatpush.bf16.msra.mxu0 %v2930_v14  ;;  %2702 = vmatmul.msk.bf16.gmra.mxu1 %vm455_vm2, %v396_v33  ;;  %v2899_v9 = vld [vmem:[%s4738_s1 + $0x188] sm:$0xf0]  ;;  %v2897_v10 = vld [vmem:[%s4738_s1 + $0x180] sm:$0xf]  ;;  %v3539_v11 = vld [vmem:[%s4738_s1 + $0x184] sm:$0xf0]  ;;  %v2974_v12 = vor.u32 %v3554_v1, %v2973_v0 }
  0x44   : > { %1005 = vmatpush.bf16.msra.mxu1 %v2934_v13  ;;  %2700 = vmatmul.msk.bf16.gmra.mxu0 %vm455_vm2, %v396_v33  ;;  %v2978_v13 = vor.u32 %v3553_v2, %v2975_v6  ;;  %v2965_v14 = vld [vmem:[%s4738_s1 + $0x1e0] sm:$0xf]  ;;  %v3552_v15 = vld [vmem:[%s4738_s1 + $0x1e4] sm:$0xf0]  ;;  %v3551_v16 = vld [vmem:[%s4738_s1 + $0x1e4] sm:$0xf]  ;;  %v2898_v23 = vor.u32 %v3539_v11, %v2897_v10 }
  0x45   : > { %1144 = vmatpush.bf16.msra.mxu2 %v2998_v21  ;;  %1162 = vmatpush.bf16.msra.mxu3 %v3002_v27  ;;  %v2967_v17 = vld [vmem:[%s4738_s1 + $0x1e8] sm:$0xf0]  ;;  %343 = vst.msk [vmem:[#allocation2 + $0xc] sm:$0x1] %vm342_vm5, %v337_v3  ;;  %v631_v19 = vrot.slane %v4109_v56, 1  ;;  %v4266_v20 = vrot.slane %v4026_v7, 1  ;;  %v2902_v21 = vor.u32 %v3538_v8, %v2899_v9  ;;  %v2966_v24 = vor.u32 %v3552_v15, %v2965_v14 }
  0x46   : > { %v2970_v25 = vor.u32 %v3551_v16, %v2967_v17  ;;  %v1026_v26 = vld [vmem:[#allocation2] sm:$0xc]  ;;  %v2961_v56 = vld [vmem:[#allocation2 + $0x8] sm:$0xf]  ;;  %v1048_v7 = vunpack.c.l.b16 %v4044_v18  ;;  %v3573_v31 = vld [vmem:[%s4738_s1 + $0x294] sm:$0xf] }
  0x47   : > { %988 = vmatpush.bf16.msra.mxu0 %v2922_v35  ;;  %v633_v27 = vsel %vm630_vm6, %v631_v19, %v4266_v20  ;;  %v1047_v28 = vunpack.c.l.b16 %v1026_v26  ;;  %v3071_v32 = vld [vmem:[%s4738_s1 + $0x298] sm:$0x10]  ;;  %v3574_v35 = vld [vmem:[%s4738_s1 + $0x294] sm:$0x10]  ;;  %v3571_v36 = vld [vmem:[%s4738_s1 + $0x284] sm:$0xf] }
  0x48   : > { %1006 = vmatpush.bf16.msra.mxu1 %v2926_v34  ;;  %v3074_v33 = vor.u32 %v3573_v31, %v3071_v32  ;;  %v3069_v34 = vld [vmem:[%s4738_s1 + $0x290] sm:$0xf]  ;;  %v3063_v38 = vld [vmem:[%s4738_s1 + $0x288] sm:$0xf0]  ;;  %v3061_v22 = vld [vmem:[%s4738_s1 + $0x280] sm:$0xf] }
  0x49   : > { %1145 = vmatpush.bf16.msra.mxu2 %v2990_v40  ;;  %1163 = vmatpush.bf16.msra.mxu3 %v2994_v45  ;;  %v3070_v37 = vor.u32 %v3574_v35, %v3069_v34  ;;  %v1051_v40 = vpack.c.b16 %v1048_v7, %v1047_v28  ;;  %v3572_v43 = vld [vmem:[%s4738_s1 + $0x284] sm:$0xf0]  ;;  %v3066_v45 = vor.u32 %v3571_v36, %v3063_v38  ;;  %v3055_v48 = vld [vmem:[%s4738_s1 + $0x278] sm:$0xf0]  ;;  %v3053_v49 = vld [vmem:[%s4738_s1 + $0x270] sm:$0xf] }
  0x4a   : > { %2879 = vmatmul.msk.bf16.vlgmr.msrb.gmra.mxu2 %vm455_vm2, %v780_v58  ;;  %2881 = vmatmul.msk.bf16.vlgmr.msrb.gmra.mxu3 %vm455_vm2, %v780_v58  ;;  %v1272_v42 = vsel %vm462_vm0, %v3074_v33, 0  ;;  %v3062_v46 = vor.u32 %v3572_v43, %v3061_v22  ;;  %v3570_v51 = vld [vmem:[%s4738_s1 + $0x274] sm:$0xf0]  ;;  %v893_v63 = vld [vmem:[#allocation2] sm:$0xc]  ;;  %v912_v55 = vrot.slane %v4105_v50, 2 }
  0x4b   : > { %989 = vmatpush.bf16.msra.mxu0 %v2914_v52  ;;  %v1269_v44 = vsel %vm462_vm0, %v3070_v37, 0  ;;  %v1055_v52 = vshrl.u32 %v1051_v40, 16  ;;  %v1058_v53 = vshll.u32 %v1051_v40, 16  ;;  %vm1053_vm7 = vsmask.f32 5376 }
  0x4c   : > { %1007 = vmatpush.bf16.msra.mxu1 %v2918_v47  ;;  %v3550_v29 = vld [vmem:[#allocation2 + $0x8] sm:$0x10]  ;;  %v3569_v47 = vld [vmem:[%s4738_s1 + $0x274] sm:$0xf]  ;;  %v3567_v2 = vld [vmem:[%s4738_s1 + $0x264] sm:$0xf] }
  0x4d   : > { %1146 = vmatpush.bf16.msra.mxu2 %v2982_v59  ;;  %1164 = vmatpush.bf16.msra.mxu3 %v2986_v60  ;;  %v4295_v41 = vor.u32 %v3550_v29, %v2961_v56  ;;  %v3058_v58 = vor.u32 %v3569_v47, %v3055_v48  ;;  %v3054_v59 = vor.u32 %v3570_v51, %v3053_v49  ;;  %v1057_v60 = vrot.slane %v1055_v52, 2  ;;  %v3047_v3 = vld [vmem:[%s4738_s1 + $0x268] sm:$0xf0]  ;;  %v3568_v8 = vld [vmem:[%s4738_s1 + $0x264] sm:$0xf0] }
  0x4e   : > { %v3050_v6 = vor.u32 %v3567_v2, %v3047_v3  ;;  %v3565_v9 = vld [vmem:[%s4738_s1 + $0x254] sm:$0xf]  ;;  %v3039_v10 = vld [vmem:[%s4738_s1 + $0x258] sm:$0xf0]  ;;  %v3563_v17 = vld [vmem:[%s4738_s1 + $0x244] sm:$0xf] }
  0x4f   : > { %990 = vmatpush.bf16.msra.mxu0 %v2906_v5  ;;  %v1063_v54 = vshrl.u32 %v4295_v41, 16  ;;  %v1066_v57 = vshll.u32 %v4295_v41, 16  ;;  %v908_v5 = vunpack.c.l.b16 %v893_v63  ;;  %v3042_v15 = vor.u32 %v3565_v9, %v3039_v10  ;;  %v3031_v19 = vld [vmem:[%s4738_s1 + $0x248] sm:$0xf0] }
  0x50   : > { %1008 = vmatpush.bf16.msra.mxu1 %v2910_v4  ;;  %v3045_v4 = vld [vmem:[%s4738_s1 + $0x260] sm:$0xf]  ;;  %v1202_v29 = vrot.slane %v4295_v41, 3  ;;  %vm1580_vm13 = vcmask 1041409   ;;  %vm1626_vm14 = vcmask 1040384   ;;  %vm1627_vm15 = vcmask 454660  }
  0x51   : > { %1147 = vmatpush.bf16.msra.mxu2 %v2974_v12  ;;  %1165 = vmatpush.bf16.msra.mxu3 %v2978_v13  ;;  %v1065_v61 = vrot.slane %v1063_v54, 2  ;;  %v1068_v62 = vrot.slane %v1066_v57, 3  ;;  %v3046_v11 = vor.u32 %v3568_v8, %v3045_v4  ;;  %v3037_v12 = vld [vmem:[%s4738_s1 + $0x250] sm:$0xf]  ;;  %v3566_v13 = vld [vmem:[%s4738_s1 + $0x254] sm:$0xf0] }
  0x52   : > { %v3038_v16 = vor.u32 %v3566_v13, %v3037_v12  ;;  %vm1583_vm1 = vcmask 1042434   ;;  %vm1586_vm3 = vcmask 1043459   ;;  %vm1589_vm4 = vcmask 1044484  }
  0x53   : > { %991 = vmatpush.bf16.msra.mxu0 %v2898_v23  ;;  %2817 = vmatmul.msk.bf16.vlgmr.msrb.gmra.mxu1 %vm455_vm2, %v633_v27  ;;  %v1069_v1 = vor.u32 %v1068_v62, %v1065_v61  ;;  %v3564_v23 = vld [vmem:[%s4738_s1 + $0x244] sm:$0xf0]  ;;  %vm1592_vm5 = vcmask 1045509   ;;  %vm1595_vm6 = vcmask 1046534  }
  0x54   : > { %1009 = vmatpush.bf16.msra.mxu1 %v2902_v21  ;;  %2815 = vmatmul.msk.bf16.vlgmr.msrb.gmra.mxu0 %vm455_vm2, %v633_v27  ;;  %v3029_v21 = vld [vmem:[%s4738_s1 + $0x240] sm:$0xf] }
  0x55   : > { %1148 = vmatpush.bf16.msra.mxu2 %v2966_v24  ;;  %1166 = vmatpush.bf16.msra.mxu3 %v2970_v25  ;;  %v3034_v24 = vor.u32 %v3563_v17, %v3031_v19  ;;  %v3030_v25 = vor.u32 %v3564_v23, %v3029_v21  ;;  %v1183_v27 = vld [vmem:[#allocation2] sm:$0x8] }
  0x56   : > { %v1198_v56 = vunpack.c.l.b16 %v1183_v27 }
  0x57   : > { %1276 = vmatpush.bf16.msrb.mxu0 %v1269_v44 }
  0x58   : > { %1294 = vmatpush.bf16.msrb.mxu1 %v1272_v42  ;;  %v1199_v50 = vpack.c.b16 %v1048_v7, %v1198_v56 }
  0x5a   : > { %2880 = vmatmul.msk.bf16.gmra.mxu2 %vm455_vm2, %v4180_v39  ;;  %2882 = vmatmul.msk.bf16.gmra.mxu3 %vm455_vm2, %v4180_v39  ;;  %v1060_v39 = vrot.slane %v1058_v53, 3  ;;  %v1201_v28 = vrot.slane %v1199_v50, 3 }
  0x5b   : > { %1277 = vmatpush.bf16.msrb.mxu0 %v3062_v46 }
  0x5c   : > { %1295 = vmatpush.bf16.msrb.mxu1 %v3066_v45  ;;  %v1061_v0 = vor.u32 %v1060_v39, %v1057_v60  ;;  %v1203_v31 = vsel %vm462_vm0, %v1201_v28, %v1202_v29  ;;  %vm4485_vm0 = vmor %vm1627_vm15, %vm1626_vm14  ;;  %vm2583_vm14 = vcmask 40960  }
  0x5e   : > { %v1070_v14 = vsel %vm1053_vm7, %v1061_v0, %v1069_v1  ;;  %vm1598_vm7 = vcmask 1047559  }
  0x5f   : > { %1278 = vmatpush.bf16.msrb.mxu0 %v3054_v59 }
  0x60   : > { %1296 = vmatpush.bf16.msrb.mxu1 %v3058_v58 }
  0x63   : > { %2818 = vmatmul.msk.bf16.gmra.mxu1 %vm455_vm2, %v4266_v20  ;;  %1279 = vmatpush.bf16.msrb.mxu0 %v3046_v11 }
  0x64   : > { %2816 = vmatmul.msk.bf16.gmra.mxu0 %vm455_vm2, %v4266_v20  ;;  %1297 = vmatpush.bf16.msrb.mxu1 %v3050_v6  ;;  %v909_v20 = vpack.c.b16 %v3647_v30, %v908_v5 }
  0x66   : > { %v911_v26 = vrot.slane %v909_v20, 2 }
  0x67   : > { %1280 = vmatpush.bf16.msrb.mxu0 %v3038_v16 }
  0x68   : > { %1298 = vmatpush.bf16.msrb.mxu1 %v3042_v15  ;;  %v913_v30 = vsel %vm910_vm8, %v911_v26, %v912_v55 }
  0x6a   : > { %3011 = vmatmul.msk.bf16.vlgmr.msra.gmra.mxu2 %vm455_vm2, %v1070_v14  ;;  %3013 = vmatmul.msk.bf16.vlgmr.msra.gmra.mxu3 %vm455_vm2, %v1070_v14 }
  0x6b   : > { %1281 = vmatpush.bf16.msrb.mxu0 %v3030_v25 }
  0x6c   : > { %1299 = vmatpush.bf16.msrb.mxu1 %v3034_v24 }
  0x73   : > { %2945 = vmatmul.msk.bf16.vlgmr.msra.gmra.mxu1 %vm455_vm2, %v913_v30 }
  0x74   : > { %2943 = vmatmul.msk.bf16.vlgmr.msra.gmra.mxu0 %vm455_vm2, %v913_v30 }
  0x7a   : > { %3012 = vmatmul.msk.bf16.gmra.mxu2 %vm455_vm2, %v1069_v1  ;;  %3014 = vmatmul.msk.bf16.gmra.mxu3 %vm455_vm2, %v1069_v1 }
  0x83   : > { %2946 = vmatmul.msk.bf16.gmra.mxu1 %vm455_vm2, %v912_v55 }
  0x84   : > { %2944 = vmatmul.msk.bf16.gmra.mxu0 %vm455_vm2, %v912_v55 }
  0x93   : > { %3077 = vmatmul.msk.bf16.vlgmr.msrb.gmra.mxu1 %vm455_vm2, %v1203_v31 }
  0x94   : > { %3075 = vmatmul.msk.bf16.vlgmr.msrb.gmra.mxu0 %vm455_vm2, %v1203_v31 }
  0xa3   : > { %3078 = vmatmul.msk.bf16.gmra.mxu1 %vm455_vm2, %v1202_v29 }
  0xa4   : > { %3076 = vmatmul.msk.bf16.gmra.mxu0 %vm455_vm2, %v1202_v29  ;;  %v1316_v29 = vld [vmem:[%s4739_s2] sm:$0x3]  ;;  %vm1622_vm2 = vcmask 1043456  }
  0xad   : > { %v586_v32 = vpop.f32.mrf.mxu2  ;;  %v604_v33 = vpop.f32.mrf.mxu3 }
  0xb0   : > { %v496_v35 = vpop.f32.mrf.mxu1 }
  0xb1   : > { %v478_v34 = vpop.f32.mrf.mxu0  ;;  %v605_v18 = vadd.f32 %v604_v33, %v496_v35  ;;  %v1319_v35 = vperm.slane %v1316_v29, 1 }
  0xb2   : > { %v587_v36 = vadd.f32 %v586_v32, %v478_v34 }
  0xb5   : > { %v588_v7 = vpop.f32.mrf.mxu2  ;;  %v606_v37 = vpop.f32.mrf.mxu3 }
  0xb8   : > { %v498_v22 = vpop.f32.mrf.mxu1 }
  0xb9   : > { %v480_v38 = vpop.f32.mrf.mxu0  ;;  %v607_v41 = vadd.f32 %v606_v37, %v498_v22  ;;  %v1318_v22 = vperm.slane %v1316_v29, 0 }
  0xba   : > { %v589_v40 = vadd.f32 %v588_v7, %v480_v38 }
  0xbd   : > { %v591_v42 = vpop.f32.mrf.mxu2  ;;  %v609_v43 = vpop.f32.mrf.mxu3 }
  0xc0   : > { %v501_v45 = vpop.f32.mrf.mxu1 }
  0xc1   : > { %v483_v44 = vpop.f32.mrf.mxu0  ;;  %v4381_v47 = vadd.f32 %v609_v43, %v501_v45 }
  0xc2   : > { %v592_v46 = vadd.f32 %v591_v42, %v483_v44 }
  0xc5   : > { %v593_v48 = vpop.f32.mrf.mxu2  ;;  %v611_v49 = vpop.f32.mrf.mxu3 }
  0xc8   : > { %v503_v52 = vpop.f32.mrf.mxu1 }
  0xc9   : > { %v485_v51 = vpop.f32.mrf.mxu0 }
  0xcd   : > { %v860_v53 = vpop.f32.mrf.mxu2  ;;  %v878_v54 = vpop.f32.mrf.mxu3 }
  0xd0   : > { %v731_v58 = vpop.f32.mrf.mxu1 }
  0xd1   : > { %v713_v57 = vpop.f32.mrf.mxu0  ;;  %v741_v50 = vadd.f32 %v731_v58, %v605_v18 }
  0xd2   : > { %v740_v59 = vadd.f32 %v713_v57, %v587_v36 }
  0xd3   : > { %v888_v28 = vadd.f32 %v878_v54, %v741_v50 }
  0xd4   : > { %v887_v60 = vadd.f32 %v860_v53, %v740_v59 }
  0xd5   : > { %v862_v39 = vpop.f32.mrf.mxu2  ;;  %v880_v61 = vpop.f32.mrf.mxu3 }
  0xd8   : > { %v733_v63 = vpop.f32.mrf.mxu1 }
  0xd9   : > { %v715_v62 = vpop.f32.mrf.mxu0  ;;  %v743_v36 = vadd.f32 %v733_v63, %v607_v41 }
  0xda   : > { %v742_v0 = vadd.f32 %v715_v62, %v589_v40 }
  0xdb   : > { %v890_v42 = vadd.f32 %v880_v61, %v743_v36 }
  0xdc   : > { %v889_v1 = vadd.f32 %v862_v39, %v742_v0 }
  0xdd   : > { %v865_v2 = vpop.f32.mrf.mxu2  ;;  %v883_v3 = vpop.f32.mrf.mxu3 }
  0xe0   : > { %v736_v5 = vpop.f32.mrf.mxu1 }
  0xe1   : > { %v718_v4 = vpop.f32.mrf.mxu0  ;;  %v745_v54 = vadd.f32 %v736_v5, %v4381_v47 }
  0xe2   : > { %v744_v6 = vadd.f32 %v718_v4, %v592_v46 }
  0xe3   : > { %v892_v62 = vadd.f32 %v883_v3, %v745_v54 }
  0xe4   : > { %v891_v8 = vadd.f32 %v865_v2, %v744_v6 }
  0xe5   : > { %v867_v9 = vpop.f32.mrf.mxu2  ;;  %v885_v10 = vpop.f32.mrf.mxu3 }
  0xe8   : > { %v738_v12 = vpop.f32.mrf.mxu1 }
  0xe9   : > { %v720_v11 = vpop.f32.mrf.mxu0 }
  0xed   : > { %v1150_v13 = vpop.f32.mrf.mxu2  ;;  %v1168_v14 = vpop.f32.mrf.mxu3 }
  0xf0   : > { %v1011_v16 = vpop.f32.mrf.mxu1 }
  0xf1   : > { %v993_v15 = vpop.f32.mrf.mxu0  ;;  %v1021_v32 = vadd.f32 %v1011_v16, %v888_v28 }
  0xf2   : > { %v1020_v31 = vadd.f32 %v993_v15, %v887_v60 }
  0xf3   : > { %v1178_v34 = vadd.f32 %v1168_v14, %v1021_v32 }
  0xf4   : > { %v1177_v33 = vadd.f32 %v1150_v13, %v1020_v31 }
  0xf5   : > { %v1152_v17 = vpop.f32.mrf.mxu2  ;;  %v1170_v19 = vpop.f32.mrf.mxu3 }
  0xf8   : > { %v1013_v21 = vpop.f32.mrf.mxu1 }
  0xf9   : > { %v995_v20 = vpop.f32.mrf.mxu0  ;;  %v1023_v44 = vadd.f32 %v1013_v21, %v890_v42 }
  0xfa   : > { %v1022_v18 = vadd.f32 %v995_v20, %v889_v1 }
  0xfb   : > { %v1180_v49 = vadd.f32 %v1170_v19, %v1023_v44 }
  0xfc   : > { %v1179_v48 = vadd.f32 %v1152_v17, %v1022_v18 }
  0xfd   : > { %v1155_v23 = vpop.f32.mrf.mxu2  ;;  %v1173_v24 = vpop.f32.mrf.mxu3 }
 0x100   : > { %v1016_v26 = vpop.f32.mrf.mxu1 }
 0x101   : > { %v998_v25 = vpop.f32.mrf.mxu0  ;;  %v1025_v6 = vadd.f32 %v1016_v26, %v892_v62  ;;  %v3604_v62 = vld [vmem:[%s4740_s3 + $0xf0] sm:$0xff] }
 0x102   : > { %v1024_v4 = vadd.f32 %v998_v25, %v891_v8  ;;  %2016 = vmatpush.bf16.msra.mxu1 %v3604_v62 }
 0x103   : > { %v1182_v5 = vadd.f32 %v1173_v24, %v1025_v6  ;;  %v3591_v6 = vld [vmem:[%s4740_s3 + $0x84] sm:$0xff] }
 0x104   : > { %v1181_v47 = vadd.f32 %v1155_v23, %v1024_v4 }
 0x105   : > { %v1175_v55 = vpop.f32.mrf.mxu3  ;;  %v1157_v30 = vpop.f32.mrf.mxu2 }
 0x108   : > { %v1018_v56 = vpop.f32.mrf.mxu1 }
 0x109   : > { %v1000_v27 = vpop.f32.mrf.mxu0 }
 0x110   : > { %v1301_v37 = vpop.f32.mrf.mxu1 }
 0x111   : > { %v1283_v7 = vpop.f32.mrf.mxu0  ;;  %v1311_v40 = vadd.f32 %v1301_v37, %v1178_v34 }
 0x112   : > { %v1310_v38 = vadd.f32 %v1283_v7, %v1177_v33 }
 0x113   : > { %v1323_v43 = vadd.f32 %v1319_v35, %v1311_v40 }
 0x114   : > { %v1322_v45 = vadd.f32 %v1318_v22, %v1310_v38 }
 0x115   : > { %v1334_v46 = vrot.slane %v1323_v43, 6 }
 0x117   : > { %v1340_v51 = vsel %vm1339_vm9, %v1322_v45, %v1334_v46  ;;  %v1343_v41 = vsel %vm1342_vm10, %v1322_v45, %v1334_v46  ;;  %v1338_v52 = vsel %vm1337_vm11, %v1322_v45, %v1334_v46  ;;  %v1346_v53 = vsel %vm910_vm8, %v1334_v46, %v1322_v45 }
 0x118   : > { %v1303_v58 = vpop.f32.mrf.mxu1  ;;  %v1341_v59 = vrot.slane %v1340_v51, 2  ;;  %v1344_v60 = vrot.slane %v1343_v41, 4  ;;  %v1347_v1 = vrot.slane %v1346_v53, 6  ;;  %v3079_v20 = vrot.slane %v1338_v52, 9  ;;  %v3582_v51 = vld [vmem:[%s4740_s3 + $0x38] sm:$0xff]  ;;  %v3581_v41 = vld [vmem:[%s4740_s3 + $0x30] sm:$0xff] }
 0x119   : > { %v1285_v57 = vpop.f32.mrf.mxu0  ;;  %v1313_v61 = vadd.f32 %v1303_v58, %v1180_v49  ;;  %1882 = vmatpush.bf16.msra.mxu0 %v3582_v51  ;;  %v3593_v53 = vld [vmem:[%s4740_s3 + $0x94] sm:$0xff] }
 0x11a   : > { %v1312_v39 = vadd.f32 %v1285_v57, %v1179_v48  ;;  %v3080_v63 = vrot.slane %v1341_v59, 9  ;;  %v3081_v0 = vrot.slane %v1344_v60, 9  ;;  %v3082_v14 = vrot.slane %v1347_v1, 9  ;;  %1775 = vmatpush.bf16.msrb.mxu2 %v3593_v53  ;;  %v3626_v53 = vld [vmem:[%s4740_s3 + $0x1a8] sm:$0xff] }
 0x11b   : > { %v1325_v2 = vadd.f32 %v1319_v35, %v1313_v61  ;;  %v4404_v50 = vmax.f32 %v1338_v52, %v3079_v20  ;;  %v3580_v52 = vld [vmem:[%s4740_s3 + $0x28] sm:$0xff] }
 0x11c   : > { %v4391_v9 = vmax.f32 %v1341_v59, %v3080_v63  ;;  %v4393_v10 = vmax.f32 %v1344_v60, %v3081_v0  ;;  %v1324_v11 = vadd.f32 %v1318_v22, %v1312_v39  ;;  %v4402_v26 = vmax.f32 %v1347_v1, %v3082_v14  ;;  %v3579_v59 = vld [vmem:[%s4740_s3 + $0x20] sm:$0xff]  ;;  %v3592_v60 = vld [vmem:[%s4740_s3 + $0x8c] sm:$0xff]  ;;  %v3578_v1 = vld [vmem:[%s4740_s3 + $0x18] sm:$0xff] }
 0x11d   : > { %v1335_v12 = vrot.slane %v1325_v2, 6  ;;  %1883 = vmatpush.bf16.msra.mxu0 %v3581_v41 }
 0x11e   : > { %v3658_v13 = vpack.i.bf16 %v4393_v10, %v4391_v9  ;;  %v3663_v33 = vpack.i.bf16 %v4402_v26, %v4404_v50  ;;  %1776 = vmatpush.bf16.msrb.mxu2 %v3592_v60 }
 0x11f   : > { %v1348_v3 = vsel %vm1337_vm11, %v1324_v11, %v1335_v12  ;;  %v1349_v15 = vsel %vm1339_vm9, %v1324_v11, %v1335_v12  ;;  %v1351_v16 = vsel %vm1342_vm10, %v1324_v11, %v1335_v12  ;;  %v1353_v8 = vsel %vm910_vm8, %v1335_v12, %v1324_v11 }
 0x120   : > { %v1306_v17 = vpop.f32.mrf.mxu1  ;;  %3659 = vrot.lane.b32.xlu0 %v3658_v13, %s3692_s22  ;;  %v1350_v21 = vrot.slane %v1349_v15, 2  ;;  %v3083_v23 = vrot.slane %v1348_v3, 9  ;;  %v1352_v30 = vrot.slane %v1351_v16, 4  ;;  %v1354_v27 = vrot.slane %v1353_v8, 6 }
 0x121   : > { %v1288_v19 = vpop.f32.mrf.mxu0  ;;  %v1315_v24 = vadd.f32 %v1306_v17, %v1182_v5  ;;  %1884 = vmatpush.bf16.msra.mxu0 %v3580_v52  ;;  %v3603_v5 = vld [vmem:[%s4740_s3 + $0xe8] sm:$0xff]  ;;  %vm1623_vm8 = vcmask 457732   ;;  %vm1768_vm10 = vcmask 457728  }
 0x122   : > { %v1314_v25 = vadd.f32 %v1288_v19, %v1181_v47  ;;  %v3084_v55 = vrot.slane %v1350_v21, 9  ;;  %v4406_v28 = vmax.f32 %v1348_v3, %v3083_v23  ;;  %v3085_v36 = vrot.slane %v1352_v30, 9  ;;  %1777 = vmatpush.bf16.msrb.mxu2 %v3591_v6  ;;  %v3577_v3 = vld [vmem:[%s4740_s3 + $0x10] sm:$0xff]  ;;  %2017 = vmatpush.bf16.msra.mxu1 %v3603_v5  ;;  %v3590_v19 = vld [vmem:[%s4740_s3 + $0x7c] sm:$0xff]  ;;  %v3587_v6 = vld [vmem:[%s4740_s3 + $0x64] sm:$0xff] }
 0x123   : > { %v1327_v56 = vadd.f32 %v1319_v35, %v1315_v24  ;;  %v3086_v7 = vrot.slane %v1354_v27, 9  ;;  %v3588_v52 = vld [vmem:[%s4740_s3 + $0x6c] sm:$0xff] }
 0x124   : > { %v4408_v29 = vmax.f32 %v1350_v21, %v3084_v55  ;;  %v1326_v32 = vadd.f32 %v1318_v22, %v1314_v25  ;;  %v4418_v43 = vmax.f32 %v1352_v30, %v3085_v36  ;;  %v3602_v25 = vld [vmem:[%s4740_s3 + $0xe0] sm:$0xff]  ;;  %v3599_v5 = vld [vmem:[%s4740_s3 + $0xc8] sm:$0xff] }
 0x125   : > { %v1336_v31 = vrot.slane %v1327_v56, 6  ;;  %v4420_v18 = vmax.f32 %v1354_v27, %v3086_v7  ;;  %1885 = vmatpush.bf16.msra.mxu0 %v3579_v59  ;;  %v3576_v27 = vld [vmem:[%s4740_s3 + $0x8] sm:$0xff] }
 0x126   : > { %v3668_v34 = vpack.i.bf16 %v4408_v29, %v4406_v28  ;;  %1778 = vmatpush.bf16.msrb.mxu2 %v3590_v19  ;;  %2018 = vmatpush.bf16.msra.mxu1 %v3602_v25  ;;  %v3598_v25 = vld [vmem:[%s4740_s3 + $0xc0] sm:$0xff] }
 0x127   : > { %v1355_v37 = vsel %vm1337_vm11, %v1326_v32, %v1336_v31  ;;  %v1356_v35 = vsel %vm1339_vm9, %v1326_v32, %v1336_v31  ;;  %v3673_v48 = vpack.i.bf16 %v4420_v18, %v4418_v43  ;;  %v3589_v32 = vld [vmem:[%s4740_s3 + $0x74] sm:$0xff]  ;;  %vm1624_vm9 = vmor %vm1623_vm8, %vm1622_vm2  ;;  %vm2415_vm11 = vcmask 1042432  }
 0x128   : > { %3664 = vrot.lane.b32.xlu0 %v3663_v33, %s3692_s22  ;;  %3669 = vrot.lane.b32.xlu1 %v3668_v34, %s3692_s22  ;;  %v1357_v38 = vrot.slane %v1356_v35, 2  ;;  %v3087_v40 = vrot.slane %v1355_v37, 9  ;;  %v1308_v42 = vpop.f32.mrf.mxu1 }
 0x129   : > { %v1290_v22 = vpop.f32.mrf.mxu0  ;;  %1886 = vmatpush.bf16.msra.mxu0 %v3578_v1  ;;  %v3601_v42 = vld [vmem:[%s4740_s3 + $0xd8] sm:$0xff] }
 0x12a   : > { %v3088_v44 = vrot.slane %v1357_v38, 9  ;;  %v1406_v45 = vmax.f32 %v1355_v37, %v3087_v40  ;;  %1779 = vmatpush.bf16.msrb.mxu2 %v3589_v32  ;;  %2019 = vmatpush.bf16.msra.mxu1 %v3601_v42  ;;  %v3111_v32 = vld [vmem:[%s4740_s3 + $0xb4] sm:$0xf]  ;;  %v3597_v42 = vld [vmem:[%s4740_s3 + $0xb8] sm:$0xff] }
 0x12c   : > { %v1407_v46 = vmax.f32 %v1357_v38, %v3088_v44 }
 0x12d   : > { %1887 = vmatpush.bf16.msra.mxu0 %v3577_v3  ;;  %v3586_v3 = vld [vmem:[%s4740_s3 + $0x5c] sm:$0xff] }
 0x12e   : > { %v3678_v49 = vpack.i.bf16 %v1406_v45, %v1407_v46  ;;  %1780 = vmatpush.bf16.msrb.mxu2 %v3588_v52  ;;  %v3622_v52 = vld [vmem:[%s4740_s3 + $0x188] sm:$0xff] }
 0x130   : > { %3674 = vrot.lane.b32.xlu1 %v3673_v48, %s3692_s22  ;;  %3679 = vrot.lane.b32.xlu2 %v3678_v49, %s3692_s22 }
 0x131   : > { %1888 = vmatpush.bf16.msra.mxu0 %v3576_v27  ;;  %v3623_v27 = vld [vmem:[%s4740_s3 + $0x190] sm:$0xff] }
 0x132   : > { %1781 = vmatpush.bf16.msrb.mxu2 %v3587_v6 }
 0x136   : > { %1782 = vmatpush.bf16.msrb.mxu2 %v3586_v3 }
 0x18a   : > { %v3680_v54 = vpop.permute.xlu2 %3679 }
 0x18b   : > { %v3682_v57 = vunpack.i.h.bf16 %v3680_v54  ;;  %v3681_v58 = vunpack.i.l.bf16 %v3680_v54 }
 0x18d   : > { %v1446_v39 = vrot.slane %v3682_v57, 2  ;;  %v1447_v61 = vrot.slane %v3681_v58, 2 }
 0x18f   : > { %v1457_v63 = vsel %vm1448_vm12, %v3682_v57, %v1446_v39  ;;  %v1458_v0 = vsel %vm1448_vm12, %v3681_v58, %v1447_v61 }
 0x190   : > { %v1477_v2 = vmax.f32 %v1406_v45, %v1457_v63  ;;  %v1478_v4 = vmax.f32 %v1407_v46, %v1458_v0  ;;  %v3600_v63 = vld [vmem:[%s4740_s3 + $0xd0] sm:$0xff] }
 0x191   : > { %2020 = vmatpush.bf16.msra.mxu1 %v3600_v63 }
 0x192   : > { %v1487_v11 = vmax.f32 %v1477_v2, 0.0  ;;  %v1488_v12 = vmax.f32 %v1478_v4, 0.0  ;;  %v3660_v47 = vpop.permute.xlu0 %3659 }
 0x193   : > { %v3662_v13 = vunpack.i.h.bf16 %v3660_v47  ;;  %v3661_v14 = vunpack.i.l.bf16 %v3660_v47 }
 0x194   : > { %v1515_v15 = vperm.slane %v1487_v11, 0  ;;  %v1516_v16 = vperm.slane %v1487_v11, 2  ;;  %v1517_v8 = vperm.slane %v1488_v12, 0  ;;  %v1518_v17 = vperm.slane %v1488_v12, 2  ;;  %v3625_v11 = vld [vmem:[%s4740_s3 + $0x1a0] sm:$0xff] }
 0x195   : > { %v1440_v20 = vrot.slane %v3662_v13, 2  ;;  %v1439_v21 = vrot.slane %v3661_v14, 2  ;;  %2021 = vmatpush.bf16.msra.mxu1 %v3599_v5 }
 0x196   : > { %v1547_v23 = vpack.c.bf16 %v1516_v16, %v1515_v15  ;;  %v1548_v24 = vpack.c.bf16 %v1518_v17, %v1517_v8 }
 0x197   : > { %v1451_v55 = vsel %vm1448_vm12, %v3662_v13, %v1440_v20  ;;  %v1450_v30 = vsel %vm1448_vm12, %v3661_v14, %v1439_v21 }
 0x198   : > { %v1577_v56 = vunpack.c.l.b16 %v1548_v24  ;;  %v1578_v31 = vunpack.c.h.b16 %v1548_v24  ;;  %v1471_v33 = vmax.f32 %v4393_v10, %v1451_v55  ;;  %v1470_v34 = vmax.f32 %v4391_v9, %v1450_v30  ;;  %v3575_v9 = vld [vmem:[%s4740_s3] sm:$0xff] }
 0x199   : > { %v1575_v36 = vunpack.c.l.b16 %v1547_v23  ;;  %v1576_v7 = vunpack.c.h.b16 %v1547_v23  ;;  %1889 = vmatpush.bf16.msra.mxu0 %v3575_v9  ;;  %2022 = vmatpush.bf16.msra.mxu1 %v3598_v25 }
 0x19a   : > { %v1614_v37 = vrot.slane %v1577_v56, 7  ;;  %v1616_v35 = vrot.slane %v1578_v31, 7  ;;  %v3665_v38 = vpop.permute.xlu0 %3664  ;;  %v3670_v40 = vpop.permute.xlu1 %3669  ;;  %v1481_v22 = vmax.f32 %v1471_v33, 0.0  ;;  %v1480_v44 = vmax.f32 %v1470_v34, 0.0 }
 0x19b   : > { %v3667_v45 = vunpack.i.h.bf16 %v3665_v38  ;;  %v3666_v46 = vunpack.i.l.bf16 %v3665_v38  ;;  %v3672_v51 = vunpack.i.h.bf16 %v3670_v40  ;;  %v3671_v41 = vunpack.i.l.bf16 %v3670_v40 }
 0x19c   : > { %v1615_v48 = vsel %vm1580_vm13, %v1614_v37, %v1575_v36  ;;  %v1617_v49 = vsel %vm1580_vm13, %v1616_v35, %v1576_v7  ;;  %v1503_v57 = vperm.slane %v1481_v22, 0  ;;  %v1504_v39 = vperm.slane %v1481_v22, 2 }
 0x19d   : > { %v1619_v54 = vpack.c.b16 %v1617_v49, %v1615_v48  ;;  %v1441_v58 = vrot.slane %v3667_v45, 2  ;;  %v1438_v59 = vrot.slane %v3666_v46, 2  ;;  %v1443_v60 = vrot.slane %v3672_v51, 2  ;;  %2304 = vmatpush.bf16.msrb.mxu0 %v3626_v53  ;;  %v1653_v48 = vld [vmem:[%s4740_s3 + $0x58] sm:$0xf]  ;;  %2023 = vmatpush.bf16.msra.mxu1 %v3597_v42 }
 0x19e   : > { %v1501_v61 = vperm.slane %v1480_v44, 0  ;;  %v1442_v62 = vrot.slane %v3671_v41, 2  ;;  %v1502_v0 = vperm.slane %v1480_v44, 2  ;;  %v1744_v44 = vunpack.c.l.b16 %v3111_v32  ;;  %v3360_v53 = vld [vmem:[%s4740_s3 + $0x1c8] sm:$0xf]  ;;  %v3620_v32 = vld [vmem:[%s4740_s3 + $0x178] sm:$0xff] }
 0x19f   : > { %1629 = vst.msk [vmem:[#allocation3 + $0x8] sm:$0x11] %vm4485_vm0, %v1619_v54  ;;  %v1452_v1 = vsel %vm1448_vm12, %v3667_v45, %v1441_v58  ;;  %v1449_v2 = vsel %vm1448_vm12, %v3666_v46, %v1438_v59  ;;  %v1454_v4 = vsel %vm1448_vm12, %v3672_v51, %v1443_v60 }
 0x1a0   : > { %v1472_v12 = vmax.f32 %v4402_v26, %v1452_v1  ;;  %v1469_v47 = vmax.f32 %v4404_v50, %v1449_v2  ;;  %v1474_v13 = vmax.f32 %v4408_v29, %v1454_v4  ;;  %v1453_v14 = vsel %vm1448_vm12, %v3671_v41, %v1442_v62  ;;  %v3624_v26 = vld [vmem:[%s4740_s3 + $0x198] sm:$0xff]  ;;  %v3621_v4 = vld [vmem:[%s4740_s3 + $0x180] sm:$0xff] }
 0x1a1   : > { %2305 = vmatpush.bf16.msrb.mxu0 %v3625_v11  ;;  %v1541_v50 = vpack.c.bf16 %v1504_v39, %v1503_v57  ;;  %v1540_v17 = vpack.c.bf16 %v1502_v0, %v1501_v61  ;;  %v1473_v29 = vmax.f32 %v4406_v28, %v1453_v14  ;;  %v1756_v61 = vpack.c.b16 %v1744_v44, %v1744_v44  ;;  %v3596_v14 = vld [vmem:[%s4740_s3 + $0xac] sm:$0xff] }
 0x1a2   : > { %v1482_v15 = vmax.f32 %v1472_v12, 0.0  ;;  %v1479_v16 = vmax.f32 %v1469_v47, 0.0  ;;  %v4524_v8 = vpop.permute.xlu1 %3674  ;;  %v1484_v19 = vmax.f32 %v1474_v13, 0.0  ;;  %v1852_v62 = vunpack.c.l.b16 %v1653_v48 }
 0x1a3   : > { %v1483_v55 = vmax.f32 %v1473_v29, 0.0  ;;  %v3677_v30 = vunpack.i.h.bf16 %v4524_v8  ;;  %v1563_v56 = vunpack.c.l.b16 %v1541_v50  ;;  %v1564_v33 = vunpack.c.h.b16 %v1541_v50 }
 0x1a4   : > { %v1505_v20 = vperm.slane %v1482_v15, 0  ;;  %v1506_v21 = vperm.slane %v1482_v15, 2  ;;  %v1499_v23 = vperm.slane %v1479_v16, 0  ;;  %v1500_v24 = vperm.slane %v1479_v16, 2 }
 0x1a5   : > { %2306 = vmatpush.bf16.msrb.mxu0 %v3624_v26  ;;  %v1561_v34 = vunpack.c.l.b16 %v1540_v17  ;;  %v1562_v36 = vunpack.c.h.b16 %v1540_v17  ;;  %v1445_v7 = vrot.slane %v3677_v30, 2  ;;  %v1509_v37 = vperm.slane %v1484_v19, 0  ;;  %v3224_v26 = vld [vmem:[%s4740_s3 + $0x110] sm:$0xf] }
 0x1a6   : > { %v1542_v28 = vpack.c.bf16 %v1506_v21, %v1505_v20  ;;  %v1539_v31 = vpack.c.bf16 %v1500_v24, %v1499_v23  ;;  %v1510_v35 = vperm.slane %v1484_v19, 2  ;;  %v1507_v38 = vperm.slane %v1483_v55, 0  ;;  %v3585_v24 = vld [vmem:[%s4740_s3 + $0x50] sm:$0xff] }
 0x1a7   : > { %v1508_v40 = vperm.slane %v1483_v55, 2  ;;  %v3676_v22 = vunpack.i.l.bf16 %v4524_v8  ;;  %v1456_v10 = vsel %vm1448_vm12, %v3677_v30, %v1445_v7  ;;  %v1582_v49 = vrot.slane %v1563_v56, 6  ;;  %v3629_v55 = vld [vmem:[%s4740_s3 + $0x1c0] sm:$0xff] }
 0x1a8   : > { %v1565_v45 = vunpack.c.l.b16 %v1542_v28  ;;  %v1559_v46 = vunpack.c.l.b16 %v1539_v31  ;;  %v1560_v9 = vunpack.c.h.b16 %v1539_v31  ;;  %v1602_v51 = vrot.slane %v1564_v33, 6  ;;  %v3595_v31 = vld [vmem:[%s4740_s3 + $0xa4] sm:$0xff] }
 0x1a9   : > { %2307 = vmatpush.bf16.msrb.mxu0 %v3623_v27  ;;  %v1579_v41 = vrot.slane %v1561_v34, 7  ;;  %v1600_v54 = vrot.slane %v1562_v36, 7  ;;  %v1566_v57 = vunpack.c.h.b16 %v1542_v28  ;;  %v4551_v58 = vpack.c.bf16 %v1510_v35, %v1509_v37 }
 0x1aa   : > { %v1543_v59 = vpack.c.bf16 %v1508_v40, %v1507_v38  ;;  %v1476_v60 = vmax.f32 %v4420_v18, %v1456_v10  ;;  %v1444_v39 = vrot.slane %v3676_v22, 2  ;;  %v1585_v63 = vrot.slane %v1565_v45, 5  ;;  %v3584_v38 = vld [vmem:[%s4740_s3 + $0x48] sm:$0xff]  ;;  %v3628_v40 = vld [vmem:[%s4740_s3 + $0x1b8] sm:$0xff] }
 0x1ab   : > { %v1581_v0 = vsel %vm1580_vm13, %v1579_v41, %v1559_v46  ;;  %v1601_v1 = vsel %vm1580_vm13, %v1600_v54, %v1560_v9  ;;  %v2274_v2 = vunpack.c.l.b16 %v3360_v53  ;;  %v1773_v12 = vsel %vm1622_vm2, %v1756_v61, 0  ;;  %v3594_v46 = vld [vmem:[%s4740_s3 + $0x9c] sm:$0xff]  ;;  %v3619_v9 = vld [vmem:[%s4740_s3 + $0x170] sm:$0xff] }
 0x1ac   : > { %v1486_v6 = vmax.f32 %v1476_v60, 0.0  ;;  %v1455_v11 = vsel %vm1448_vm12, %v3676_v22, %v1444_v39  ;;  %v1864_v18 = vpack.c.b16 %v1852_v62, %v1852_v62  ;;  %v1567_v47 = vunpack.c.l.b16 %v1543_v59  ;;  %1792 = vmatpush.bf16.msrb.mxu3 %v1773_v12 }
 0x1ad   : > { %2308 = vmatpush.bf16.msrb.mxu0 %v3622_v52  ;;  %v1568_v5 = vunpack.c.h.b16 %v1543_v59  ;;  %v1475_v13 = vmax.f32 %v4418_v43, %v1455_v11  ;;  %v2286_v3 = vpack.c.b16 %v2274_v2, %v2274_v2  ;;  %v1604_v50 = vrot.slane %v1566_v57, 5  ;;  %v3627_v59 = vld [vmem:[%s4740_s3 + $0x1b0] sm:$0xff]  ;;  %v3605_v2 = vld [vmem:[%s4740_s3 + $0xf8] sm:$0xff] }
 0x1ae   : > { %v1584_v15 = vsel %vm1583_vm1, %v1582_v49, %v1581_v0  ;;  %v1513_v16 = vperm.slane %v1486_v6, 0  ;;  %v1514_v8 = vperm.slane %v1486_v6, 2  ;;  %v1603_v17 = vsel %vm1583_vm1, %v1602_v51, %v1601_v1  ;;  %v3606_v1 = vld [vmem:[%s4740_s3 + $0x100] sm:$0xff] }
 0x1af   : > { %v1485_v19 = vmax.f32 %v1475_v13, 0.0  ;;  %v1880_v43 = vsel %vm1622_vm2, %v1864_v18, 0  ;;  %v2302_v29 = vsel %vm1622_vm2, %v2286_v3, 0  ;;  %v1569_v20 = vunpack.c.l.b16 %v4551_v58 }
 0x1b0   : > { %v1570_v21 = vunpack.c.h.b16 %v4551_v58  ;;  %v1546_v23 = vpack.c.bf16 %v1514_v8, %v1513_v16  ;;  %1899 = vmatpush.bf16.msra.mxu2 %v1880_v43  ;;  %2321 = vmatpush.bf16.msrb.mxu1 %v2302_v29  ;;  %v1986_v25 = vunpack.c.l.b16 %v3224_v26  ;;  %v1588_v30 = vrot.slane %v1567_v47, 4  ;;  %v3583_v58 = vld [vmem:[%s4740_s3 + $0x40] sm:$0xff] }
 0x1b1   : > { %2309 = vmatpush.bf16.msrb.mxu0 %v3621_v4  ;;  %v1606_v27 = vrot.slane %v1568_v5, 4  ;;  %v1511_v56 = vperm.slane %v1485_v19, 0  ;;  %v1512_v28 = vperm.slane %v1485_v19, 2  ;;  %1793 = vmatpush.bf16.msrb.mxu3 %v3596_v14  ;;  %v1587_v33 = vsel %vm1586_vm3, %v1585_v63, %v1584_v15  ;;  %v3607_v63 = vld [vmem:[%s4740_s3 + $0x108] sm:$0xff] }
 0x1b2   : > { %v1605_v34 = vsel %vm1586_vm3, %v1604_v50, %v1603_v17  ;;  %v1573_v36 = vunpack.c.l.b16 %v1546_v23  ;;  %v1574_v7 = vunpack.c.h.b16 %v1546_v23  ;;  %v1998_v35 = vpack.c.b16 %v1986_v25, %v1986_v25  ;;  %v3292_v4 = vld [vmem:[%s4740_s3 + $0x16c] sm:$0xf] }
 0x1b3   : > { %v1545_v37 = vpack.c.bf16 %v1512_v28, %v1511_v56  ;;  %v1590_v42 = vsel %vm1589_vm4, %v1588_v30, %v1587_v33  ;;  %v1607_v22 = vsel %vm1589_vm4, %v1606_v27, %v1605_v34  ;;  %v1591_v10 = vrot.slane %v1569_v20, 3  ;;  %v2044_v30 = vld [vmem:[#allocation3 + $0x8] sm:$0x11]  ;;  %v3614_v28 = vld [vmem:[%s4740_s3 + $0x144] sm:$0xff] }
 0x1b4   : > { %1900 = vmatpush.bf16.msra.mxu2 %v3585_v24  ;;  %2322 = vmatpush.bf16.msrb.mxu1 %v3629_v55  ;;  %v1608_v48 = vrot.slane %v1570_v21, 3  ;;  %v1597_v49 = vrot.slane %v1573_v36, 1  ;;  %v1612_v51 = vrot.slane %v1574_v7, 1  ;;  %v2014_v53 = vsel %vm1622_vm2, %v1998_v35, 0  ;;  %v3615_v24 = vld [vmem:[%s4740_s3 + $0x14c] sm:$0xff]  ;;  %v3618_v33 = vld [vmem:[%s4740_s3 + $0x164] sm:$0xff] }
 0x1b5   : > { %2310 = vmatpush.bf16.msrb.mxu0 %v3620_v32  ;;  %v1571_v44 = vunpack.c.l.b16 %v1545_v37  ;;  %v1572_v45 = vunpack.c.h.b16 %v1545_v37  ;;  %1794 = vmatpush.bf16.msrb.mxu3 %v3595_v31  ;;  %v1593_v54 = vsel %vm1592_vm5, %v1591_v10, %v1590_v42  ;;  %v2139_v14 = vunpack.c.l.b16 %v3292_v4  ;;  %v3613_v7 = vld [vmem:[%s4740_s3 + $0x13c] sm:$0xff]  ;;  %v3611_v10 = vld [vmem:[%s4740_s3 + $0x12c] sm:$0xff] }
 0x1b6   : > { %v1609_v57 = vsel %vm1592_vm5, %v1608_v48, %v1607_v22  ;;  %v2073_v31 = vunpack.c.l.b16 %v2044_v30  ;;  %v2074_v34 = vunpack.c.h.b16 %v2044_v30  ;;  %v3612_v22 = vld [vmem:[%s4740_s3 + $0x134] sm:$0xff]  ;;  %vm2411_vm12 = vcmask 572416  }
 0x1b7   : > { %v1594_v41 = vrot.slane %v1571_v44, 2  ;;  %v1610_v52 = vrot.slane %v1572_v45, 2  ;;  %v2151_v19 = vpack.c.b16 %v2139_v14, %v2139_v14  ;;  %vm2566_vm13 = vcmask 261120  }
 0x1b8   : > { %1901 = vmatpush.bf16.msra.mxu2 %v3584_v38  ;;  %2323 = vmatpush.bf16.msrb.mxu1 %v3628_v40  ;;  %v3617_v38 = vld [vmem:[%s4740_s3 + $0x15c] sm:$0xff] }
 0x1b9   : > { %2311 = vmatpush.bf16.msrb.mxu0 %v3619_v9  ;;  %v1596_v60 = vsel %vm1595_vm6, %v1594_v41, %v1593_v54  ;;  %v1611_v39 = vsel %vm1595_vm6, %v1610_v52, %v1609_v57  ;;  %1795 = vmatpush.bf16.msrb.mxu3 %v3594_v46  ;;  %v2167_v27 = vsel %vm1622_vm2, %v2151_v19, 0  ;;  %v3616_v46 = vld [vmem:[%s4740_s3 + $0x154] sm:$0xff]  ;;  %v3610_v52 = vld [vmem:[%s4740_s3 + $0x124] sm:$0xff]  ;;  %v3609_v57 = vld [vmem:[%s4740_s3 + $0x11c] sm:$0xff] }
 0x1ba   : > { %v1599_v61 = vsel %vm1598_vm7, %v1597_v49, %v1596_v60  ;;  %v1613_v62 = vsel %vm1598_vm7, %v1612_v51, %v1611_v39 }
 0x1bb   : > { %v1618_v0 = vpack.c.b16 %v1613_v62, %v1599_v61  ;;  %v3608_v61 = vld [vmem:[%s4740_s3 + $0x114] sm:$0xff] }
 0x1bc   : > { %1902 = vmatpush.bf16.msra.mxu2 %v3583_v58  ;;  %2324 = vmatpush.bf16.msrb.mxu1 %v3627_v59 }
 0x1bd   : > { %2033 = vmatpush.bf16.msra.mxu3 %v2014_v53  ;;  %1625 = vst.msk [vmem:[#allocation3] sm:$0xff] %vm1624_vm9, %v1618_v0 }
 0x1c1   : > { %2034 = vmatpush.bf16.msra.mxu3 %v3607_v63 }
 0x1c4   : > { %v1630_v6 = vld [vmem:[#allocation3] sm:$0x77] }
 0x1c5   : > { %2035 = vmatpush.bf16.msra.mxu3 %v3606_v1  ;;  %v1908_v11 = vld [vmem:[#allocation3] sm:$0xee]  ;;  %v1802_v18 = vunpack.c.l.b16 %v1630_v6  ;;  %v1803_v44 = vunpack.c.h.b16 %v1630_v6 }
 0x1c6   : > { %v1654_v12 = vld [vmem:[#allocation3] sm:$0xff]  ;;  %v1934_v47 = vunpack.c.l.b16 %v1908_v11  ;;  %v1935_v35 = vunpack.c.h.b16 %v1908_v11 }
 0x1c7   : > { %v1680_v5 = vunpack.c.l.b16 %v1654_v12  ;;  %v1681_v13 = vunpack.c.h.b16 %v1654_v12  ;;  %v1804_v3 = vpack.c.b16 %v1802_v18, %v1802_v18  ;;  %v2196_v23 = vld [vmem:[#allocation3] sm:$0xcc]  ;;  %v1805_v48 = vpack.c.b16 %v1803_v44, %v1803_v44 }
 0x1c8   : > { %v1936_v26 = vpack.c.b16 %v1934_v47, %v1934_v47  ;;  %v2222_v56 = vunpack.c.l.b16 %v2196_v23  ;;  %v2223_v32 = vunpack.c.h.b16 %v2196_v23  ;;  %v1937_v45 = vpack.c.b16 %v1935_v35, %v1935_v35  ;;  %v2043_v9 = vld [vmem:[#allocation3] sm:$0xee] }
 0x1c9   : > { %2036 = vmatpush.bf16.msra.mxu3 %v3605_v2  ;;  %v1682_v50 = vpack.c.b16 %v1680_v5, %v1680_v5  ;;  %v1683_v15 = vpack.c.b16 %v1681_v13, %v1681_v13  ;;  %1890 = vmatmul.bf16.vlgmr.msra.gmra.mxu0 %v1804_v3  ;;  %v2072_v51 = vunpack.c.h.b16 %v2043_v9  ;;  %v2071_v41 = vunpack.c.l.b16 %v2043_v9 }
 0x1ca   : > { %v1938_v16 = vrot.slane %v1936_v26, 1  ;;  %v2224_v36 = vpack.c.b16 %v2073_v31, %v2222_v56  ;;  %v2225_v37 = vpack.c.b16 %v2074_v34, %v2223_v32  ;;  %v1939_v49 = vrot.slane %v1937_v45, 1  ;;  %v3631_v56 = vld [vmem:[%s4742_s5 + $0x8] sm:$0xff] }
 0x1cb   : > { %v1687_v8 = vshll.u32 %v1682_v50, 16  ;;  %v1694_v17 = vshll.u32 %v1683_v15, 16  ;;  %v1685_v43 = vshrl.u32 %v1682_v50, 16  ;;  %v1692_v20 = vshrl.u32 %v1683_v15, 16 }
 0x1cc   : > { %2024 = vmatmul.bf16.vlgmr.msra.gmra.mxu1 %v1938_v16  ;;  %v2226_v40 = vrot.slane %v2224_v36, 2  ;;  %v2227_v42 = vrot.slane %v2225_v37, 2  ;;  %v2076_v53 = vpack.c.b16 %v2074_v34, %v2072_v51  ;;  %v2075_v54 = vpack.c.b16 %v2073_v31, %v2071_v41  ;;  %v2383_v16 = vld [vmem:[%s4742_s5 + $0x20] sm:$0x7]  ;;  %v3434_v51 = vld [vmem:[%s4742_s5 + $0x44] sm:$0x7] }
 0x1cd   : > { %v1689_v29 = vrot.slane %v1687_v8, 1  ;;  %v1696_v21 = vrot.slane %v1694_v17, 1  ;;  %v2401_v19 = vunpack.c.l.b16 %v2383_v16  ;;  %v3460_v41 = vld [vmem:[%s4742_s5 + $0x68] sm:$0x7]  ;;  %v3642_v16 = vld [vmem:[%s4744_s7] sm:$0xff] }
 0x1ce   : > { %v2078_v58 = vshrl.u32 %v2075_v54, 16  ;;  %v2081_v59 = vshll.u32 %v2075_v54, 16  ;;  %v2086_v60 = vshrl.u32 %v2076_v53, 16  ;;  %v2089_v39 = vshll.u32 %v2076_v53, 16 }
 0x1cf   : > { %v1690_v25 = vor.u32 %v1689_v29, %v1685_v43  ;;  %v1697_v55 = vor.u32 %v1696_v21, %v1692_v20  ;;  %v2406_v43 = vpack.c.b16 %v2401_v19, %v2401_v19  ;;  %v3633_v20 = vld [vmem:[%s4742_s5 + $0x18] sm:$0xff]  ;;  %v2517_v53 = vunpack.c.l.b16 %v3460_v41  ;;  %v2374_v19 = vld [vmem:[%s4743_s6] sm:$0x1] }
 0x1d0   : > { %v2080_v62 = vrot.slane %v2078_v58, 1  ;;  %v2083_v63 = vrot.slane %v2081_v59, 2  ;;  %v2088_v0 = vrot.slane %v2086_v60, 1  ;;  %v2091_v1 = vrot.slane %v2089_v39, 2  ;;  %v3637_v60 = vld [vmem:[%s4742_s5 + $0x3c] sm:$0xff] }
 0x1d1   : > { %1783 = vmatmul.bf16.vlgmr.msrb.gmra.mxu2 %v1690_v25  ;;  %3156 = vmatmul.msk.bf16.vlgmr.msrb.gmra.mxu3 %vm1768_vm10, %v1697_v55  ;;  %v2417_v29 = vsel %vm2415_vm11, %v2406_v43, 0  ;;  %v3632_v25 = vld [vmem:[%s4742_s5 + $0x10] sm:$0xff]  ;;  %v3641_v39 = vld [vmem:[%s4742_s5 + $0x60] sm:$0xff] }
 0x1d2   : > { %2169 = vmatpush.bf16.msrb.mxu2 %v3615_v24  ;;  %2186 = vmatpush.bf16.msrb.mxu3 %v2167_v27  ;;  %v2084_v2 = vor.u32 %v2083_v63, %v2080_v62  ;;  %v2092_v4 = vor.u32 %v2091_v1, %v2088_v0  ;;  %v3640_v62 = vld [vmem:[%s4742_s5 + $0x58] sm:$0xff]  ;;  %v3635_v63 = vld [vmem:[%s4742_s5 + $0x2c] sm:$0xff]  ;;  %v3634_v1 = vld [vmem:[%s4742_s5 + $0x24] sm:$0xff] }
 0x1d3   : > { %v3639_v0 = vld [vmem:[%s4742_s5 + $0x50] sm:$0xff] }
 0x1d6   : > { %2170 = vmatpush.bf16.msrb.mxu2 %v3614_v28  ;;  %2187 = vmatpush.bf16.msrb.mxu3 %v3618_v33 }
 0x1d9   : > { %2312 = vmatmul.bf16.vlgmr.msrb.gmra.mxu0 %v2226_v40 }
 0x1da   : > { %2171 = vmatpush.bf16.msrb.mxu2 %v3613_v7  ;;  %2188 = vmatpush.bf16.msrb.mxu3 %v3617_v38  ;;  %v3683_v7 = vld [vmem:[%s4741_s4] ss:$0 sm:$0xff] }
 0x1dc   : > { %3405 = vmatmul.msk.bf16.vlgmr.msrb.gmra.mxu1 %vm1768_vm10, %v2227_v42 }
 0x1de   : > { %2172 = vmatpush.bf16.msrb.mxu2 %v3612_v22  ;;  %2189 = vmatpush.bf16.msrb.mxu3 %v3616_v46 }
 0x1e1   : > { %3201 = vmatmul.msk.bf16.vlgmr.msra.gmra.mxu2 %vm1768_vm10, %v1805_v48  ;;  %3269 = vmatmul.msk.bf16.vlgmr.msra.gmra.mxu3 %vm1768_vm10, %v1939_v49  ;;  %v3630_v49 = vld [vmem:[%s4742_s5] sm:$0xff] }
 0x1e2   : > { %2173 = vmatpush.bf16.msrb.mxu2 %v3611_v10  ;;  %2422 = vmatpush.bf16.msra.mxu3 %v2417_v29 }
 0x1e6   : > { %2174 = vmatpush.bf16.msrb.mxu2 %v3610_v52  ;;  %2423 = vmatpush.bf16.msra.mxu3 %v3633_v20  ;;  %v2460_v52 = vunpack.c.l.b16 %v3434_v51 }
 0x1e8   : > { %v2465_v54 = vpack.c.b16 %v2460_v52, %v2460_v52 }
 0x1ea   : > { %2175 = vmatpush.bf16.msrb.mxu2 %v3609_v57  ;;  %2424 = vmatpush.bf16.msra.mxu3 %v3632_v25  ;;  %v2522_v57 = vpack.c.b16 %v2517_v53, %v2517_v53  ;;  %v2474_v58 = vsel %vm2415_vm11, %v2465_v54, 0 }
 0x1eb   : > { %2479 = vmatpush.bf16.msra.mxu1 %v2474_v58 }
 0x1ec   : > { %v2531_v59 = vsel %vm2415_vm11, %v2522_v57, 0 }
 0x1ee   : > { %2176 = vmatpush.bf16.msrb.mxu2 %v3608_v61  ;;  %2425 = vmatpush.bf16.msra.mxu3 %v3631_v56  ;;  %v3636_v61 = vld [vmem:[%s4742_s5 + $0x34] sm:$0xff] }
 0x1ef   : > { %2480 = vmatpush.bf16.msra.mxu1 %v3637_v60 }
 0x1f1   : > { %2177 = vmatmul.bf16.vlgmr.msrb.gmra.mxu2 %v2084_v2  ;;  %3337 = vmatmul.msk.bf16.vlgmr.msrb.gmra.mxu3 %vm1768_vm10, %v2092_v4  ;;  %v3638_v2 = vld [vmem:[%s4742_s5 + $0x48] sm:$0xff] }
 0x1f2   : > { %2426 = vmatpush.bf16.msra.mxu3 %v3630_v49  ;;  %2536 = vmatpush.bf16.msra.mxu2 %v2531_v59 }
 0x1f3   : > { %2481 = vmatpush.bf16.msra.mxu1 %v3636_v61 }
 0x1f6   : > { %2537 = vmatpush.bf16.msra.mxu2 %v3641_v39 }
 0x1f7   : > { %2482 = vmatpush.bf16.msra.mxu1 %v3635_v63 }
 0x1fa   : > { %2538 = vmatpush.bf16.msra.mxu2 %v3640_v62 }
 0x1fb   : > { %2483 = vmatpush.bf16.msra.mxu1 %v3634_v1 }
 0x1fe   : > { %2539 = vmatpush.bf16.msra.mxu2 %v3639_v0 }
 0x202   : > { %2540 = vmatpush.bf16.msra.mxu2 %v3638_v2 }
 0x246   : > { %v1891_v6 = vpop.f32.mrf.mxu0 }
 0x249   : > { %v2025_v11 = vpop.f32.mrf.mxu1 }
 0x24e   : > { %v1893_v12 = vpop.f32.mrf.mxu0 }
 0x251   : > { %v2027_v18 = vpop.f32.mrf.mxu1 }
 0x254   : > { %v1784_v47 = vpop.f32.mrf.mxu2  ;;  %v1797_v5 = vpop.f32.mrf.mxu3 }
 0x255   : > { %v1798_v21 = vadd.f32 %v1797_v5, %v1784_v47 }
 0x256   : > { %v2313_v13 = vpop.f32.mrf.mxu0 }
 0x257   : > { %v1892_v55 = vadd.f32 %v1891_v6, %v1798_v21 }
 0x259   : > { %v2326_v14 = vpop.f32.mrf.mxu1 }
 0x25a   : > { %v2327_v34 = vadd.f32 %v2326_v14, %v2313_v13 }
 0x25c   : > { %v1786_v3 = vpop.f32.mrf.mxu2  ;;  %v1799_v26 = vpop.f32.mrf.mxu3 }
 0x25e   : > { %v2315_v50 = vpop.f32.mrf.mxu0 }
 0x261   : > { %v2328_v15 = vpop.f32.mrf.mxu1 }
 0x262   : > { %v3643_v15 = vld [vmem:[%s4744_s7 + $0x8] sm:$0xff] }
 0x263   : > { %2576 = vmatpush.bf16.msrb.mxu3 %v3643_v15 }
 0x264   : > { %v1904_v8 = vpop.f32.mrf.mxu2  ;;  %v2038_v17 = vpop.f32.mrf.mxu3 }
 0x265   : > { %v1905_v30 = vadd.f32 %v1904_v8, %v1892_v55  ;;  %v2039_v27 = vadd.f32 %v2038_v17, %v2025_v11 }
 0x267   : > { %v2042_v32 = vadd.f32 %v2039_v27, %v1905_v30  ;;  %2577 = vmatpush.bf16.msrb.mxu3 %v3642_v16  ;;  %v2553_v27 = vld [vmem:[%s4745_s8] sm:$0x1] }
 0x26c   : > { %v1906_v23 = vpop.f32.mrf.mxu2  ;;  %v2040_v24 = vpop.f32.mrf.mxu3 }
 0x274   : > { %v2178_v28 = vpop.f32.mrf.mxu2  ;;  %v2191_v31 = vpop.f32.mrf.mxu3 }
 0x275   : > { %v2192_v33 = vadd.f32 %v2191_v31, %v2178_v28 }
 0x277   : > { %v2195_v36 = vadd.f32 %v2192_v33, %v2042_v32 }
 0x279   : > { %v2330_v37 = vadd.f32 %v2327_v34, %v2195_v36 }
 0x27b   : > { %v2335_v35 = vadd.f32 %v3683_v7, %v2330_v37 }
 0x27c   : > { %v2180_v38 = vpop.f32.mrf.mxu2  ;;  %v2193_v40 = vpop.f32.mrf.mxu3 }
 0x27d   : > { %v3406_v42 = vrot.slane %v2335_v35, 9  ;;  %v2338_v22 = vrot.slane %v2335_v35, 4  ;;  %v2337_v44 = vrot.slane %v2335_v35, 2 }
 0x27f   : > { %v2350_v45 = vmax.f32 %v2335_v35, %v3406_v42  ;;  %v3408_v46 = vrot.slane %v2338_v22, 9  ;;  %v3407_v9 = vrot.slane %v2337_v44, 9 }
 0x281   : > { %2356 = vrot.lane.b32.xlu2 %v2350_v45, %s3693_s20  ;;  %v2352_v10 = vmax.f32 %v2338_v22, %v3408_v46  ;;  %v2351_v48 = vmax.f32 %v2337_v44, %v3407_v9 }
 0x283   : > { %2360 = vrot.lane.b32.xlu0 %v2352_v10, %s3693_s20  ;;  %2358 = vrot.lane.b32.xlu1 %v2351_v48, %s3693_s20 }
 0x2db   : > { %v2357_v4 = vpop.permute.xlu2 %2356 }
 0x2dc   : > { %v2365_v6 = vmax.f32 %v2350_v45, %v2357_v4 }
 0x2de   : > { %v2368_v11 = vmax.f32 %v2365_v6, 0.0 }
 0x2e0   : > { %v2371_v12 = vpack.c.bf16 %v2368_v11, %v2368_v11 }
 0x2e2   : > { %3425 = vmatmul.msk.bf16.vlgmr.msra.gmra.mxu3 %vm2411_vm12, %v2371_v12 }
 0x2f5   : > { %v2361_v18 = vpop.permute.xlu0 %2360  ;;  %v2359_v47 = vpop.permute.xlu1 %2358 }
 0x2f6   : > { %v2367_v5 = vmax.f32 %v2352_v10, %v2361_v18  ;;  %v2366_v13 = vmax.f32 %v2351_v48, %v2359_v47 }
 0x2f8   : > { %v2370_v14 = vmax.f32 %v2367_v5, 0.0  ;;  %v2369_v3 = vmax.f32 %v2366_v13, 0.0 }
 0x2fa   : > { %v2373_v26 = vpack.c.bf16 %v2370_v14, %v2370_v14  ;;  %v2372_v50 = vpack.c.bf16 %v2369_v3, %v2369_v3 }
 0x2fc   : > { %3451 = vmatmul.msk.bf16.vlgmr.msra.gmra.mxu1 %vm2411_vm12, %v2372_v50  ;;  %3477 = vmatmul.msk.bf16.vlgmr.msra.gmra.mxu2 %vm2411_vm12, %v2373_v26 }
 0x365   : > { %v2428_v8 = vpop.f32.mrf.mxu3 }
 0x366   : > { %v2432_v29 = vadd.f32 %v2428_v8, %v2374_v19 }
 0x36d   : > { %v2430_v17 = vpop.f32.mrf.mxu3 }
 0x379   : > { %v2485_v43 = vpop.f32.mrf.mxu1 }
 0x37a   : > { %v2489_v20 = vadd.f32 %v2485_v43, %v2432_v29 }
 0x37f   : > { %v2542_v21 = vpop.f32.mrf.mxu2 }
 0x380   : > { %v2546_v23 = vadd.f32 %v2542_v21, %v2489_v20 }
 0x381   : > { %v2487_v24 = vpop.f32.mrf.mxu1 }
 0x382   : > { %v2547_v25 = vmax.f32 %v2546_v23, 0.0 }
 0x384   : > { %v2548_v55 = vpack.c.bf16 %v2547_v25, %v2547_v25 }
 0x386   : > { %3486 = vmatmul.msk.bf16.vlgmr.msrb.gmra.mxu3 %vm2566_vm13, %v2548_v55 }
 0x387   : > { %v2544_v30 = vpop.f32.mrf.mxu2 }
 0x409   : > { %v2579_v56 = vpop.f32.mrf.mxu3 }
 0x40a   : > { %v2580_v28 = vadd.f32 %v2579_v56, %v2553_v27 }
 0x40c   : > { %2584 = vst.msk [vmem:[%s328_s13] sm:$0x1] %vm2583_vm14, %v2580_v28 }
 0x411   : > { %v2581_v31 = vpop.f32.mrf.mxu3 }
 0x412 PF: > { %s19_s30 = sadd.s32 1, %s3690_s30  }
 0x413   : > { %p16_p4 = scmp.ge.s32.totalorder %s19_s30, 4  }
 0x415   :  { %18 = sbr.rel (!%p16_p4) target bundleno = 1 (0x1), region = 98 }

</bundles_post_ra>
